<compile_context>
chip_gen: v6e
topology: v6e:2x2x1
jax: 0.10.0
libtpu: 0.0.40
codegen_flags: <defaults>
</compile_context>

<pallas_src>
import functools

import jax
import jax.numpy as jnp
from jax.experimental import pallas as pl
from jax.experimental.pallas import tpu as pltpu


# --------------------------------------------------------------------------
# helpers
# --------------------------------------------------------------------------
def _round_up(x, m):
    return ((x + m - 1) // m) * m


def _mlp_vmem_limit(tm, fin, hid, outc):
    xin = 2 * tm * fin * 4
    w = 2 * (fin * hid + hid * hid + hid * outc) * 4
    rows = 2 * 6 * max(hid, outc) * 4
    zout = 2 * tm * outc * 2
    hout = 2 * tm * outc * 4
    need = xin + w + rows + zout + hout
    return min(int(need * 1.5) + (4 << 20), 40 << 20)


def _hop_vmem_limit(n, c, tm, tn, x_itemsize, x_resident):
    a = 2 * tm * tn * 2                                   # bf16 A tiles, double buffered
    xb = 2 * (n if x_resident else tn) * c * x_itemsize   # x (resident or streamed)
    hin = 2 * tm * c * 4
    acc = tm * c * 4
    xout = 2 * tm * c * x_itemsize
    hout = 2 * tm * c * 4
    need = a + xb + hin + acc + xout + hout
    return min(int(need * 1.25) + (4 << 20), 40 << 20)


# --------------------------------------------------------------------------
# Kernel 1: fused 3-layer MLP (Linear + ReLU + folded-BN, Linear + ReLU +
# folded-BN, Linear) + fused `hidden0 = temp[0] * z` epilogue.
# Tiled over node-row blocks; weights resident (constant index_maps).
# Outputs: z (bf16, feeds the first propagation hop) and hidden0 (f32).
# --------------------------------------------------------------------------
def mlp_kernel(g0_ref, x_ref, w1_ref, b1_ref, s1_ref, t1_ref,
               w2_ref, b2_ref, s2_ref, t2_ref, w3_ref, b3_ref,
               z_ref, h0_ref):
    x = x_ref[...]                                                       # (TM, FIN_P)

    h1 = jnp.dot(x, w1_ref[...], preferred_element_type=jnp.float32) + b1_ref[...]
    h1 = jnp.maximum(h1, 0.0)                                            # ReLU
    h1 = h1 * s1_ref[...] + t1_ref[...]                                  # BN1 (inference, folded)

    h2 = jnp.dot(h1, w2_ref[...], preferred_element_type=jnp.float32) + b2_ref[...]
    h2 = jnp.maximum(h2, 0.0)                                            # ReLU
    h2 = h2 * s2_ref[...] + t2_ref[...]                                  # BN2 (inference, folded)

    z = jnp.dot(h2, w3_ref[...], preferred_element_type=jnp.float32) + b3_ref[...]
    z_ref[...] = z.astype(z_ref.dtype)                                   # bf16 for hop chain
    h0_ref[...] = g0_ref[0] * z                                          # temp[0] * z (f32)


def mlp_forward(x_pad, gamma0, w1, b1, s1, t1, w2, b2, s2, t2, w3, b3,
                *, tm=512, z_dtype=jnp.bfloat16):
    n, fin = x_pad.shape
    hid = w1.shape[1]
    outc = w3.shape[1]
    tm = min(tm, n)
    assert n % tm == 0

    g0 = jnp.reshape(gamma0, (1,)).astype(jnp.float32)
    const = lambda i: (0, 0)
    rows = lambda i: (i, 0)

    return pl.pallas_call(
        mlp_kernel,
        out_shape=(jax.ShapeDtypeStruct((n, outc), z_dtype),      # z
                   jax.ShapeDtypeStruct((n, outc), jnp.float32)), # hidden0 = temp[0]*z
        grid=(n // tm,),
        in_specs=[
            pl.BlockSpec(memory_space=pltpu.MemorySpace.SMEM),    # temp[0] scalar
            pl.BlockSpec((tm, fin), rows),                        # x tile
            pl.BlockSpec((fin, hid), const),                      # W1^T
            pl.BlockSpec((1, hid), const),                        # b1
            pl.BlockSpec((1, hid), const),                        # bn1 scale
            pl.BlockSpec((1, hid), const),                        # bn1 shift
            pl.BlockSpec((hid, hid), const),                      # W2^T
            pl.BlockSpec((1, hid), const),                        # b2
            pl.BlockSpec((1, hid), const),                        # bn2 scale
            pl.BlockSpec((1, hid), const),                        # bn2 shift
            pl.BlockSpec((hid, outc), const),                     # W3^T
            pl.BlockSpec((1, outc), const),                       # b3
        ],
        out_specs=(pl.BlockSpec((tm, outc), rows),
                   pl.BlockSpec((tm, outc), rows)),
        compiler_params=pltpu.CompilerParams(
            dimension_semantics=("parallel",),
            vmem_limit_bytes=_mlp_vmem_limit(tm, fin, hid, outc)),
    )(g0, x_pad, w1, b1, s1, t1, w2, b2, s2, t2, w3, b3)


# --------------------------------------------------------------------------
# Kernel 2: one GPR propagation hop.
#   x_out      = A_hat @ x                          (bf16 operands, f32 acc)
#   hidden_out = hidden_in + gamma * (A_hat @ x)    (fused into the epilogue)
# Grid: (row tiles, col/reduction tiles).  A_hat (bf16) streams through a
# double-buffered pipeline; x is fully VMEM-resident when it fits (fetched
# ONCE per hop), hidden_in is resident across the reduction axis.
# --------------------------------------------------------------------------
def gpr_step_kernel(gamma_ref, a_ref, x_ref, hin_ref, xout_ref, hout_ref,
                    acc_ref, *, x_resident):
    j = pl.program_id(1)

    @pl.when(j == 0)
    def _():
        acc_ref[...] = jnp.zeros_like(acc_ref)

    if x_resident:
        tn = a_ref.shape[1]
        off = pl.multiple_of(j * tn, tn)
        xblk = x_ref[pl.ds(off, tn), :]                    # slice the resident x
    else:
        xblk = x_ref[...]                                  # streamed (tn, c) block

    acc_ref[...] += jnp.dot(a_ref[...], xblk, preferred_element_type=jnp.float32)

    @pl.when(j == pl.num_programs(1) - 1)
    def _():
        xn = acc_ref[...]
        xout_ref[...] = xn.astype(xout_ref.dtype)
        hout_ref[...] = hin_ref[...] + gamma_ref[0] * xn


def gpr_propagate_step(a_hat, x, hidden, gamma, *, tm=512, tn=512,
                       x_resident=None, x_resident_budget=16 << 20):
    n, c = x.shape
    assert a_hat.shape == (n, n)
    tm = min(tm, n)
    tn = min(tn, n)
    assert n % tm == 0 and n % tn == 0

    if x_resident is None:
        x_resident = (2 * n * c * x.dtype.itemsize) <= x_resident_budget

    gamma_arr = jnp.reshape(gamma, (1,)).astype(jnp.float32)

    if x_resident:
        x_spec = pl.BlockSpec((n, c), lambda i, j: (0, 0))     # fetched once per hop
    else:
        x_spec = pl.BlockSpec((tn, c), lambda i, j: (j, 0))    # streamed fallback

    kernel = functools.partial(gpr_step_kernel, x_resident=x_resident)

    # On v5e, if xprof shows exposed DMA on the A_hat stream, add
    # `pipeline_mode=pl.Buffered(3)` to the A_hat BlockSpec below.
    return pl.pallas_call(
        kernel,
        out_shape=(jax.ShapeDtypeStruct((n, c), x.dtype),        # x_out (bf16)
                   jax.ShapeDtypeStruct((n, c), jnp.float32)),   # hidden_out
        grid=(n // tm, n // tn),
        in_specs=[
            pl.BlockSpec(memory_space=pltpu.MemorySpace.SMEM),   # gamma scalar
            pl.BlockSpec((tm, tn), lambda i, j: (i, j)),         # A_hat tile (bf16, streamed)
            x_spec,                                              # x
            pl.BlockSpec((tm, c), lambda i, j: (i, 0)),          # hidden_in (resident over j)
        ],
        out_specs=(
            pl.BlockSpec((tm, c), lambda i, j: (i, 0)),
            pl.BlockSpec((tm, c), lambda i, j: (i, 0)),
        ),
        scratch_shapes=[pltpu.VMEM((tm, c), jnp.float32)],
        input_output_aliases={3: 1},                             # hidden_in -> hidden_out
        compiler_params=pltpu.CompilerParams(
            dimension_semantics=("parallel", "arbitrary"),
            vmem_limit_bytes=_hop_vmem_limit(n, c, tm, tn,
                                             x.dtype.itemsize, x_resident)),
    )(gamma_arr, a_hat, x, hidden)


# --------------------------------------------------------------------------
# Full GPRGNN forward (inference).  The K hops reuse ONE traced pallas_call
# via lax.fori_loop (hops are inherently sequential: each needs the fully
# updated node features of the previous one).
# --------------------------------------------------------------------------
def gprgnn_forward(x_pad, a_hat, temp, mlp_params, K, tile):
    z, hidden = mlp_forward(x_pad, temp[0], *mlp_params, tm=tile)

    def hop_body(k, carry):
        xk, hid = carry
        gamma = jax.lax.dynamic_slice(temp, (k + 1,), (1,))
        return gpr_propagate_step(a_hat, xk, hid, gamma, tm=tile, tn=tile)

    _, hidden = jax.lax.fori_loop(0, K, hop_body, (z, hidden))
    return hidden
    # TODO(synk): training-mode dropout / BatchNorm batch statistics are not
    # implemented (eval-mode semantics only), matching the deterministic forward.


# --------------------------------------------------------------------------
# Demo / self-test
# --------------------------------------------------------------------------
if __name__ == "__main__":
    N = 900                        # nodes (padded to a multiple of TILE below)
    IN_C, HID_C, OUT_C = 32, 64, 16
    K, ALPHA = 10, 0.1             # GPR_prop, Init='PPR'
    PAD = 128                      # lane-dense padded feature width
    TILE = 512                     # node-row / A_hat tile

    key = jax.random.PRNGKey(0)
    (k_x, k_adj, k_w1, k_b1, k_w2, k_b2, k_w3, k_b3,
     k_g1, k_bt1, k_g2, k_bt2) = jax.random.split(key, 12)

    # ---- node features ----
    x = jax.random.normal(k_x, (N, IN_C), dtype=jnp.float32)

    # ---- dense symmetric adjacency; gcn_norm adds self-loops ----
    a = (jax.random.uniform(k_adj, (N, N)) < 0.05).astype(jnp.float32)
    a = jnp.clip(a + a.T, 0.0, 1.0) * (1.0 - jnp.eye(N, dtype=jnp.float32))
    a1 = a + jnp.eye(N, dtype=jnp.float32)
    deg = jnp.sum(a1, axis=1)
    dinv = 1.0 / jnp.sqrt(deg)                        # deg >= 1 (self loops)
    a_hat = dinv[:, None] * a1 * dinv[None, :]        # D^{-1/2}(A+I)D^{-1/2}

    # ---- MLP parameters (PyTorch-style uniform fan-in init) ----
    def lin_init(kw, kb, fout, fin):
        bound = 1.0 / (fin ** 0.5)
        W = jax.random.uniform(kw, (fout, fin), minval=-bound, maxval=bound, dtype=jnp.float32)
        b = jax.random.uniform(kb, (fout,), minval=-bound, maxval=bound, dtype=jnp.float32)
        return W, b

    W1, b1 = lin_init(k_w1, k_b1, HID_C, IN_C)
    W2, b2 = lin_init(k_w2, k_b2, HID_C, HID_C)
    W3, b3 = lin_init(k_w3, k_b3, OUT_C, HID_C)

    # BatchNorm1d (inference): fold into per-channel scale/shift.
    eps = 1e-5
    g1 = jax.random.uniform(k_g1, (HID_C,), minval=0.8, maxval=1.2, dtype=jnp.float32)
    bt1 = jax.random.uniform(k_bt1, (HID_C,), minval=-0.1, maxval=0.1, dtype=jnp.float32)
    g2 = jax.random.uniform(k_g2, (HID_C,), minval=0.8, maxval=1.2, dtype=jnp.float32)
    bt2 = jax.random.uniform(k_bt2, (HID_C,), minval=-0.1, maxval=0.1, dtype=jnp.float32)
    rm1 = jnp.zeros((HID_C,), jnp.float32); rv1 = jnp.ones((HID_C,), jnp.float32)
    rm2 = jnp.zeros((HID_C,), jnp.float32); rv2 = jnp.ones((HID_C,), jnp.float32)
    bn1_scale = g1 / jnp.sqrt(rv1 + eps); bn1_shift = bt1 - rm1 * bn1_scale
    bn2_scale = g2 / jnp.sqrt(rv2 + eps); bn2_shift = bt2 - rm2 * bn2_scale

    # ---- GPR coefficients (PPR init) ----
    ks = jnp.arange(K + 1, dtype=jnp.float32)
    temp = ALPHA * (1.0 - ALPHA) ** ks
    temp = temp.at[-1].set((1.0 - ALPHA) ** K)

    # ---- zero-pad: features to 128 lanes, node count to a multiple of TILE ----
    N_PAD = _round_up(N, TILE)                        # even tile count (2) for v7x balance

    def pad2(m, r, c):
        return jnp.zeros((r, c), jnp.float32).at[:m.shape[0], :m.shape[1]].set(m)

    def pad_row(v, c, fill=0.0):
        return jnp.full((1, c), fill, jnp.float32).at[0, :v.shape[0]].set(v)

    x_p = pad2(x, N_PAD, PAD)
    a_hat_p = pad2(a_hat, N_PAD, N_PAD).astype(jnp.bfloat16)   # bf16 HBM stream
    mlp_params = (
        pad2(W1.T, PAD, PAD), pad_row(b1, PAD),
        pad_row(bn1_scale, PAD, fill=1.0), pad_row(bn1_shift, PAD),
        pad2(W2.T, PAD, PAD), pad_row(b2, PAD),
        pad_row(bn2_scale, PAD, fill=1.0), pad_row(bn2_shift, PAD),
        pad2(W3.T, PAD, PAD), pad_row(b3, PAD),
    )

    fwd = jax.jit(gprgnn_forward, static_argnames=("K", "tile"))
    hidden_pad = fwd(x_p, a_hat_p, temp, mlp_params, K=K, tile=TILE)
    hidden_pad = jax.block_until_ready(hidden_pad)
    out = hidden_pad[:N, :OUT_C]

    # ---- pure-JAX f32 reference (unpadded, module semantics) ----
    hp = jax.lax.Precision.HIGHEST
    h1 = jnp.maximum(jnp.dot(x, W1.T, precision=hp) + b1, 0.0) * bn1_scale + bn1_shift
    h2 = jnp.maximum(jnp.dot(h1, W2.T, precision=hp) + b2, 0.0) * bn2_scale + bn2_shift
    z_ref = jnp.dot(h2, W3.T, precision=hp) + b3
    hid_f32 = temp[0] * z_ref
    xk_f32 = z_ref
    for k in range(K):
        xk_f32 = jnp.dot(a_hat, xk_f32, precision=hp)
        hid_f32 = hid_f32 + temp[k + 1] * xk_f32

    # ---- bf16-matching reference (same quantization points as the kernel) ----
    a_q = a_hat_p[:N, :N].astype(jnp.float32)                  # bf16-rounded A_hat
    hid_q = temp[0] * z_ref
    xq = z_ref.astype(jnp.bfloat16).astype(jnp.float32)        # z rounded for the hop chain
    for k in range(K):
        xn = jnp.dot(a_q, xq, precision=hp)                    # f32 accumulation
        hid_q = hid_q + temp[k + 1] * xn
        xq = xn.astype(jnp.bfloat16).astype(jnp.float32)       # hop-boundary rounding

    assert out.shape == (N, OUT_C)
    assert bool(jnp.all(jnp.isfinite(out)))
    # tight check vs quantization-matched reference
    assert bool(jnp.allclose(out, hid_q, atol=1e-2, rtol=1e-2))
    # semantic check vs full-f32 module reference (bf16 drift over K=10 hops)
    assert bool(jnp.allclose(out, hid_f32, atol=5e-2, rtol=5e-2))
    # padded feature lanes must stay exactly zero
    assert bool(jnp.all(hidden_pad[:, OUT_C:] == 0.0))
    print("KERNEL_OK")
</pallas_src>

<mosaic_0001>
module attributes {stable_mosaic.version = 11 : i64} {
  func.func @gpr_step_kernel(%arg0: i32, %arg1: i32, %arg2: memref<1xf32, #tpu.memory_space<smem>>, %arg3: memref<512x512xbf16, #tpu.memory_space<vmem>>, %arg4: memref<1024x128xbf16, #tpu.memory_space<vmem>>, %arg5: memref<512x128xf32, #tpu.memory_space<vmem>>, %arg6: memref<512x128xbf16, #tpu.memory_space<vmem>>, %arg7: memref<512x128xf32, #tpu.memory_space<vmem>>, %arg8: memref<512x128xf32, #tpu.memory_space<vmem>>) attributes {dimension_semantics = [#tpu.dimension_semantics<parallel>, #tpu.dimension_semantics<arbitrary>], iteration_bounds = array<i64: 2, 2>, scalar_prefetch = 0 : i64, scratch_operands = 1 : i64, tpu.core_type = #tpu.core_type<tc>, window_params = [{transform_indices = @transform_0, window_bounds = array<i64: 1>}, {transform_indices = @transform_1, window_bounds = array<i64: 512, 512>}, {pipeline_mode = #tpu.pipeline_mode<synchronous>, transform_indices = @transform_2, window_bounds = array<i64: 1024, 128>}, {transform_indices = @transform_3, window_bounds = array<i64: 512, 128>}, {transform_indices = @transform_4, window_bounds = array<i64: 512, 128>}, {transform_indices = @transform_5, window_bounds = array<i64: 512, 128>}]} {
    %c0_i32 = arith.constant 0 : i32
    %0 = arith.cmpi eq, %arg1, %c0_i32 : i32
    %1 = arith.extui %0 : i1 to i32
    %c0_i32_0 = arith.constant 0 : i32
    %2 = arith.cmpi ne, %1, %c0_i32_0 : i32
    scf.if %2 {
      %cst_8 = arith.constant 0.000000e+00 : f32
      %15 = vector.broadcast %cst_8 : f32 to vector<512x128xf32>
      %c0_9 = arith.constant 0 : index
      %c0_10 = arith.constant 0 : index
      %16 = vector.load %arg8[%c0_9, %c0_10] : memref<512x128xf32, #tpu.memory_space<vmem>>, vector<512x128xf32>
      tpu.vector_store %arg8[%c0_9, %c0_10], %15 {strides = array<i32>} : memref<512x128xf32, #tpu.memory_space<vmem>>, vector<512x128xf32>,
    } else {
    }
    %c512_i32 = arith.constant 512 : i32
    %3 = arith.muli %arg1, %c512_i32 : i32
    %4 = tpu.assume_multiple %3, 512 : i32
    %5 = arith.index_cast %4 : i32 to index
    %c0 = arith.constant 0 : index
    %6 = vector.load %arg4[%5, %c0] : memref<1024x128xbf16, #tpu.memory_space<vmem>>, vector<512x128xbf16>
    %c0_1 = arith.constant 0 : index
    %c0_2 = arith.constant 0 : index
    %7 = vector.load %arg8[%c0_1, %c0_2] : memref<512x128xf32, #tpu.memory_space<vmem>>, vector<512x128xf32>
    %c0_3 = arith.constant 0 : index
    %c0_4 = arith.constant 0 : index
    %8 = vector.load %arg3[%c0_3, %c0_4] : memref<512x512xbf16, #tpu.memory_space<vmem>>, vector<512x512xbf16>
    %cst = arith.constant dense<0.000000e+00> : vector<512x128xf32>
    %9 = tpu.matmul %8, %6, %cst {dimension_numbers = #tpu.dot_dimension_numbers<[1], [0], [0], [1], [0, 0, 1, 1], [], []>} : vector<512x512xbf16>, vector<512x128xbf16>, vector<512x128xf32> -> vector<512x128xf32>
    %10 = arith.addf %7, %9 : vector<512x128xf32>
    %c0_5 = arith.constant 0 : index
    %c0_6 = arith.constant 0 : index
    %11 = vector.load %arg8[%c0_5, %c0_6] : memref<512x128xf32, #tpu.memory_space<vmem>>, vector<512x128xf32>
    tpu.vector_store %arg8[%c0_5, %c0_6], %10 {strides = array<i32>} : memref<512x128xf32, #tpu.memory_space<vmem>>, vector<512x128xf32>,
    %c1_i32 = arith.constant 1 : i32
    %12 = arith.cmpi eq, %arg1, %c1_i32 : i32
    %13 = arith.extui %12 : i1 to i32
    %c0_i32_7 = arith.constant 0 : i32
    %14 = arith.cmpi ne, %13, %c0_i32_7 : i32
    scf.if %14 {
      %c0_8 = arith.constant 0 : index
      %c0_9 = arith.constant 0 : index
      %15 = vector.load %arg8[%c0_8, %c0_9] : memref<512x128xf32, #tpu.memory_space<vmem>>, vector<512x128xf32>
      %16 = arith.truncf %15 : vector<512x128xf32> to vector<512x128xbf16>
      %c0_10 = arith.constant 0 : index
      %c0_11 = arith.constant 0 : index
      %17 = vector.load %arg6[%c0_10, %c0_11] : memref<512x128xbf16, #tpu.memory_space<vmem>>, vector<512x128xbf16>
      tpu.vector_store %arg6[%c0_10, %c0_11], %16 {strides = array<i32>} : memref<512x128xbf16, #tpu.memory_space<vmem>>, vector<512x128xbf16>,
      %c0_12 = arith.constant 0 : index
      %c0_13 = arith.constant 0 : index
      %18 = vector.load %arg5[%c0_12, %c0_13] : memref<512x128xf32, #tpu.memory_space<vmem>>, vector<512x128xf32>
      %c0_14 = arith.constant 0 : index
      %19 = memref.load %arg2[%c0_14] : memref<1xf32, #tpu.memory_space<smem>>
      %20 = vector.broadcast %19 : f32 to vector<512x128xf32>
      %21 = arith.mulf %20, %15 : vector<512x128xf32>
      %22 = arith.addf %18, %21 : vector<512x128xf32>
      %c0_15 = arith.constant 0 : index
      %c0_16 = arith.constant 0 : index
      %23 = vector.load %arg7[%c0_15, %c0_16] : memref<512x128xf32, #tpu.memory_space<vmem>>, vector<512x128xf32>
      tpu.vector_store %arg7[%c0_15, %c0_16], %22 {strides = array<i32>} : memref<512x128xf32, #tpu.memory_space<vmem>>, vector<512x128xf32>,
    } else {
    }
    return
  }
  func.func @transform_0(%arg0: i32, %arg1: i32) -> i32 {
    %c0_i32 = arith.constant 0 : i32
    %c0_i32_0 = arith.constant 0 : i32
    return %c0_i32 : i32
  }
  func.func @transform_1(%arg0: i32, %arg1: i32) -> (i32, i32) {
    %c0_i32 = arith.constant 0 : i32
    return %arg0, %arg1 : i32, i32
  }
  func.func @transform_2(%arg0: i32, %arg1: i32) -> (i32, i32) {
    %c0_i32 = arith.constant 0 : i32
    %c0_i32_0 = arith.constant 0 : i32
    %c0_i32_1 = arith.constant 0 : i32
    return %c0_i32, %c0_i32_0 : i32, i32
  }
  func.func @transform_3(%arg0: i32, %arg1: i32) -> (i32, i32) {
    %c0_i32 = arith.constant 0 : i32
    %c0_i32_0 = arith.constant 0 : i32
    return %arg0, %c0_i32 : i32, i32
  }
  func.func @transform_4(%arg0: i32, %arg1: i32) -> (i32, i32) {
    %c0_i32 = arith.constant 0 : i32
    %c0_i32_0 = arith.constant 0 : i32
    return %arg0, %c0_i32 : i32, i32
  }
  func.func @transform_5(%arg0: i32, %arg1: i32) -> (i32, i32) {
    %c0_i32 = arith.constant 0 : i32
    %c0_i32_0 = arith.constant 0 : i32
    return %arg0, %c0_i32 : i32, i32
  }
}

module attributes {stable_mosaic.version = 11 : i64} {
  func.func @mlp_kernel(%arg0: i32, %arg1: memref<1xf32, #tpu.memory_space<smem>>, %arg2: memref<512x128xf32, #tpu.memory_space<vmem>>, %arg3: memref<128x128xf32, #tpu.memory_space<vmem>>, %arg4: memref<1x128xf32, #tpu.memory_space<vmem>>, %arg5: memref<1x128xf32, #tpu.memory_space<vmem>>, %arg6: memref<1x128xf32, #tpu.memory_space<vmem>>, %arg7: memref<128x128xf32, #tpu.memory_space<vmem>>, %arg8: memref<1x128xf32, #tpu.memory_space<vmem>>, %arg9: memref<1x128xf32, #tpu.memory_space<vmem>>, %arg10: memref<1x128xf32, #tpu.memory_space<vmem>>, %arg11: memref<128x128xf32, #tpu.memory_space<vmem>>, %arg12: memref<1x128xf32, #tpu.memory_space<vmem>>, %arg13: memref<512x128xbf16, #tpu.memory_space<vmem>>, %arg14: memref<512x128xf32, #tpu.memory_space<vmem>>) attributes {dimension_semantics = [#tpu.dimension_semantics<parallel>], iteration_bounds = array<i64: 2>, scalar_prefetch = 0 : i64, scratch_operands = 0 : i64, tpu.core_type = #tpu.core_type<tc>, window_params = [{transform_indices = @transform_0, window_bounds = array<i64: 1>}, {transform_indices = @transform_1, window_bounds = array<i64: 512, 128>}, {pipeline_mode = #tpu.pipeline_mode<synchronous>, transform_indices = @transform_2, window_bounds = array<i64: 128, 128>}, {pipeline_mode = #tpu.pipeline_mode<synchronous>, transform_indices = @transform_3, window_bounds = array<i64: 1, 128>}, {pipeline_mode = #tpu.pipeline_mode<synchronous>, transform_indices = @transform_4, window_bounds = array<i64: 1, 128>}, {pipeline_mode = #tpu.pipeline_mode<synchronous>, transform_indices = @transform_5, window_bounds = array<i64: 1, 128>}, {pipeline_mode = #tpu.pipeline_mode<synchronous>, transform_indices = @transform_6, window_bounds = array<i64: 128, 128>}, {pipeline_mode = #tpu.pipeline_mode<synchronous>, transform_indices = @transform_7, window_bounds = array<i64: 1, 128>}, {pipeline_mode = #tpu.pipeline_mode<synchronous>, transform_indices = @transform_8, window_bounds = array<i64: 1, 128>}, {pipeline_mode = #tpu.pipeline_mode<synchronous>, transform_indices = @transform_9, window_bounds = array<i64: 1, 128>}, {pipeline_mode = #tpu.pipeline_mode<synchronous>, transform_indices = @transform_10, window_bounds = array<i64: 128, 128>}, {pipeline_mode = #tpu.pipeline_mode<synchronous>, transform_indices = @transform_11, window_bounds = array<i64: 1, 128>}, {transform_indices = @transform_12, window_bounds = array<i64: 512, 128>}, {transform_indices = @transform_13, window_bounds = array<i64: 512, 128>}]} {
    %c0 = arith.constant 0 : index
    %c0_0 = arith.constant 0 : index
    %0 = vector.load %arg2[%c0, %c0_0] : memref<512x128xf32, #tpu.memory_space<vmem>>, vector<512x128xf32>
    %c0_1 = arith.constant 0 : index
    %c0_2 = arith.constant 0 : index
    %1 = vector.load %arg3[%c0_1, %c0_2] : memref<128x128xf32, #tpu.memory_space<vmem>>, vector<128x128xf32>
    %cst = arith.constant dense<0.000000e+00> : vector<512x128xf32>
    %2 = tpu.matmul %0, %1, %cst {dimension_numbers = #tpu.dot_dimension_numbers<[1], [0], [0], [1], [0, 0, 1, 1], [], []>} : vector<512x128xf32>, vector<128x128xf32>, vector<512x128xf32> -> vector<512x128xf32>
    %c0_3 = arith.constant 0 : index
    %c0_4 = arith.constant 0 : index
    %3 = vector.load %arg4[%c0_3, %c0_4] : memref<1x128xf32, #tpu.memory_space<vmem>>, vector<1x128xf32>
    %4 = vector.broadcast %3 : vector<1x128xf32> to vector<512x128xf32>
    %5 = arith.addf %2, %4 : vector<512x128xf32>
    %cst_5 = arith.constant 0.000000e+00 : f32
    %6 = vector.broadcast %cst_5 : f32 to vector<512x128xf32>
    %7 = arith.maximumf %5, %6 : vector<512x128xf32>
    %c0_6 = arith.constant 0 : index
    %c0_7 = arith.constant 0 : index
    %8 = vector.load %arg5[%c0_6, %c0_7] : memref<1x128xf32, #tpu.memory_space<vmem>>, vector<1x128xf32>
    %9 = vector.broadcast %8 : vector<1x128xf32> to vector<512x128xf32>
    %10 = arith.mulf %7, %9 : vector<512x128xf32>
    %c0_8 = arith.constant 0 : index
    %c0_9 = arith.constant 0 : index
    %11 = vector.load %arg6[%c0_8, %c0_9] : memref<1x128xf32, #tpu.memory_space<vmem>>, vector<1x128xf32>
    %12 = vector.broadcast %11 : vector<1x128xf32> to vector<512x128xf32>
    %13 = arith.addf %10, %12 : vector<512x128xf32>
    %c0_10 = arith.constant 0 : index
    %c0_11 = arith.constant 0 : index
    %14 = vector.load %arg7[%c0_10, %c0_11] : memref<128x128xf32, #tpu.memory_space<vmem>>, vector<128x128xf32>
    %cst_12 = arith.constant dense<0.000000e+00> : vector<512x128xf32>
    %15 = tpu.matmul %13, %14, %cst_12 {dimension_numbers = #tpu.dot_dimension_numbers<[1], [0], [0], [1], [0, 0, 1, 1], [], []>} : vector<512x128xf32>, vector<128x128xf32>, vector<512x128xf32> -> vector<512x128xf32>
    %c0_13 = arith.constant 0 : index
    %c0_14 = arith.constant 0 : index
    %16 = vector.load %arg8[%c0_13, %c0_14] : memref<1x128xf32, #tpu.memory_space<vmem>>, vector<1x128xf32>
    %17 = vector.broadcast %16 : vector<1x128xf32> to vector<512x128xf32>
    %18 = arith.addf %15, %17 : vector<512x128xf32>
    %cst_15 = arith.constant 0.000000e+00 : f32
    %19 = vector.broadcast %cst_15 : f32 to vector<512x128xf32>
    %20 = arith.maximumf %18, %19 : vector<512x128xf32>
    %c0_16 = arith.constant 0 : index
    %c0_17 = arith.constant 0 : index
    %21 = vector.load %arg9[%c0_16, %c0_17] : memref<1x128xf32, #tpu.memory_space<vmem>>, vector<1x128xf32>
    %22 = vector.broadcast %21 : vector<1x128xf32> to vector<512x128xf32>
    %23 = arith.mulf %20, %22 : vector<512x128xf32>
    %c0_18 = arith.constant 0 : index
    %c0_19 = arith.constant 0 : index
    %24 = vector.load %arg10[%c0_18, %c0_19] : memref<1x128xf32, #tpu.memory_space<vmem>>, vector<1x128xf32>
    %25 = vector.broadcast %24 : vector<1x128xf32> to vector<512x128xf32>
    %26 = arith.addf %23, %25 : vector<512x128xf32>
    %c0_20 = arith.constant 0 : index
    %c0_21 = arith.constant 0 : index
    %27 = vector.load %arg11[%c0_20, %c0_21] : memref<128x128xf32, #tpu.memory_space<vmem>>, vector<128x128xf32>
    %cst_22 = arith.constant dense<0.000000e+00> : vector<512x128xf32>
    %28 = tpu.matmul %26, %27, %cst_22 {dimension_numbers = #tpu.dot_dimension_numbers<[1], [0], [0], [1], [0, 0, 1, 1], [], []>} : vector<512x128xf32>, vector<128x128xf32>, vector<512x128xf32> -> vector<512x128xf32>
    %c0_23 = arith.constant 0 : index
    %c0_24 = arith.constant 0 : index
    %29 = vector.load %arg12[%c0_23, %c0_24] : memref<1x128xf32, #tpu.memory_space<vmem>>, vector<1x128xf32>
    %30 = vector.broadcast %29 : vector<1x128xf32> to vector<512x128xf32>
    %31 = arith.addf %28, %30 : vector<512x128xf32>
    %32 = arith.truncf %31 : vector<512x128xf32> to vector<512x128xbf16>
    %c0_25 = arith.constant 0 : index
    %c0_26 = arith.constant 0 : index
    %33 = vector.load %arg13[%c0_25, %c0_26] : memref<512x128xbf16, #tpu.memory_space<vmem>>, vector<512x128xbf16>
    tpu.vector_store %arg13[%c0_25, %c0_26], %32 {strides = array<i32>} : memref<512x128xbf16, #tpu.memory_space<vmem>>, vector<512x128xbf16>,
    %c0_27 = arith.constant 0 : index
    %34 = memref.load %arg1[%c0_27] : memref<1xf32, #tpu.memory_space<smem>>
    %35 = vector.broadcast %34 : f32 to vector<512x128xf32>
    %36 = arith.mulf %35, %31 : vector<512x128xf32>
    %c0_28 = arith.constant 0 : index
    %c0_29 = arith.constant 0 : index
    %37 = vector.load %arg14[%c0_28, %c0_29] : memref<512x128xf32, #tpu.memory_space<vmem>>, vector<512x128xf32>
    tpu.vector_store %arg14[%c0_28, %c0_29], %36 {strides = array<i32>} : memref<512x128xf32, #tpu.memory_space<vmem>>, vector<512x128xf32>,
    return
  }
  func.func @transform_0(%arg0: i32) -> i32 {
    %c0_i32 = arith.constant 0 : i32
    %c0_i32_0 = arith.constant 0 : i32
    return %c0_i32 : i32
  }
  func.func @transform_1(%arg0: i32) -> (i32, i32) {
    %c0_i32 = arith.constant 0 : i32
    %c0_i32_0 = arith.constant 0 : i32
    return %arg0, %c0_i32 : i32, i32
  }
  func.func @transform_2(%arg0: i32) -> (i32, i32) {
    %c0_i32 = arith.constant 0 : i32
    %c0_i32_0 = arith.constant 0 : i32
    %c0_i32_1 = arith.constant 0 : i32
    return %c0_i32, %c0_i32_0 : i32, i32
  }
  func.func @transform_3(%arg0: i32) -> (i32, i32) {
    %c0_i32 = arith.constant 0 : i32
    %c0_i32_0 = arith.constant 0 : i32
    %c0_i32_1 = arith.constant 0 : i32
    return %c0_i32, %c0_i32_0 : i32, i32
  }
  func.func @transform_4(%arg0: i32) -> (i32, i32) {
    %c0_i32 = arith.constant 0 : i32
    %c0_i32_0 = arith.constant 0 : i32
    %c0_i32_1 = arith.constant 0 : i32
    return %c0_i32, %c0_i32_0 : i32, i32
  }
  func.func @transform_5(%arg0: i32) -> (i32, i32) {
    %c0_i32 = arith.constant 0 : i32
    %c0_i32_0 = arith.constant 0 : i32
    %c0_i32_1 = arith.constant 0 : i32
    return %c0_i32, %c0_i32_0 : i32, i32
  }
  func.func @transform_6(%arg0: i32) -> (i32, i32) {
    %c0_i32 = arith.constant 0 : i32
    %c0_i32_0 = arith.constant 0 : i32
    %c0_i32_1 = arith.constant 0 : i32
    return %c0_i32, %c0_i32_0 : i32, i32
  }
  func.func @transform_7(%arg0: i32) -> (i32, i32) {
    %c0_i32 = arith.constant 0 : i32
    %c0_i32_0 = arith.constant 0 : i32
    %c0_i32_1 = arith.constant 0 : i32
    return %c0_i32, %c0_i32_0 : i32, i32
  }
  func.func @transform_8(%arg0: i32) -> (i32, i32) {
    %c0_i32 = arith.constant 0 : i32
    %c0_i32_0 = arith.constant 0 : i32
    %c0_i32_1 = arith.constant 0 : i32
    return %c0_i32, %c0_i32_0 : i32, i32
  }
  func.func @transform_9(%arg0: i32) -> (i32, i32) {
    %c0_i32 = arith.constant 0 : i32
    %c0_i32_0 = arith.constant 0 : i32
    %c0_i32_1 = arith.constant 0 : i32
    return %c0_i32, %c0_i32_0 : i32, i32
  }
  func.func @transform_10(%arg0: i32) -> (i32, i32) {
    %c0_i32 = arith.constant 0 : i32
    %c0_i32_0 = arith.constant 0 : i32
    %c0_i32_1 = arith.constant 0 : i32
    return %c0_i32, %c0_i32_0 : i32, i32
  }
  func.func @transform_11(%arg0: i32) -> (i32, i32) {
    %c0_i32 = arith.constant 0 : i32
    %c0_i32_0 = arith.constant 0 : i32
    %c0_i32_1 = arith.constant 0 : i32
    return %c0_i32, %c0_i32_0 : i32, i32
  }
  func.func @transform_12(%arg0: i32) -> (i32, i32) {
    %c0_i32 = arith.constant 0 : i32
    %c0_i32_0 = arith.constant 0 : i32
    return %arg0, %c0_i32 : i32, i32
  }
  func.func @transform_13(%arg0: i32) -> (i32, i32) {
    %c0_i32 = arith.constant 0 : i32
    %c0_i32_0 = arith.constant 0 : i32
    return %arg0, %c0_i32 : i32, i32
  }
}

</mosaic_0001>

<bundles_post_ra>
// kernel: closed_call.18
= control target key start
LH: loop header
LB: loop body
LE: loop exit
PB: predicated region body
PF: predicated region fallthrough
CT: control target
= control target key end

     0   :  { %s4731_s0 = inlined_call_operand.<no memory space> [shape: f32[1], index: 0, kind: input, shape index: {}]   ;;  %s4732_s1 = inlined_call_operand.hbm [shape: bf16[1024,1024], index: 1, kind: input, shape index: {}]   ;;  %s4733_s2 = inlined_call_operand.vmem [shape: bf16[1024,128], index: 2, kind: input, shape index: {}]   ;;  %s4734_s3 = inlined_call_operand.vmem [shape: f32[1024,128], index: 3, kind: input, shape index: {}, may-alias: {3,5}]   ;;  %s4735_s4 = inlined_call_operand.vmem [shape: bf16[1024,128], index: 4, kind: output, shape index: {0}]   ;;  %s4736_s5 = inlined_call_operand.vmem [shape: f32[1024,128], index: 5, kind: output, shape index: {1}, may-alias: {3,5}]  }
   0x1   :  { %11 = sst [smem:[#allocation3]] %s4731_s0 }
   0x2   :  { %12 = vsyncpa [#allocation5], 0 }
   0x3   :  { %14 = vsyncpa [#allocation5 + $0x1], 0  ;;  %s3884_s20 = smov 0   ;;  %s3886_s21 = smov 0  }
   0x4   :  { %s3888_s22 = smov 0   ;;  %s3890_s23 = smov 0  }
   0x5   :  { %s3892_s24 = smov 0   ;;  %s3894_s25 = smov 0  }
   0x6   :  { %s3896_s26 = smov 0   ;;  %s3898_s27 = smov 0  }
   0x7 LB: > { %s2946_s0 = sadd.s32 4294967295, %s3843_s27   ;;  %s29_s28 = sadd.s32 1, %s3835_s25  ;;  %s3843_s27 = sphi %s3898_s27, %s20_s27   ;;  %s3839_s26 = sphi %s3896_s26, %s4777_s26   ;;  %s3835_s25 = sphi %s3894_s25, %s4776_s25   ;;  %s3831_s24 = sphi %s3892_s24, %s4775_s24   ;;  %s3827_s23 = sphi %s3890_s23, %s4774_s23   ;;  %s3823_s22 = sphi %s3888_s22, %s4773_s22   ;;  %s3819_s21 = sphi %s3886_s21, %s4772_s21   ;;  %s3815_s20 = sphi %s3884_s20, %s4771_s20  }
   0x8   : > { %p30_p0 = scmp.ge.s32.totalorder %s29_s28, 2  ;;  %s32_s29 = sadd.s32 1, %s3839_s26 }
   0x9   : > { %s62_s30 = sadd.s32 1, %s3823_s22  ;;  %p69_p1 = scmp.ne.s32.totalorder %s3823_s22, %s3819_s21 }
   0xa   : > { %s4779_s28 = smov (%p30_p0, %s29_s28), 0  ;;  %s4781_s29 = smov (!%p30_p0, %s32_s29), %s3839_s26 }
   0xb   : > { %4738 = sst [smem:[#allocation7_spill]] %s4779_s28  ;;  %s58_s6 = ssub.s32 %s3835_s25, %s4779_s28 }
   0xc   : > { %p70_p2 = scmp.eq.s32.totalorder %s3843_s27, 0  ;;  %p34_p3 = scmp.ge.s32.totalorder %s4781_s29, 2 }
   0xd   : > { %p75_p4 = scmp.ne.s32.totalorder %s3819_s21, %s3815_s20  ;;  %p76_p6 = scmp.eq.s32.totalorder %s2946_s0, 0 }
   0xe   : > { %p3935_p5 = por %p70_p2, %p69_p1  ;;  %s4783_s29 = smov (%p34_p3, %s4781_s29), 0 }
   0xf   : > { %p3941_p7 = por %p76_p6, %p75_p4  ;;  %s57_s9 = ssub.s32 %s3839_s26, %s4783_s29 }
  0x10   : > { %p3455_p8 = scmp.lt.s32.totalorder %s3843_s27, 4  ;;  %s59_s10 = sor.u32 %s58_s6, %s57_s9 }
  0x11   : > { %s204_s11 = sand.u32 1, %s3823_s22   ;;  %p60_p9 = scmp.eq.s32.totalorder %s59_s10, 0 }
  0x12   : > { %s2950_s12 = sshll.u32 %s204_s11, 10  ;;  %s2952_s13 = sshll.u32 %s3835_s25, 2 }
  0x13   : > { %s3951_s14 = scalar_select %p60_p9, %s3823_s22, %s62_s30  }
  0x14   : > { %s3193_s15 = sshll.u32 %s3839_s26, 9  ;;  %s208_s17 = scalar_lea.vmem [#allocation4], %s2950_s12 }
  0x15   : > { %s215_s16 = sadd.s32 %s3193_s15, %s2952_s13  ;;  %s218_s18 = sshll.u32 %s208_s17, 4  ;;  %s219_s18 = int_to_ptr.vmem [resolvable:$true] %s218_s18 }
  0x16   : > { %s2954_s19 = sshll.u32 %s215_s16, 6  ;;  %p3961_p10 = pnand %p3455_p8, %p3935_p5 }
  0x17   : > { %s217_s28 = scalar_lea.hbm %s4732_s1, %s2954_s19  ;;  %s205_s9 = scalar_lea.sflag [#allocation5], %s204_s11 }
  0x18   : > { %p3751_p11 = pneg %p3961_p10  ;;  %s3762_s30 = scalar_lea.vmem %s219_s18, 16384 }
  0x19   : > { %p3763_p12 = scmp.ne.s32.totalorder %s219_s18, %s3762_s30  ;;  %s3845_s10 = smov [#allocation4]  }
  0x1a   : > { %s3767_s12 = sshll.u32 %s3845_s10, 4  ;;  %s3768_s12 = int_to_ptr.vmem [resolvable:$false] %s3767_s12 }
  0x1b   : > { %p3765_p13 = pnand %p3763_p12, %p3751_p11  ;;  %s3769_s13 = scalar_lea.vmem %s3768_s12, 32768 }
  0x1c   : > { %p3770_p1 = scmp.lt.s32.totalorder %s219_s18, %s3768_s12  ;;  %p3771_p2 = scmp.lt.s32.totalorder %s3769_s13, %s3762_s30 }
  0x1d   : > { %p3766_p0 = pneg %p3765_p13 }
  0x1e   : > { %p3772_p3 = por %p3771_p2, %p3770_p1 }
  0x20   : > { %p3773_p4 = pnand %p3772_p3, %p3766_p0 }
  0x22   : > { %3776 = shalt.err (!%p3773_p4)
}
  0x23   : > { %s3846_s7 = smov 512   ;;  %s3847_s11 = smov 256  }
  0x24   : > { %s3848_s15 = smov 16   ;;  %p2955_p5 = scmp.ge.s32.totalorder %s3843_s27, 1 }
  0x25   : > { %3454 = dma.hbm_to_vmem [thread:$0]  (!%p3961_p10), %s217_s28, 16384, %s219_s18, %s205_s9, %s3846_s7, %s3847_s11, %s3848_s15  }
  0x26   : > { %p235_p6 = scmp.lt.s32.totalorder %s3843_s27, 5 }
  0x28   : > { %p236_p8 = pnand %p2955_p5, %p235_p6 }
  0x29   : > { %s241_s16 = sand.u32 (!%p236_p8), 1, %s3819_s21  }
  0x2a   : > { %239 = sbr.rel (%p236_p8) target bundleno = 688 (0x2b0), region = 36  ;;  %s2956_s17 = sshll.u32 (!%p236_p8), %s241_s16, 10 }
  0x2b   : > { %s242_s19 = scalar_lea.sflag (!%p236_p8), [#allocation5], %s241_s16  ;;  %s3972_s20 = scalar_lea.vmem (!%p236_p8), [#allocation4], %s2956_s17 }
  0x2f   : > { %3810 = dma.done.wait (%p3941_p7), %s242_s19, 16384  }
  0x30   : > { %3812 = vsyncadd (%p3941_p7), %s242_s19, 4294950912  ;;  %s2957_s0 = sshll.u32 %s3831_s24, 6  ;;  %p2963_p7 = scmp.ne.s32.totalorder %s3827_s23, 0 }
  0x31   : > { %p285_p9 = scmp.lt.s32.totalorder %s2957_s0, 127 }
  0x32   : > { %306 = sbr.rel (%p2963_p7) target bundleno = 88 (0x58), region = 44 }
  0x33   : > { %s4785_s0 = smov (!%p285_p9, %s2957_s0), 127 }
  0x34   : > { %s2958_s28 = sshll.u32 %s4785_s0, 3  ;;  %s2960_s18 = sshll.u32 %s4785_s0, 2 }
  0x35   : > { %s3982_s30 = scalar_lea.vmem %s4734_s3, %s2958_s28  ;;  %s3987_s13 = scalar_lea.vmem %s4735_s4, %s2960_s18 }
  0x36   : > { %s3992_s8 = scalar_lea.vmem %s4736_s5, %s2958_s28 }
  0x37   : > { %v3849_v0 = vmov 0.0  }
  0x38   : > { %307 = vst [vmem:[#allocation2 + $0xb0] sm:$0xff] %v3849_v0  ;;  %308 = vst [vmem:[#allocation2 + $0x1b0] sm:$0xff] %v3849_v0 }
  0x39   : > { %309 = vst [vmem:[#allocation2 + $0xd8] sm:$0xff] %v3849_v0  ;;  %310 = vst [vmem:[#allocation2 + $0x18] sm:$0xff] %v3849_v0 }
  0x3a   : > { %311 = vst [vmem:[#allocation2 + $0x50] sm:$0xff] %v3849_v0  ;;  %312 = vst [vmem:[#allocation2 + $0x168] sm:$0xff] %v3849_v0 }
  0x3b   : > { %313 = vst [vmem:[#allocation2 + $0x130] sm:$0xff] %v3849_v0  ;;  %314 = vst [vmem:[#allocation2 + $0x48] sm:$0xff] %v3849_v0 }
  0x3c   : > { %315 = vst [vmem:[#allocation2 + $0x180] sm:$0xff] %v3849_v0  ;;  %316 = vst [vmem:[#allocation2 + $0x110] sm:$0xff] %v3849_v0 }
  0x3d   : > { %317 = vst [vmem:[#allocation2 + $0x118] sm:$0xff] %v3849_v0  ;;  %318 = vst [vmem:[#allocation2 + $0x98] sm:$0xff] %v3849_v0 }
  0x3e   : > { %319 = vst [vmem:[#allocation2 + $0x120] sm:$0xff] %v3849_v0  ;;  %320 = vst [vmem:[#allocation2 + $0x150] sm:$0xff] %v3849_v0 }
  0x3f   : > { %321 = vst [vmem:[#allocation2 + $0x108] sm:$0xff] %v3849_v0  ;;  %322 = vst [vmem:[#allocation2 + $0x60] sm:$0xff] %v3849_v0 }
  0x40   : > { %323 = vst [vmem:[#allocation2 + $0xe0] sm:$0xff] %v3849_v0  ;;  %324 = vst [vmem:[#allocation2 + $0x188] sm:$0xff] %v3849_v0 }
  0x41   : > { %325 = vst [vmem:[#allocation2 + $0x138] sm:$0xff] %v3849_v0  ;;  %326 = vst [vmem:[#allocation2 + $0x140] sm:$0xff] %v3849_v0 }
  0x42   : > { %327 = vst [vmem:[#allocation2 + $0x80] sm:$0xff] %v3849_v0  ;;  %328 = vst [vmem:[#allocation2 + $0x1a8] sm:$0xff] %v3849_v0 }
  0x43   : > { %329 = vst [vmem:[#allocation2 + $0x1b8] sm:$0xff] %v3849_v0  ;;  %330 = vst [vmem:[#allocation2 + $0x28] sm:$0xff] %v3849_v0 }
  0x44   : > { %331 = vst [vmem:[#allocation2 + $0x1e8] sm:$0xff] %v3849_v0  ;;  %332 = vst [vmem:[#allocation2 + $0xf8] sm:$0xff] %v3849_v0 }
  0x45   : > { %333 = vst [vmem:[#allocation2 + $0x160] sm:$0xff] %v3849_v0  ;;  %334 = vst [vmem:[#allocation2 + $0x30] sm:$0xff] %v3849_v0 }
  0x46   : > { %335 = vst [vmem:[#allocation2 + $0x1e0] sm:$0xff] %v3849_v0  ;;  %336 = vst [vmem:[#allocation2] sm:$0xff] %v3849_v0 }
  0x47   : > { %337 = vst [vmem:[#allocation2 + $0xf0] sm:$0xff] %v3849_v0  ;;  %338 = vst [vmem:[#allocation2 + $0x8] sm:$0xff] %v3849_v0 }
  0x48   : > { %339 = vst [vmem:[#allocation2 + $0x148] sm:$0xff] %v3849_v0  ;;  %340 = vst [vmem:[#allocation2 + $0x1d0] sm:$0xff] %v3849_v0 }
  0x49   : > { %341 = vst [vmem:[#allocation2 + $0x100] sm:$0xff] %v3849_v0  ;;  %342 = vst [vmem:[#allocation2 + $0xc8] sm:$0xff] %v3849_v0 }
  0x4a   : > { %343 = vst [vmem:[#allocation2 + $0x40] sm:$0xff] %v3849_v0  ;;  %344 = vst [vmem:[#allocation2 + $0x1f8] sm:$0xff] %v3849_v0 }
  0x4b   : > { %345 = vst [vmem:[#allocation2 + $0x20] sm:$0xff] %v3849_v0  ;;  %346 = vst [vmem:[#allocation2 + $0x128] sm:$0xff] %v3849_v0 }
  0x4c   : > { %347 = vst [vmem:[#allocation2 + $0x1a0] sm:$0xff] %v3849_v0  ;;  %348 = vst [vmem:[#allocation2 + $0x1f0] sm:$0xff] %v3849_v0 }
  0x4d   : > { %349 = vst [vmem:[#allocation2 + $0xe8] sm:$0xff] %v3849_v0  ;;  %350 = vst [vmem:[#allocation2 + $0x78] sm:$0xff] %v3849_v0 }
  0x4e   : > { %351 = vst [vmem:[#allocation2 + $0x70] sm:$0xff] %v3849_v0  ;;  %352 = vst [vmem:[#allocation2 + $0x90] sm:$0xff] %v3849_v0 }
  0x4f   : > { %353 = vst [vmem:[#allocation2 + $0x1d8] sm:$0xff] %v3849_v0  ;;  %354 = vst [vmem:[#allocation2 + $0xd0] sm:$0xff] %v3849_v0 }
  0x50   : > { %355 = vst [vmem:[#allocation2 + $0xb8] sm:$0xff] %v3849_v0  ;;  %356 = vst [vmem:[#allocation2 + $0x88] sm:$0xff] %v3849_v0 }
  0x51   : > { %357 = vst [vmem:[#allocation2 + $0xa8] sm:$0xff] %v3849_v0  ;;  %358 = vst [vmem:[#allocation2 + $0x1c8] sm:$0xff] %v3849_v0 }
  0x52   : > { %359 = vst [vmem:[#allocation2 + $0x170] sm:$0xff] %v3849_v0  ;;  %360 = vst [vmem:[#allocation2 + $0x178] sm:$0xff] %v3849_v0 }
  0x53   : > { %361 = vst [vmem:[#allocation2 + $0x68] sm:$0xff] %v3849_v0  ;;  %362 = vst [vmem:[#allocation2 + $0x190] sm:$0xff] %v3849_v0 }
  0x54   : > { %363 = vst [vmem:[#allocation2 + $0x198] sm:$0xff] %v3849_v0  ;;  %364 = vst [vmem:[#allocation2 + $0x38] sm:$0xff] %v3849_v0 }
  0x55   : > { %365 = vst [vmem:[#allocation2 + $0xc0] sm:$0xff] %v3849_v0  ;;  %366 = vst [vmem:[#allocation2 + $0x1c0] sm:$0xff] %v3849_v0 }
  0x56   : > { %367 = vst [vmem:[#allocation2 + $0x158] sm:$0xff] %v3849_v0  ;;  %368 = vst [vmem:[#allocation2 + $0x10] sm:$0xff] %v3849_v0 }
  0x57   : > { %369 = vst [vmem:[#allocation2 + $0x58] sm:$0xff] %v3849_v0  ;;  %370 = vst [vmem:[#allocation2 + $0xa0] sm:$0xff] %v3849_v0 }
  0x58 PF: > { %s2964_s24 = sshll.u32 %s3827_s23, 9  ;;  %v3850_v1 = vmov 0   ;;  %v3559_v2 = vld [vmem:[%s3972_s20 + $0x4] ss:$16 sps:$4 sm:$0xff]   ;;  %v3562_v3 = vld [vmem:[%s3972_s20 + $0xc] ss:$16 sps:$4 sm:$0xff]  }
  0x59   : > { %1464 = vmatprep.subr.bf16.mxu0 %v3850_v1  ;;  %1753 = vmatprep.subr.bf16.mxu1 %v3850_v1  ;;  %s372_s15 = sshra.s32 %s2964_s24, 3  ;;  %v3557_v36 = vld [vmem:[%s3972_s20] ss:$16 sps:$4 sm:$0xff]   ;;  %v3560_v37 = vld [vmem:[%s3972_s20 + $0x8] ss:$16 sps:$4 sm:$0xff]   ;;  %p3126_p10 = scmp.ne.s32.totalorder %s3827_s23, 1 }
  0x5a   : > { %s2965_s16 = sshll.u32 %s372_s15, 2  ;;  %1496 = vmatprep.mubr.bf16.mxu0 %v3559_v2  ;;  %1785 = vmatprep.mubr.bf16.mxu1 %v3562_v3  ;;  %v3563_v38 = vld [vmem:[%s3972_s20 + $0x24] ss:$16 sps:$4 sm:$0xff]   ;;  %v3565_v39 = vld [vmem:[%s3972_s20 + $0x2c] ss:$16 sps:$4 sm:$0xff]  }
  0x5b   : > { %s4067_s0 = scalar_lea.vmem %s4733_s2, %s2965_s16  ;;  %v3567_v40 = vld [vmem:[%s3972_s20 + $0x20] ss:$16 sps:$4 sm:$0xff]   ;;  %v3568_v41 = vld [vmem:[%s3972_s20 + $0x28] ss:$16 sps:$4 sm:$0xff]   ;;  %v3569_v42 = vld [vmem:[%s3972_s20 + $0x44] ss:$16 sps:$4 sm:$0xff]  }
  0x5c   : > { %v3525_v4 = vld [vmem:[%s4067_s0 + $0x38] sm:$0xff]   ;;  %v3527_v6 = vld [vmem:[%s4067_s0 + $0x30] sm:$0xff]   ;;  %v3529_v8 = vld [vmem:[%s4067_s0 + $0x28] sm:$0xff]  }
  0x5d   : > { %v3526_v5 = vld [vmem:[%s4067_s0 + $0xb8] sm:$0xff]   ;;  %1465 = vmatpush1.bf16.msra.mxu0 %v3525_v4  ;;  %v3528_v7 = vld [vmem:[%s4067_s0 + $0xb0] sm:$0xff]   ;;  %v3530_v9 = vld [vmem:[%s4067_s0 + $0xa8] sm:$0xff]  }
  0x5e   : > { %1754 = vmatpush1.bf16.msra.mxu1 %v3526_v5  ;;  %1466 = vmatprep.subr.bf16.mxu0 %v3850_v1  ;;  %v3531_v10 = vld [vmem:[%s4067_s0 + $0x20] sm:$0xff]   ;;  %v3533_v12 = vld [vmem:[%s4067_s0 + $0x18] sm:$0xff]   ;;  %v3535_v14 = vld [vmem:[%s4067_s0 + $0x10] sm:$0xff]  }
  0x5f   : > { %1755 = vmatprep.subr.bf16.mxu1 %v3850_v1  ;;  %v3532_v11 = vld [vmem:[%s4067_s0 + $0xa0] sm:$0xff]   ;;  %v3534_v13 = vld [vmem:[%s4067_s0 + $0x98] sm:$0xff]   ;;  %v3536_v15 = vld [vmem:[%s4067_s0 + $0x90] sm:$0xff]  }
  0x60   : > { %v3537_v16 = vld [vmem:[%s4067_s0 + $0x8] sm:$0xff]   ;;  %v3539_v18 = vld [vmem:[%s4067_s0] sm:$0xff]   ;;  %v3541_v20 = vld [vmem:[%s4067_s0 + $0x78] sm:$0xff]  }
  0x61   : > { %1467 = vmatpush1.bf16.msra.mxu0 %v3527_v6  ;;  %v3538_v17 = vld [vmem:[%s4067_s0 + $0x88] sm:$0xff]   ;;  %v3540_v19 = vld [vmem:[%s4067_s0 + $0x80] sm:$0xff]   ;;  %v3542_v21 = vld [vmem:[%s4067_s0 + $0xf8] sm:$0xff]  }
  0x62   : > { %1756 = vmatpush1.bf16.msra.mxu1 %v3528_v7  ;;  %1468 = vmatprep.subr.bf16.mxu0 %v3850_v1  ;;  %v3543_v22 = vld [vmem:[%s4067_s0 + $0x70] sm:$0xff]   ;;  %v3545_v24 = vld [vmem:[%s4067_s0 + $0x68] sm:$0xff]   ;;  %v3547_v26 = vld [vmem:[%s4067_s0 + $0x60] sm:$0xff]  }
  0x63   : > { %1757 = vmatprep.subr.bf16.mxu1 %v3850_v1  ;;  %v3544_v23 = vld [vmem:[%s4067_s0 + $0xf0] sm:$0xff]   ;;  %v3546_v25 = vld [vmem:[%s4067_s0 + $0xe8] sm:$0xff]   ;;  %v3548_v27 = vld [vmem:[%s4067_s0 + $0xe0] sm:$0xff]  }
  0x64   : > { %v3549_v28 = vld [vmem:[%s4067_s0 + $0x58] sm:$0xff]   ;;  %v3551_v30 = vld [vmem:[%s4067_s0 + $0x50] sm:$0xff]   ;;  %v3553_v32 = vld [vmem:[%s4067_s0 + $0x48] sm:$0xff]  }
  0x65   : > { %1469 = vmatpush1.bf16.msra.mxu0 %v3529_v8  ;;  %v3550_v29 = vld [vmem:[%s4067_s0 + $0xd8] sm:$0xff]   ;;  %v3552_v31 = vld [vmem:[%s4067_s0 + $0xd0] sm:$0xff]   ;;  %v3554_v33 = vld [vmem:[%s4067_s0 + $0xc8] sm:$0xff]  }
  0x66   : > { %1758 = vmatpush1.bf16.msra.mxu1 %v3530_v9  ;;  %1470 = vmatprep.subr.bf16.mxu0 %v3850_v1  ;;  %v3555_v34 = vld [vmem:[%s4067_s0 + $0x40] sm:$0xff]   ;;  %v3571_v43 = vld [vmem:[%s3972_s20 + $0x4c] ss:$16 sps:$4 sm:$0xff]   ;;  %v3574_v45 = vld [vmem:[%s3972_s20 + $0x48] ss:$16 sps:$4 sm:$0xff]  }
  0x67   : > { %1759 = vmatprep.subr.bf16.mxu1 %v3850_v1  ;;  %v3556_v35 = vld [vmem:[%s4067_s0 + $0xc0] sm:$0xff]   ;;  %v3577_v47 = vld [vmem:[%s3972_s20 + $0x6c] ss:$16 sps:$4 sm:$0xff]   ;;  %v3580_v49 = vld [vmem:[%s3972_s20 + $0x68] ss:$16 sps:$4 sm:$0xff]  }
  0x68   : > { %v3573_v44 = vld [vmem:[%s3972_s20 + $0x40] ss:$16 sps:$4 sm:$0xff]   ;;  %v3575_v46 = vld [vmem:[%s3972_s20 + $0x64] ss:$16 sps:$4 sm:$0xff]   ;;  %v3583_v51 = vld [vmem:[%s3972_s20 + $0x8c] ss:$16 sps:$4 sm:$0xff]  }
  0x69   : > { %1471 = vmatpush1.bf16.msra.mxu0 %v3531_v10  ;;  %v3579_v48 = vld [vmem:[%s3972_s20 + $0x60] ss:$16 sps:$4 sm:$0xff]   ;;  %v3581_v50 = vld [vmem:[%s3972_s20 + $0x84] ss:$16 sps:$4 sm:$0xff]   ;;  %v3586_v53 = vld [vmem:[%s3972_s20 + $0x88] ss:$16 sps:$4 sm:$0xff]  }
  0x6a   : > { %1760 = vmatpush1.bf16.msra.mxu1 %v3532_v11  ;;  %1472 = vmatprep.subr.bf16.mxu0 %v3850_v1  ;;  %v3585_v52 = vld [vmem:[%s3972_s20 + $0x80] ss:$16 sps:$4 sm:$0xff]   ;;  %v3587_v54 = vld [vmem:[%s3972_s20 + $0xa4] ss:$16 sps:$4 sm:$0xff]   ;;  %v3589_v55 = vld [vmem:[%s3972_s20 + $0xac] ss:$16 sps:$4 sm:$0xff]  }
  0x6b   : > { %1761 = vmatprep.subr.bf16.mxu1 %v3850_v1  ;;  %v3591_v56 = vld [vmem:[%s3972_s20 + $0xa0] ss:$16 sps:$4 sm:$0xff]   ;;  %v3592_v57 = vld [vmem:[%s3972_s20 + $0xa8] ss:$16 sps:$4 sm:$0xff]   ;;  %v3593_v58 = vld [vmem:[%s3972_s20 + $0xc4] ss:$16 sps:$4 sm:$0xff]  }
  0x6c   : > { %v3595_v59 = vld [vmem:[%s3972_s20 + $0xcc] ss:$16 sps:$4 sm:$0xff]   ;;  %v3597_v60 = vld [vmem:[%s3972_s20 + $0xc0] ss:$16 sps:$4 sm:$0xff]   ;;  %v3598_v61 = vld [vmem:[%s3972_s20 + $0xc8] ss:$16 sps:$4 sm:$0xff]  }
  0x6d   : > { %1473 = vmatpush1.bf16.msra.mxu0 %v3533_v12  ;;  %v3599_v62 = vld [vmem:[%s3972_s20 + $0xe4] ss:$16 sps:$4 sm:$0xff]   ;;  %v3601_v63 = vld [vmem:[%s3972_s20 + $0xec] ss:$16 sps:$4 sm:$0xff]   ;;  %v3603_v0 = vld [vmem:[%s3972_s20 + $0xe0] ss:$16 sps:$4 sm:$0xff]  }
  0x6e   : > { %1762 = vmatpush1.bf16.msra.mxu1 %v3534_v13  ;;  %1474 = vmatprep.subr.bf16.mxu0 %v3850_v1  ;;  %v3605_v2 = vld [vmem:[%s3972_s20 + $0x104] ss:$16 sps:$4 sm:$0xff]   ;;  %v3607_v3 = vld [vmem:[%s3972_s20 + $0x10c] ss:$16 sps:$4 sm:$0xff]   ;;  %v3609_v4 = vld [vmem:[%s3972_s20 + $0x100] ss:$16 sps:$4 sm:$0xff]  }
  0x6f   : > { %1763 = vmatprep.subr.bf16.mxu1 %v3850_v1  ;;  %v3610_v5 = vld [vmem:[%s3972_s20 + $0x108] ss:$16 sps:$4 sm:$0xff]   ;;  %v3611_v6 = vld [vmem:[%s3972_s20 + $0x124] ss:$16 sps:$4 sm:$0xff]   ;;  %v3613_v7 = vld [vmem:[%s3972_s20 + $0x12c] ss:$16 sps:$4 sm:$0xff]  }
  0x70   : > { %v3615_v8 = vld [vmem:[%s3972_s20 + $0x120] ss:$16 sps:$4 sm:$0xff]   ;;  %v3616_v9 = vld [vmem:[%s3972_s20 + $0x128] ss:$16 sps:$4 sm:$0xff]   ;;  %v3617_v10 = vld [vmem:[%s3972_s20 + $0x144] ss:$16 sps:$4 sm:$0xff]  }
  0x71   : > { %1475 = vmatpush1.bf16.msra.mxu0 %v3535_v14  ;;  %v3619_v11 = vld [vmem:[%s3972_s20 + $0x14c] ss:$16 sps:$4 sm:$0xff]   ;;  %v3621_v12 = vld [vmem:[%s3972_s20 + $0x140] ss:$16 sps:$4 sm:$0xff]   ;;  %v3622_v13 = vld [vmem:[%s3972_s20 + $0x148] ss:$16 sps:$4 sm:$0xff]  }
  0x72   : > { %1764 = vmatpush1.bf16.msra.mxu1 %v3536_v15  ;;  %1476 = vmatprep.subr.bf16.mxu0 %v3850_v1  ;;  %v3623_v14 = vld [vmem:[%s3972_s20 + $0x164] ss:$16 sps:$4 sm:$0xff]   ;;  %v3625_v15 = vld [vmem:[%s3972_s20 + $0x16c] ss:$16 sps:$4 sm:$0xff]  }
  0x73   : > { %1765 = vmatprep.subr.bf16.mxu1 %v3850_v1 }
  0x75   : > { %1477 = vmatpush1.bf16.msra.mxu0 %v3537_v16  ;;  %v3627_v16 = vld [vmem:[%s3972_s20 + $0x160] ss:$16 sps:$4 sm:$0xff]  }
  0x76   : > { %1766 = vmatpush1.bf16.msra.mxu1 %v3538_v17  ;;  %1478 = vmatprep.subr.bf16.mxu0 %v3850_v1  ;;  %v3628_v17 = vld [vmem:[%s3972_s20 + $0x168] ss:$16 sps:$4 sm:$0xff]  }
  0x77   : > { %1767 = vmatprep.subr.bf16.mxu1 %v3850_v1 }
  0x79   : > { %1479 = vmatpush1.bf16.msra.mxu0 %v3539_v18  ;;  %v3629_v18 = vld [vmem:[%s3972_s20 + $0x184] ss:$16 sps:$4 sm:$0xff]  }
  0x7a   : > { %1768 = vmatpush1.bf16.msra.mxu1 %v3540_v19  ;;  %1480 = vmatprep.subr.bf16.mxu0 %v3850_v1  ;;  %v3631_v19 = vld [vmem:[%s3972_s20 + $0x18c] ss:$16 sps:$4 sm:$0xff]  }
  0x7b   : > { %1769 = vmatprep.subr.bf16.mxu1 %v3850_v1 }
  0x7d   : > { %1481 = vmatpush2.bf16.msra.mxu0 %v3541_v20  ;;  %v3633_v20 = vld [vmem:[%s3972_s20 + $0x180] ss:$16 sps:$4 sm:$0xff]  }
  0x7e   : > { %1770 = vmatpush2.bf16.msra.mxu1 %v3542_v21  ;;  %1482 = vmatprep.subr.bf16.mxu0 %v3850_v1  ;;  %v3634_v21 = vld [vmem:[%s3972_s20 + $0x188] ss:$16 sps:$4 sm:$0xff]  }
  0x7f   : > { %1771 = vmatprep.subr.bf16.mxu1 %v3850_v1 }
  0x81   : > { %1483 = vmatpush2.bf16.msra.mxu0 %v3543_v22  ;;  %v3635_v22 = vld [vmem:[%s3972_s20 + $0x1a4] ss:$16 sps:$4 sm:$0xff]  }
  0x82   : > { %1772 = vmatpush2.bf16.msra.mxu1 %v3544_v23  ;;  %1484 = vmatprep.subr.bf16.mxu0 %v3850_v1  ;;  %v3637_v23 = vld [vmem:[%s3972_s20 + $0x1ac] ss:$16 sps:$4 sm:$0xff]  }
  0x83   : > { %1773 = vmatprep.subr.bf16.mxu1 %v3850_v1 }
  0x85   : > { %1485 = vmatpush2.bf16.msra.mxu0 %v3545_v24  ;;  %v3639_v24 = vld [vmem:[%s3972_s20 + $0x1a0] ss:$16 sps:$4 sm:$0xff]  }
  0x86   : > { %1774 = vmatpush2.bf16.msra.mxu1 %v3546_v25  ;;  %1486 = vmatprep.subr.bf16.mxu0 %v3850_v1  ;;  %v3640_v25 = vld [vmem:[%s3972_s20 + $0x1a8] ss:$16 sps:$4 sm:$0xff]  }
  0x87   : > { %1775 = vmatprep.subr.bf16.mxu1 %v3850_v1 }
  0x89   : > { %1487 = vmatpush2.bf16.msra.mxu0 %v3547_v26  ;;  %v3641_v26 = vld [vmem:[%s3972_s20 + $0x1c4] ss:$16 sps:$4 sm:$0xff]  }
  0x8a   : > { %1776 = vmatpush2.bf16.msra.mxu1 %v3548_v27  ;;  %1488 = vmatprep.subr.bf16.mxu0 %v3850_v1  ;;  %v3643_v27 = vld [vmem:[%s3972_s20 + $0x1cc] ss:$16 sps:$4 sm:$0xff]  }
  0x8b   : > { %1777 = vmatprep.subr.bf16.mxu1 %v3850_v1 }
  0x8d   : > { %1489 = vmatpush2.bf16.msra.mxu0 %v3549_v28  ;;  %v3645_v28 = vld [vmem:[%s3972_s20 + $0x1c0] ss:$16 sps:$4 sm:$0xff]  }
  0x8e   : > { %1778 = vmatpush2.bf16.msra.mxu1 %v3550_v29  ;;  %1490 = vmatprep.subr.bf16.mxu0 %v3850_v1  ;;  %v3646_v29 = vld [vmem:[%s3972_s20 + $0x1c8] ss:$16 sps:$4 sm:$0xff]  }
  0x8f   : > { %1779 = vmatprep.subr.bf16.mxu1 %v3850_v1 }
  0x91   : > { %1491 = vmatpush2.bf16.msra.mxu0 %v3551_v30  ;;  %v3647_v30 = vld [vmem:[%s3972_s20 + $0x1e4] ss:$16 sps:$4 sm:$0xff]  }
  0x92   : > { %1780 = vmatpush2.bf16.msra.mxu1 %v3552_v31  ;;  %1492 = vmatprep.subr.bf16.mxu0 %v3850_v1  ;;  %v3649_v31 = vld [vmem:[%s3972_s20 + $0x1ec] ss:$16 sps:$4 sm:$0xff]  }
  0x93   : > { %1781 = vmatprep.subr.bf16.mxu1 %v3850_v1 }
  0x95   : > { %1493 = vmatpush2.bf16.msra.mxu0 %v3553_v32  ;;  %v3651_v32 = vld [vmem:[%s3972_s20 + $0x1e0] ss:$16 sps:$4 sm:$0xff]  }
  0x96   : > { %1782 = vmatpush2.bf16.msra.mxu1 %v3554_v33  ;;  %1494 = vmatprep.subr.bf16.mxu0 %v3850_v1  ;;  %v3652_v33 = vld [vmem:[%s3972_s20 + $0x1e8] ss:$16 sps:$4 sm:$0xff]  }
  0x97   : > { %1783 = vmatprep.subr.bf16.mxu1 %v3850_v1  ;;  %v3604_v1 = vld [vmem:[%s3972_s20 + $0xe8] ss:$16 sps:$4 sm:$0xff]  }
  0x99   : > { %1495 = vmatpush2.bf16.msra.mxu0 %v3555_v34  ;;  %v3653_v34 = vld [vmem:[%s3972_s20 + $0x204] ss:$16 sps:$4 sm:$0xff]  }
  0x9a   : > { %1784 = vmatpush2.bf16.msra.mxu1 %v3556_v35  ;;  %v3655_v35 = vld [vmem:[%s3972_s20 + $0x20c] ss:$16 sps:$4 sm:$0xff]  }
  0x9c   : > { %1497 = vmatmul.mubr.bf16.vlgmr.msra.gmra.mxu0 %v3557_v36  ;;  %v3657_v36 = vld [vmem:[%s3972_s20 + $0x200] ss:$16 sps:$4 sm:$0xff]  }
  0x9d   : > { %1786 = vmatmul.mubr.bf16.vlgmr.msra.gmra.mxu1 %v3560_v37  ;;  %1504 = vmatprep.mubr.bf16.mxu0 %v3563_v38  ;;  %v3658_v37 = vld [vmem:[%s3972_s20 + $0x208] ss:$16 sps:$4 sm:$0xff]   ;;  %v3659_v38 = vld [vmem:[%s3972_s20 + $0x224] ss:$16 sps:$4 sm:$0xff]  }
  0x9e   : > { %1793 = vmatprep.mubr.bf16.mxu1 %v3565_v39  ;;  %v3661_v39 = vld [vmem:[%s3972_s20 + $0x22c] ss:$16 sps:$4 sm:$0xff]  }
  0xa4   : > { %1505 = vmatmul.mubr.bf16.gmra.mxu0 %v3567_v40  ;;  %v3663_v40 = vld [vmem:[%s3972_s20 + $0x220] ss:$16 sps:$4 sm:$0xff]  }
  0xa5   : > { %1794 = vmatmul.mubr.bf16.gmra.mxu1 %v3568_v41  ;;  %1512 = vmatprep.mubr.bf16.mxu0 %v3569_v42  ;;  %v3664_v41 = vld [vmem:[%s3972_s20 + $0x228] ss:$16 sps:$4 sm:$0xff]   ;;  %v3665_v42 = vld [vmem:[%s3972_s20 + $0x244] ss:$16 sps:$4 sm:$0xff]  }
  0xa6   : > { %1801 = vmatprep.mubr.bf16.mxu1 %v3571_v43  ;;  %v3667_v43 = vld [vmem:[%s3972_s20 + $0x24c] ss:$16 sps:$4 sm:$0xff]  }
  0xac   : > { %1513 = vmatmul.mubr.bf16.gmra.mxu0 %v3573_v44  ;;  %v3669_v44 = vld [vmem:[%s3972_s20 + $0x240] ss:$16 sps:$4 sm:$0xff]  }
  0xad   : > { %1802 = vmatmul.mubr.bf16.gmra.mxu1 %v3574_v45  ;;  %1520 = vmatprep.mubr.bf16.mxu0 %v3575_v46  ;;  %v3670_v45 = vld [vmem:[%s3972_s20 + $0x248] ss:$16 sps:$4 sm:$0xff]   ;;  %v3671_v46 = vld [vmem:[%s3972_s20 + $0x264] ss:$16 sps:$4 sm:$0xff]  }
  0xae   : > { %1809 = vmatprep.mubr.bf16.mxu1 %v3577_v47  ;;  %v3673_v47 = vld [vmem:[%s3972_s20 + $0x26c] ss:$16 sps:$4 sm:$0xff]  }
  0xb4   : > { %1521 = vmatmul.mubr.bf16.gmra.mxu0 %v3579_v48  ;;  %v3675_v48 = vld [vmem:[%s3972_s20 + $0x260] ss:$16 sps:$4 sm:$0xff]  }
  0xb5   : > { %1810 = vmatmul.mubr.bf16.gmra.mxu1 %v3580_v49  ;;  %1528 = vmatprep.mubr.bf16.mxu0 %v3581_v50  ;;  %v3676_v49 = vld [vmem:[%s3972_s20 + $0x268] ss:$16 sps:$4 sm:$0xff]   ;;  %v3677_v50 = vld [vmem:[%s3972_s20 + $0x284] ss:$16 sps:$4 sm:$0xff]  }
  0xb6   : > { %1817 = vmatprep.mubr.bf16.mxu1 %v3583_v51  ;;  %v3679_v51 = vld [vmem:[%s3972_s20 + $0x28c] ss:$16 sps:$4 sm:$0xff]  }
  0xbc   : > { %1529 = vmatmul.mubr.bf16.gmra.mxu0 %v3585_v52  ;;  %v3681_v52 = vld [vmem:[%s3972_s20 + $0x280] ss:$16 sps:$4 sm:$0xff]  }
  0xbd   : > { %1818 = vmatmul.mubr.bf16.gmra.mxu1 %v3586_v53  ;;  %1536 = vmatprep.mubr.bf16.mxu0 %v3587_v54  ;;  %v3682_v53 = vld [vmem:[%s3972_s20 + $0x288] ss:$16 sps:$4 sm:$0xff]   ;;  %v3683_v54 = vld [vmem:[%s3972_s20 + $0x2a4] ss:$16 sps:$4 sm:$0xff]  }
  0xbe   : > { %1825 = vmatprep.mubr.bf16.mxu1 %v3589_v55  ;;  %v3685_v55 = vld [vmem:[%s3972_s20 + $0x2ac] ss:$16 sps:$4 sm:$0xff]  }
  0xc4   : > { %1537 = vmatmul.mubr.bf16.gmra.mxu0 %v3591_v56  ;;  %v3687_v56 = vld [vmem:[%s3972_s20 + $0x2a0] ss:$16 sps:$4 sm:$0xff]  }
  0xc5   : > { %1826 = vmatmul.mubr.bf16.gmra.mxu1 %v3592_v57  ;;  %1544 = vmatprep.mubr.bf16.mxu0 %v3593_v58  ;;  %v3688_v57 = vld [vmem:[%s3972_s20 + $0x2a8] ss:$16 sps:$4 sm:$0xff]   ;;  %v3689_v58 = vld [vmem:[%s3972_s20 + $0x2c4] ss:$16 sps:$4 sm:$0xff]  }
  0xc6   : > { %1833 = vmatprep.mubr.bf16.mxu1 %v3595_v59  ;;  %v3691_v59 = vld [vmem:[%s3972_s20 + $0x2cc] ss:$16 sps:$4 sm:$0xff]  }
  0xcc   : > { %1545 = vmatmul.mubr.bf16.gmra.mxu0 %v3597_v60  ;;  %v3693_v60 = vld [vmem:[%s3972_s20 + $0x2c0] ss:$16 sps:$4 sm:$0xff]  }
  0xcd   : > { %1834 = vmatmul.mubr.bf16.gmra.mxu1 %v3598_v61  ;;  %1552 = vmatprep.mubr.bf16.mxu0 %v3599_v62  ;;  %v3694_v61 = vld [vmem:[%s3972_s20 + $0x2c8] ss:$16 sps:$4 sm:$0xff]   ;;  %v3695_v62 = vld [vmem:[%s3972_s20 + $0x2e4] ss:$16 sps:$4 sm:$0xff]  }
  0xce   : > { %1841 = vmatprep.mubr.bf16.mxu1 %v3601_v63  ;;  %v3697_v63 = vld [vmem:[%s3972_s20 + $0x2ec] ss:$16 sps:$4 sm:$0xff]  }
  0xd4   : > { %1553 = vmatmul.mubr.bf16.gmra.mxu0 %v3603_v0  ;;  %v3699_v0 = vld [vmem:[%s3972_s20 + $0x2e0] ss:$16 sps:$4 sm:$0xff]  }
  0xd5   : > { %1842 = vmatmul.mubr.bf16.gmra.mxu1 %v3604_v1  ;;  %1560 = vmatprep.mubr.bf16.mxu0 %v3605_v2  ;;  %v3700_v1 = vld [vmem:[%s3972_s20 + $0x2e8] ss:$16 sps:$4 sm:$0xff]   ;;  %v3701_v2 = vld [vmem:[%s3972_s20 + $0x304] ss:$16 sps:$4 sm:$0xff]  }
  0xd6   : > { %1849 = vmatprep.mubr.bf16.mxu1 %v3607_v3  ;;  %v3703_v3 = vld [vmem:[%s3972_s20 + $0x30c] ss:$16 sps:$4 sm:$0xff]  }
  0xdc   : > { %1561 = vmatmul.mubr.bf16.gmra.mxu0 %v3609_v4  ;;  %v3705_v4 = vld [vmem:[%s3972_s20 + $0x300] ss:$16 sps:$4 sm:$0xff]  }
  0xdd   : > { %1850 = vmatmul.mubr.bf16.gmra.mxu1 %v3610_v5  ;;  %1568 = vmatprep.mubr.bf16.mxu0 %v3611_v6  ;;  %v3706_v5 = vld [vmem:[%s3972_s20 + $0x308] ss:$16 sps:$4 sm:$0xff]   ;;  %v3707_v6 = vld [vmem:[%s3972_s20 + $0x324] ss:$16 sps:$4 sm:$0xff]  }
  0xde   : > { %1857 = vmatprep.mubr.bf16.mxu1 %v3613_v7  ;;  %v3709_v7 = vld [vmem:[%s3972_s20 + $0x32c] ss:$16 sps:$4 sm:$0xff]  }
  0xe4   : > { %1569 = vmatmul.mubr.bf16.gmra.mxu0 %v3615_v8 }
  0xe5   : > { %1858 = vmatmul.mubr.bf16.gmra.mxu1 %v3616_v9  ;;  %1576 = vmatprep.mubr.bf16.mxu0 %v3617_v10  ;;  %v440_v9 = vld [vmem:[#allocation2 + $0xb0] sm:$0xff] }
  0xe6   : > { %1865 = vmatprep.mubr.bf16.mxu1 %v3619_v11 }
  0xec   : > { %1577 = vmatmul.mubr.bf16.gmra.mxu0 %v3621_v12 }
  0xed   : > { %1866 = vmatmul.mubr.bf16.gmra.mxu1 %v3622_v13  ;;  %1584 = vmatprep.mubr.bf16.mxu0 %v3623_v14 }
  0xee   : > { %1873 = vmatprep.mubr.bf16.mxu1 %v3625_v15 }
  0xf4   : > { %1585 = vmatmul.mubr.bf16.gmra.mxu0 %v3627_v16  ;;  %v3711_v16 = vld [vmem:[%s3972_s20 + $0x320] ss:$16 sps:$4 sm:$0xff]  }
  0xf5   : > { %1874 = vmatmul.mubr.bf16.gmra.mxu1 %v3628_v17  ;;  %1592 = vmatprep.mubr.bf16.mxu0 %v3629_v18  ;;  %v441_v17 = vld [vmem:[#allocation2 + $0x1b0] sm:$0xff] }
  0xf6   : > { %1881 = vmatprep.mubr.bf16.mxu1 %v3631_v19  ;;  %v3712_v19 = vld [vmem:[%s3972_s20 + $0x328] ss:$16 sps:$4 sm:$0xff]  }
  0xfc   : > { %1593 = vmatmul.mubr.bf16.gmra.mxu0 %v3633_v20  ;;  %v3713_v20 = vld [vmem:[%s3972_s20 + $0x344] ss:$16 sps:$4 sm:$0xff]  }
  0xfd   : > { %1882 = vmatmul.mubr.bf16.gmra.mxu1 %v3634_v21  ;;  %1600 = vmatprep.mubr.bf16.mxu0 %v3635_v22 }
  0xfe   : > { %1889 = vmatprep.mubr.bf16.mxu1 %v3637_v23  ;;  %v3715_v23 = vld [vmem:[%s3972_s20 + $0x34c] ss:$16 sps:$4 sm:$0xff]  }
 0x104   : > { %1601 = vmatmul.mubr.bf16.gmra.mxu0 %v3639_v24 }
 0x105   : > { %1890 = vmatmul.mubr.bf16.gmra.mxu1 %v3640_v25  ;;  %1608 = vmatprep.mubr.bf16.mxu0 %v3641_v26 }
 0x106   : > { %1897 = vmatprep.mubr.bf16.mxu1 %v3643_v27  ;;  %v442_v27 = vld [vmem:[#allocation2 + $0xd8] sm:$0xff] }
 0x10c   : > { %1609 = vmatmul.mubr.bf16.gmra.mxu0 %v3645_v28 }
 0x10d   : > { %1898 = vmatmul.mubr.bf16.gmra.mxu1 %v3646_v29  ;;  %1616 = vmatprep.mubr.bf16.mxu0 %v3647_v30 }
 0x10e   : > { %1905 = vmatprep.mubr.bf16.mxu1 %v3649_v31 }
 0x114   : > { %1617 = vmatmul.mubr.bf16.gmra.mxu0 %v3651_v32 }
 0x115   : > { %1906 = vmatmul.mubr.bf16.gmra.mxu1 %v3652_v33  ;;  %1624 = vmatprep.mubr.bf16.mxu0 %v3653_v34  ;;  %v3717_v34 = vld [vmem:[%s3972_s20 + $0x340] ss:$16 sps:$4 sm:$0xff]  }
 0x116   : > { %1913 = vmatprep.mubr.bf16.mxu1 %v3655_v35  ;;  %v443_v35 = vld [vmem:[#allocation2 + $0x18] sm:$0xff] }
 0x11c   : > { %1625 = vmatmul.mubr.bf16.gmra.mxu0 %v3657_v36 }
 0x11d   : > { %1914 = vmatmul.mubr.bf16.gmra.mxu1 %v3658_v37  ;;  %1632 = vmatprep.mubr.bf16.mxu0 %v3659_v38  ;;  %v3718_v37 = vld [vmem:[%s3972_s20 + $0x348] ss:$16 sps:$4 sm:$0xff]   ;;  %v3719_v38 = vld [vmem:[%s3972_s20 + $0x364] ss:$16 sps:$4 sm:$0xff]  }
 0x11e   : > { %1921 = vmatprep.mubr.bf16.mxu1 %v3661_v39 }
 0x124   : > { %1633 = vmatmul.mubr.bf16.gmra.mxu0 %v3663_v40 }
 0x125   : > { %1922 = vmatmul.mubr.bf16.gmra.mxu1 %v3664_v41  ;;  %1640 = vmatprep.mubr.bf16.mxu0 %v3665_v42  ;;  %v3721_v41 = vld [vmem:[%s3972_s20 + $0x36c] ss:$16 sps:$4 sm:$0xff]  }
 0x126   : > { %1929 = vmatprep.mubr.bf16.mxu1 %v3667_v43 }
 0x12c   : > { %1641 = vmatmul.mubr.bf16.gmra.mxu0 %v3669_v44 }
 0x12d   : > { %1930 = vmatmul.mubr.bf16.gmra.mxu1 %v3670_v45  ;;  %1648 = vmatprep.mubr.bf16.mxu0 %v3671_v46  ;;  %v444_v45 = vld [vmem:[#allocation2 + $0x50] sm:$0xff] }
 0x12e   : > { %1937 = vmatprep.mubr.bf16.mxu1 %v3673_v47 }
 0x134   : > { %1649 = vmatmul.mubr.bf16.gmra.mxu0 %v3675_v48 }
 0x135   : > { %1938 = vmatmul.mubr.bf16.gmra.mxu1 %v3676_v49  ;;  %1656 = vmatprep.mubr.bf16.mxu0 %v3677_v50 }
 0x136   : > { %1945 = vmatprep.mubr.bf16.mxu1 %v3679_v51 }
 0x13c   : > { %1657 = vmatmul.mubr.bf16.gmra.mxu0 %v3681_v52  ;;  %v3723_v52 = vld [vmem:[%s3972_s20 + $0x360] ss:$16 sps:$4 sm:$0xff]  }
 0x13d   : > { %1946 = vmatmul.mubr.bf16.gmra.mxu1 %v3682_v53  ;;  %1664 = vmatprep.mubr.bf16.mxu0 %v3683_v54  ;;  %v445_v53 = vld [vmem:[#allocation2 + $0x168] sm:$0xff] }
 0x13e   : > { %1953 = vmatprep.mubr.bf16.mxu1 %v3685_v55  ;;  %v3724_v55 = vld [vmem:[%s3972_s20 + $0x368] ss:$16 sps:$4 sm:$0xff]  }
 0x144   : > { %1665 = vmatmul.mubr.bf16.gmra.mxu0 %v3687_v56  ;;  %v3727_v56 = vld [vmem:[%s3972_s20 + $0x384] ss:$16 sps:$4 sm:$0xff]  }
 0x145   : > { %1954 = vmatmul.mubr.bf16.gmra.mxu1 %v3688_v57  ;;  %1672 = vmatprep.mubr.bf16.mxu0 %v3689_v58 }
 0x146   : > { %1961 = vmatprep.mubr.bf16.mxu1 %v3691_v59  ;;  %v3730_v59 = vld [vmem:[%s3972_s20 + $0x38c] ss:$16 sps:$4 sm:$0xff]  }
 0x14c   : > { %1673 = vmatmul.mubr.bf16.gmra.mxu0 %v3693_v60 }
 0x14d   : > { %1962 = vmatmul.mubr.bf16.gmra.mxu1 %v3694_v61  ;;  %1680 = vmatprep.mubr.bf16.mxu0 %v3695_v62 }
 0x14e   : > { %1969 = vmatprep.mubr.bf16.mxu1 %v3697_v63  ;;  %v446_v63 = vld [vmem:[#allocation2 + $0x130] sm:$0xff] }
 0x154   : > { %1681 = vmatmul.mubr.bf16.gmra.mxu0 %v3699_v0 }
 0x155   : > { %1970 = vmatmul.mubr.bf16.gmra.mxu1 %v3700_v1  ;;  %1688 = vmatprep.mubr.bf16.mxu0 %v3701_v2 }
 0x156   : > { %1977 = vmatprep.mubr.bf16.mxu1 %v3703_v3 }
 0x15c   : > { %v1498_v8 = vpop.f32.mrf.mxu0  ;;  %1689 = vmatmul.mubr.bf16.gmra.mxu0 %v3705_v4 }
 0x15d   : > { %v1787_v10 = vpop.f32.mrf.mxu1  ;;  %1978 = vmatmul.mubr.bf16.gmra.mxu1 %v3706_v5  ;;  %1696 = vmatprep.mubr.bf16.mxu0 %v3707_v6  ;;  %v3725_v6 = vld [vmem:[%s3972_s20 + $0x380] ss:$16 sps:$4 sm:$0xff]  }
 0x15e   : > { %v1788_v11 = vadd.f32 %v1787_v10, %v1498_v8  ;;  %v1500_v12 = vpop.f32.mrf.mxu0  ;;  %1985 = vmatprep.mubr.bf16.mxu1 %v3709_v7  ;;  %v447_v7 = vld [vmem:[#allocation2 + $0x48] sm:$0xff]  ;;  %v3733_v10 = vld [vmem:[%s3972_s20 + $0x3a4] ss:$16 sps:$4 sm:$0xff]  }
 0x15f   : > { %v1789_v13 = vpop.f32.mrf.mxu1 }
 0x160   : > { %v2042_v14 = vadd.f32 %v1788_v11, %v440_v9  ;;  %v1501_v15 = vpop.f32.mrf.mxu0  ;;  %v3728_v9 = vld [vmem:[%s3972_s20 + $0x388] ss:$16 sps:$4 sm:$0xff]   ;;  %v3736_v13 = vld [vmem:[%s3972_s20 + $0x3ac] ss:$16 sps:$4 sm:$0xff]  }
 0x161   : > { %v1790_v18 = vpop.f32.mrf.mxu1 }
 0x162   : > { %2106 = vst [vmem:[#allocation2 + $0xb0] sm:$0xff] %v2042_v14  ;;  %v1791_v21 = vadd.f32 %v1790_v18, %v1501_v15  ;;  %v1503_v22 = vpop.f32.mrf.mxu0 }
 0x163   : > { %v1792_v24 = vpop.f32.mrf.mxu1 }
 0x164   : > { %v2043_v25 = vadd.f32 %v1791_v21, %v441_v17  ;;  %v1506_v26 = vpop.f32.mrf.mxu0  ;;  %1697 = vmatmul.mubr.bf16.gmra.mxu0 %v3711_v16  ;;  %v448_v17 = vld [vmem:[#allocation2 + $0x180] sm:$0xff] }
 0x165   : > { %v1795_v28 = vpop.f32.mrf.mxu1  ;;  %1986 = vmatmul.mubr.bf16.gmra.mxu1 %v3712_v19  ;;  %1704 = vmatprep.mubr.bf16.mxu0 %v3713_v20  ;;  %v3731_v24 = vld [vmem:[%s3972_s20 + $0x3a0] ss:$16 sps:$4 sm:$0xff]  }
 0x166   : > { %2107 = vst [vmem:[#allocation2 + $0x1b0] sm:$0xff] %v2043_v25  ;;  %v1796_v29 = vadd.f32 %v1795_v28, %v1506_v26  ;;  %v1508_v30 = vpop.f32.mrf.mxu0  ;;  %1993 = vmatprep.mubr.bf16.mxu1 %v3715_v23  ;;  %v449_v25 = vld [vmem:[#allocation2 + $0x110] sm:$0xff] }
 0x167   : > { %v1797_v31 = vpop.f32.mrf.mxu1  ;;  %v3739_v28 = vld [vmem:[%s3972_s20 + $0x3c4] ss:$16 sps:$4 sm:$0xff]  }
 0x168   : > { %v2044_v32 = vadd.f32 %v1796_v29, %v442_v27  ;;  %v1509_v33 = vpop.f32.mrf.mxu0  ;;  %v3734_v27 = vld [vmem:[%s3972_s20 + $0x3a8] ss:$16 sps:$4 sm:$0xff]   ;;  %v3742_v31 = vld [vmem:[%s3972_s20 + $0x3cc] ss:$16 sps:$4 sm:$0xff]  }
 0x169   : > { %v1798_v36 = vpop.f32.mrf.mxu1 }
 0x16a   : > { %2108 = vst [vmem:[#allocation2 + $0xd8] sm:$0xff] %v2044_v32  ;;  %v1799_v39 = vadd.f32 %v1798_v36, %v1509_v33  ;;  %v1511_v40 = vpop.f32.mrf.mxu0 }
 0x16b   : > { %v1800_v42 = vpop.f32.mrf.mxu1 }
 0x16c   : > { %v2045_v43 = vadd.f32 %v1799_v39, %v443_v35  ;;  %v1514_v44 = vpop.f32.mrf.mxu0  ;;  %1705 = vmatmul.mubr.bf16.gmra.mxu0 %v3717_v34  ;;  %v450_v35 = vld [vmem:[#allocation2 + $0x118] sm:$0xff]  ;;  %v3737_v42 = vld [vmem:[%s3972_s20 + $0x3c0] ss:$16 sps:$4 sm:$0xff]  }
 0x16d   : > { %v1803_v46 = vpop.f32.mrf.mxu1  ;;  %1994 = vmatmul.mubr.bf16.gmra.mxu1 %v3718_v37  ;;  %1712 = vmatprep.mubr.bf16.mxu0 %v3719_v38 }
 0x16e   : > { %2109 = vst [vmem:[#allocation2 + $0x18] sm:$0xff] %v2045_v43  ;;  %v1804_v47 = vadd.f32 %v1803_v46, %v1514_v44  ;;  %v1516_v48 = vpop.f32.mrf.mxu0  ;;  %2001 = vmatprep.mubr.bf16.mxu1 %v3721_v41  ;;  %v451_v43 = vld [vmem:[#allocation2 + $0x98] sm:$0xff]  ;;  %v3745_v46 = vld [vmem:[%s3972_s20 + $0x3e4] ss:$16 sps:$4 sm:$0xff]  }
 0x16f   : > { %v1805_v49 = vpop.f32.mrf.mxu1 }
 0x170   : > { %v2046_v50 = vadd.f32 %v1804_v47, %v444_v45  ;;  %v1517_v51 = vpop.f32.mrf.mxu0  ;;  %v3740_v45 = vld [vmem:[%s3972_s20 + $0x3c8] ss:$16 sps:$4 sm:$0xff]   ;;  %v3748_v49 = vld [vmem:[%s3972_s20 + $0x3ec] ss:$16 sps:$4 sm:$0xff]  }
 0x171   : > { %v1806_v54 = vpop.f32.mrf.mxu1 }
 0x172   : > { %2110 = vst [vmem:[#allocation2 + $0x50] sm:$0xff] %v2046_v50  ;;  %v1807_v57 = vadd.f32 %v1806_v54, %v1517_v51  ;;  %v1519_v58 = vpop.f32.mrf.mxu0 }
 0x173   : > { %v1808_v60 = vpop.f32.mrf.mxu1 }
 0x174   : > { %v2047_v61 = vadd.f32 %v1807_v57, %v445_v53  ;;  %v1522_v62 = vpop.f32.mrf.mxu0  ;;  %1713 = vmatmul.mubr.bf16.gmra.mxu0 %v3723_v52  ;;  %v452_v53 = vld [vmem:[#allocation2 + $0x120] sm:$0xff] }
 0x175   : > { %v1811_v0 = vpop.f32.mrf.mxu1  ;;  %2002 = vmatmul.mubr.bf16.gmra.mxu1 %v3724_v55  ;;  %1720 = vmatprep.mubr.bf16.mxu0 %v3727_v56  ;;  %v3743_v60 = vld [vmem:[%s3972_s20 + $0x3e0] ss:$16 sps:$4 sm:$0xff]  }
 0x176   : > { %2111 = vst [vmem:[#allocation2 + $0x168] sm:$0xff] %v2047_v61  ;;  %v1812_v1 = vadd.f32 %v1811_v0, %v1522_v62  ;;  %v1524_v2 = vpop.f32.mrf.mxu0  ;;  %2009 = vmatprep.mubr.bf16.mxu1 %v3730_v59  ;;  %v453_v61 = vld [vmem:[#allocation2 + $0x150] sm:$0xff] }
 0x177   : > { %v1813_v3 = vpop.f32.mrf.mxu1 }
 0x178   : > { %v2048_v4 = vadd.f32 %v1812_v1, %v446_v63  ;;  %v1525_v5 = vpop.f32.mrf.mxu0  ;;  %v3746_v63 = vld [vmem:[%s3972_s20 + $0x3e8] ss:$16 sps:$4 sm:$0xff]  }
 0x179   : > { %v1814_v8 = vpop.f32.mrf.mxu1 }
 0x17a   : > { %2112 = vst [vmem:[#allocation2 + $0x130] sm:$0xff] %v2048_v4  ;;  %v1815_v11 = vadd.f32 %v1814_v8, %v1525_v5  ;;  %v1527_v12 = vpop.f32.mrf.mxu0  ;;  %v454_v5 = vld [vmem:[#allocation2 + $0x108] sm:$0xff] }
 0x17b   : > { %v1816_v14 = vpop.f32.mrf.mxu1  ;;  %v455_v12 = vld [vmem:[#allocation2 + $0x60] sm:$0xff] }
 0x17c   : > { %v2049_v15 = vadd.f32 %v1815_v11, %v447_v7  ;;  %v1530_v16 = vpop.f32.mrf.mxu0  ;;  %1721 = vmatmul.mubr.bf16.gmra.mxu0 %v3725_v6 }
 0x17d   : > { %v1819_v18 = vpop.f32.mrf.mxu1  ;;  %2010 = vmatmul.mubr.bf16.gmra.mxu1 %v3728_v9  ;;  %1728 = vmatprep.mubr.bf16.mxu0 %v3733_v10 }
 0x17e   : > { %2113 = vst [vmem:[#allocation2 + $0x48] sm:$0xff] %v2049_v15  ;;  %v1820_v19 = vadd.f32 %v1819_v18, %v1530_v16  ;;  %v1532_v20 = vpop.f32.mrf.mxu0  ;;  %2017 = vmatprep.mubr.bf16.mxu1 %v3736_v13 }
 0x17f   : > { %v1821_v21 = vpop.f32.mrf.mxu1 }
 0x180   : > { %v2050_v22 = vadd.f32 %v1820_v19, %v448_v17  ;;  %v1533_v23 = vpop.f32.mrf.mxu0  ;;  %v456_v19 = vld [vmem:[#allocation2 + $0xe0] sm:$0xff] }
 0x181   : > { %v1822_v26 = vpop.f32.mrf.mxu1 }
 0x182   : > { %2114 = vst [vmem:[#allocation2 + $0x180] sm:$0xff] %v2050_v22  ;;  %v1823_v29 = vadd.f32 %v1822_v26, %v1533_v23  ;;  %v1535_v30 = vpop.f32.mrf.mxu0  ;;  %v457_v26 = vld [vmem:[#allocation2 + $0x188] sm:$0xff] }
 0x183   : > { %v1824_v32 = vpop.f32.mrf.mxu1 }
 0x184   : > { %v2051_v33 = vadd.f32 %v1823_v29, %v449_v25  ;;  %v1538_v34 = vpop.f32.mrf.mxu0  ;;  %1729 = vmatmul.mubr.bf16.gmra.mxu0 %v3731_v24 }
 0x185   : > { %v1827_v36 = vpop.f32.mrf.mxu1  ;;  %2018 = vmatmul.mubr.bf16.gmra.mxu1 %v3734_v27  ;;  %1736 = vmatprep.mubr.bf16.mxu0 %v3739_v28 }
 0x186   : > { %2115 = vst [vmem:[#allocation2 + $0x110] sm:$0xff] %v2051_v33  ;;  %v1828_v37 = vadd.f32 %v1827_v36, %v1538_v34  ;;  %v1540_v38 = vpop.f32.mrf.mxu0  ;;  %2025 = vmatprep.mubr.bf16.mxu1 %v3742_v31  ;;  %v458_v33 = vld [vmem:[#allocation2 + $0x138] sm:$0xff] }
 0x187   : > { %v1829_v39 = vpop.f32.mrf.mxu1 }
 0x188   : > { %v2052_v40 = vadd.f32 %v1828_v37, %v450_v35  ;;  %v1541_v41 = vpop.f32.mrf.mxu0 }
 0x189   : > { %v1830_v44 = vpop.f32.mrf.mxu1 }
 0x18a   : > { %2116 = vst [vmem:[#allocation2 + $0x118] sm:$0xff] %v2052_v40  ;;  %v1831_v47 = vadd.f32 %v1830_v44, %v1541_v41  ;;  %v1543_v48 = vpop.f32.mrf.mxu0  ;;  %v459_v40 = vld [vmem:[#allocation2 + $0x140] sm:$0xff] }
 0x18b   : > { %v1832_v50 = vpop.f32.mrf.mxu1 }
 0x18c   : > { %v2053_v51 = vadd.f32 %v1831_v47, %v451_v43  ;;  %v1546_v52 = vpop.f32.mrf.mxu0  ;;  %1737 = vmatmul.mubr.bf16.gmra.mxu0 %v3737_v42  ;;  %v460_v47 = vld [vmem:[#allocation2 + $0x80] sm:$0xff] }
 0x18d   : > { %v1835_v54 = vpop.f32.mrf.mxu1  ;;  %2026 = vmatmul.mubr.bf16.gmra.mxu1 %v3740_v45  ;;  %1744 = vmatprep.mubr.bf16.mxu0 %v3745_v46 }
 0x18e   : > { %2117 = vst [vmem:[#allocation2 + $0x98] sm:$0xff] %v2053_v51  ;;  %v1836_v55 = vadd.f32 %v1835_v54, %v1546_v52  ;;  %v1548_v56 = vpop.f32.mrf.mxu0  ;;  %2033 = vmatprep.mubr.bf16.mxu1 %v3748_v49  ;;  %v461_v54 = vld [vmem:[#allocation2 + $0x1a8] sm:$0xff] }
 0x18f   : > { %v1837_v57 = vpop.f32.mrf.mxu1 }
 0x190   : > { %v2054_v58 = vadd.f32 %v1836_v55, %v452_v53  ;;  %v1549_v59 = vpop.f32.mrf.mxu0 }
 0x191   : > { %v1838_v62 = vpop.f32.mrf.mxu1 }
 0x192   : > { %2118 = vst [vmem:[#allocation2 + $0x120] sm:$0xff] %v2054_v58  ;;  %v1839_v0 = vadd.f32 %v1838_v62, %v1549_v59  ;;  %v1551_v1 = vpop.f32.mrf.mxu0 }
 0x193   : > { %v1840_v2 = vpop.f32.mrf.mxu1 }
 0x194   : > { %v2055_v3 = vadd.f32 %v1839_v0, %v453_v61  ;;  %v1554_v4 = vpop.f32.mrf.mxu0  ;;  %1745 = vmatmul.mubr.bf16.gmra.mxu0 %v3743_v60  ;;  %v462_v61 = vld [vmem:[#allocation2 + $0x1b8] sm:$0xff] }
 0x195   : > { %v1843_v6 = vpop.f32.mrf.mxu1  ;;  %2034 = vmatmul.mubr.bf16.gmra.mxu1 %v3746_v63 }
 0x196   : > { %2119 = vst [vmem:[#allocation2 + $0x150] sm:$0xff] %v2055_v3  ;;  %v1844_v7 = vadd.f32 %v1843_v6, %v1554_v4  ;;  %v1556_v8 = vpop.f32.mrf.mxu0  ;;  %v463_v4 = vld [vmem:[#allocation2 + $0x28] sm:$0xff] }
 0x197   : > { %v1845_v9 = vpop.f32.mrf.mxu1 }
 0x198   : > { %v2056_v10 = vadd.f32 %v1844_v7, %v454_v5  ;;  %v1557_v11 = vpop.f32.mrf.mxu0 }
 0x199   : > { %v1846_v13 = vpop.f32.mrf.mxu1 }
 0x19a   : > { %2120 = vst [vmem:[#allocation2 + $0x108] sm:$0xff] %v2056_v10  ;;  %v1847_v14 = vadd.f32 %v1846_v13, %v1557_v11  ;;  %v1559_v15 = vpop.f32.mrf.mxu0  ;;  %v464_v11 = vld [vmem:[#allocation2 + $0x1e8] sm:$0xff] }
 0x19b   : > { %v1848_v16 = vpop.f32.mrf.mxu1 }
 0x19c   : > { %v2057_v17 = vadd.f32 %v1847_v14, %v455_v12  ;;  %v1562_v18 = vpop.f32.mrf.mxu0 }
 0x19d   : > { %v1851_v20 = vpop.f32.mrf.mxu1 }
 0x19e   : > { %2121 = vst [vmem:[#allocation2 + $0x60] sm:$0xff] %v2057_v17  ;;  %v1852_v21 = vadd.f32 %v1851_v20, %v1562_v18  ;;  %v1564_v22 = vpop.f32.mrf.mxu0  ;;  %v465_v18 = vld [vmem:[#allocation2 + $0xf8] sm:$0xff] }
 0x19f   : > { %v1853_v23 = vpop.f32.mrf.mxu1 }
 0x1a0   : > { %v2058_v24 = vadd.f32 %v1852_v21, %v456_v19  ;;  %v1565_v25 = vpop.f32.mrf.mxu0 }
 0x1a1   : > { %v1854_v27 = vpop.f32.mrf.mxu1 }
 0x1a2   : > { %2122 = vst [vmem:[#allocation2 + $0xe0] sm:$0xff] %v2058_v24  ;;  %v1855_v28 = vadd.f32 %v1854_v27, %v1565_v25  ;;  %v1567_v29 = vpop.f32.mrf.mxu0  ;;  %v466_v25 = vld [vmem:[#allocation2 + $0x160] sm:$0xff] }
 0x1a3   : > { %v1856_v30 = vpop.f32.mrf.mxu1 }
 0x1a4   : > { %v2059_v31 = vadd.f32 %v1855_v28, %v457_v26  ;;  %v1570_v32 = vpop.f32.mrf.mxu0 }
 0x1a5   : > { %v1859_v34 = vpop.f32.mrf.mxu1 }
 0x1a6   : > { %2123 = vst [vmem:[#allocation2 + $0x188] sm:$0xff] %v2059_v31  ;;  %v1860_v35 = vadd.f32 %v1859_v34, %v1570_v32  ;;  %v1572_v36 = vpop.f32.mrf.mxu0  ;;  %v467_v32 = vld [vmem:[#allocation2 + $0x30] sm:$0xff] }
 0x1a7   : > { %v1861_v37 = vpop.f32.mrf.mxu1 }
 0x1a8   : > { %v2060_v38 = vadd.f32 %v1860_v35, %v458_v33  ;;  %v1573_v39 = vpop.f32.mrf.mxu0 }
 0x1a9   : > { %v1862_v41 = vpop.f32.mrf.mxu1 }
 0x1aa   : > { %2124 = vst [vmem:[#allocation2 + $0x138] sm:$0xff] %v2060_v38  ;;  %v1863_v42 = vadd.f32 %v1862_v41, %v1573_v39  ;;  %v1575_v43 = vpop.f32.mrf.mxu0  ;;  %v468_v39 = vld [vmem:[#allocation2 + $0x1e0] sm:$0xff] }
 0x1ab   : > { %v1864_v44 = vpop.f32.mrf.mxu1 }
 0x1ac   : > { %v2061_v45 = vadd.f32 %v1863_v42, %v459_v40  ;;  %v1578_v46 = vpop.f32.mrf.mxu0 }
 0x1ad   : > { %v1867_v48 = vpop.f32.mrf.mxu1 }
 0x1ae   : > { %2125 = vst [vmem:[#allocation2 + $0x140] sm:$0xff] %v2061_v45  ;;  %v1868_v49 = vadd.f32 %v1867_v48, %v1578_v46  ;;  %v1580_v50 = vpop.f32.mrf.mxu0  ;;  %v469_v46 = vld [vmem:[#allocation2] sm:$0xff] }
 0x1af   : > { %v1869_v51 = vpop.f32.mrf.mxu1 }
 0x1b0   : > { %v2062_v52 = vadd.f32 %v1868_v49, %v460_v47  ;;  %v1581_v53 = vpop.f32.mrf.mxu0 }
 0x1b1   : > { %v1870_v55 = vpop.f32.mrf.mxu1 }
 0x1b2   : > { %2126 = vst [vmem:[#allocation2 + $0x80] sm:$0xff] %v2062_v52  ;;  %v1871_v56 = vadd.f32 %v1870_v55, %v1581_v53  ;;  %v1583_v57 = vpop.f32.mrf.mxu0  ;;  %v470_v53 = vld [vmem:[#allocation2 + $0xf0] sm:$0xff] }
 0x1b3   : > { %v1872_v58 = vpop.f32.mrf.mxu1 }
 0x1b4   : > { %v2063_v59 = vadd.f32 %v1871_v56, %v461_v54  ;;  %v1586_v60 = vpop.f32.mrf.mxu0 }
 0x1b5   : > { %v1875_v62 = vpop.f32.mrf.mxu1 }
 0x1b6   : > { %2127 = vst [vmem:[#allocation2 + $0x1a8] sm:$0xff] %v2063_v59  ;;  %v1876_v63 = vadd.f32 %v1875_v62, %v1586_v60  ;;  %v1588_v0 = vpop.f32.mrf.mxu0  ;;  %v471_v60 = vld [vmem:[#allocation2 + $0x8] sm:$0xff] }
 0x1b7   : > { %v1877_v1 = vpop.f32.mrf.mxu1 }
 0x1b8   : > { %v2064_v2 = vadd.f32 %v1876_v63, %v462_v61  ;;  %v1589_v3 = vpop.f32.mrf.mxu0 }
 0x1b9   : > { %v1878_v5 = vpop.f32.mrf.mxu1 }
 0x1ba   : > { %2128 = vst [vmem:[#allocation2 + $0x1b8] sm:$0xff] %v2064_v2  ;;  %v1879_v6 = vadd.f32 %v1878_v5, %v1589_v3  ;;  %v1591_v7 = vpop.f32.mrf.mxu0  ;;  %v472_v3 = vld [vmem:[#allocation2 + $0x148] sm:$0xff] }
 0x1bb   : > { %v1880_v8 = vpop.f32.mrf.mxu1 }
 0x1bc   : > { %v2065_v9 = vadd.f32 %v1879_v6, %v463_v4  ;;  %v1594_v10 = vpop.f32.mrf.mxu0 }
 0x1bd   : > { %v1883_v12 = vpop.f32.mrf.mxu1 }
 0x1be   : > { %2129 = vst [vmem:[#allocation2 + $0x28] sm:$0xff] %v2065_v9  ;;  %v1884_v13 = vadd.f32 %v1883_v12, %v1594_v10  ;;  %v1596_v14 = vpop.f32.mrf.mxu0  ;;  %v473_v10 = vld [vmem:[#allocation2 + $0x1d0] sm:$0xff] }
 0x1bf   : > { %v1885_v15 = vpop.f32.mrf.mxu1 }
 0x1c0   : > { %v2066_v16 = vadd.f32 %v1884_v13, %v464_v11  ;;  %v1597_v17 = vpop.f32.mrf.mxu0 }
 0x1c1   : > { %v1886_v19 = vpop.f32.mrf.mxu1 }
 0x1c2   : > { %2130 = vst [vmem:[#allocation2 + $0x1e8] sm:$0xff] %v2066_v16  ;;  %v1887_v20 = vadd.f32 %v1886_v19, %v1597_v17  ;;  %v1599_v21 = vpop.f32.mrf.mxu0  ;;  %v474_v17 = vld [vmem:[#allocation2 + $0x100] sm:$0xff] }
 0x1c3   : > { %v1888_v22 = vpop.f32.mrf.mxu1 }
 0x1c4   : > { %v2067_v23 = vadd.f32 %v1887_v20, %v465_v18  ;;  %v1602_v24 = vpop.f32.mrf.mxu0 }
 0x1c5   : > { %v1891_v26 = vpop.f32.mrf.mxu1 }
 0x1c6   : > { %2131 = vst [vmem:[#allocation2 + $0xf8] sm:$0xff] %v2067_v23  ;;  %v1892_v27 = vadd.f32 %v1891_v26, %v1602_v24  ;;  %v1604_v28 = vpop.f32.mrf.mxu0  ;;  %v475_v24 = vld [vmem:[#allocation2 + $0xc8] sm:$0xff] }
 0x1c7   : > { %v1893_v29 = vpop.f32.mrf.mxu1 }
 0x1c8   : > { %v2068_v30 = vadd.f32 %v1892_v27, %v466_v25  ;;  %v1605_v31 = vpop.f32.mrf.mxu0 }
 0x1c9   : > { %v1894_v33 = vpop.f32.mrf.mxu1 }
 0x1ca   : > { %2132 = vst [vmem:[#allocation2 + $0x160] sm:$0xff] %v2068_v30  ;;  %v1895_v34 = vadd.f32 %v1894_v33, %v1605_v31  ;;  %v1607_v35 = vpop.f32.mrf.mxu0  ;;  %v476_v31 = vld [vmem:[#allocation2 + $0x40] sm:$0xff] }
 0x1cb   : > { %v1896_v36 = vpop.f32.mrf.mxu1 }
 0x1cc   : > { %v2069_v37 = vadd.f32 %v1895_v34, %v467_v32  ;;  %v1610_v38 = vpop.f32.mrf.mxu0 }
 0x1cd   : > { %v1899_v40 = vpop.f32.mrf.mxu1 }
 0x1ce   : > { %2133 = vst [vmem:[#allocation2 + $0x30] sm:$0xff] %v2069_v37  ;;  %v1900_v41 = vadd.f32 %v1899_v40, %v1610_v38  ;;  %v1612_v42 = vpop.f32.mrf.mxu0  ;;  %v477_v38 = vld [vmem:[#allocation2 + $0x1f8] sm:$0xff] }
 0x1cf   : > { %v1901_v43 = vpop.f32.mrf.mxu1 }
 0x1d0   : > { %v2070_v44 = vadd.f32 %v1900_v41, %v468_v39  ;;  %v1613_v45 = vpop.f32.mrf.mxu0 }
 0x1d1   : > { %v1902_v47 = vpop.f32.mrf.mxu1 }
 0x1d2   : > { %2134 = vst [vmem:[#allocation2 + $0x1e0] sm:$0xff] %v2070_v44  ;;  %v1903_v48 = vadd.f32 %v1902_v47, %v1613_v45  ;;  %v1615_v49 = vpop.f32.mrf.mxu0  ;;  %v478_v45 = vld [vmem:[#allocation2 + $0x20] sm:$0xff] }
 0x1d3   : > { %v1904_v50 = vpop.f32.mrf.mxu1 }
 0x1d4   : > { %v2071_v51 = vadd.f32 %v1903_v48, %v469_v46  ;;  %v1618_v52 = vpop.f32.mrf.mxu0 }
 0x1d5   : > { %v1907_v54 = vpop.f32.mrf.mxu1 }
 0x1d6   : > { %2135 = vst [vmem:[#allocation2] sm:$0xff] %v2071_v51  ;;  %v1908_v55 = vadd.f32 %v1907_v54, %v1618_v52  ;;  %v1620_v56 = vpop.f32.mrf.mxu0  ;;  %v479_v52 = vld [vmem:[#allocation2 + $0x128] sm:$0xff] }
 0x1d7   : > { %v1909_v57 = vpop.f32.mrf.mxu1 }
 0x1d8   : > { %v2072_v58 = vadd.f32 %v1908_v55, %v470_v53  ;;  %v1621_v59 = vpop.f32.mrf.mxu0 }
 0x1d9   : > { %v1910_v61 = vpop.f32.mrf.mxu1 }
 0x1da   : > { %2136 = vst [vmem:[#allocation2 + $0xf0] sm:$0xff] %v2072_v58  ;;  %v1911_v62 = vadd.f32 %v1910_v61, %v1621_v59  ;;  %v1623_v63 = vpop.f32.mrf.mxu0  ;;  %v480_v59 = vld [vmem:[#allocation2 + $0x1a0] sm:$0xff] }
 0x1db   : > { %v1912_v0 = vpop.f32.mrf.mxu1 }
 0x1dc   : > { %v2073_v1 = vadd.f32 %v1911_v62, %v471_v60  ;;  %v1626_v2 = vpop.f32.mrf.mxu0 }
 0x1dd   : > { %v1915_v4 = vpop.f32.mrf.mxu1 }
 0x1de   : > { %2137 = vst [vmem:[#allocation2 + $0x8] sm:$0xff] %v2073_v1  ;;  %v1916_v5 = vadd.f32 %v1915_v4, %v1626_v2  ;;  %v1628_v6 = vpop.f32.mrf.mxu0  ;;  %v481_v2 = vld [vmem:[#allocation2 + $0x1f0] sm:$0xff] }
 0x1df   : > { %v1917_v7 = vpop.f32.mrf.mxu1 }
 0x1e0   : > { %v2074_v8 = vadd.f32 %v1916_v5, %v472_v3  ;;  %v1629_v9 = vpop.f32.mrf.mxu0 }
 0x1e1   : > { %v1918_v11 = vpop.f32.mrf.mxu1 }
 0x1e2   : > { %2138 = vst [vmem:[#allocation2 + $0x148] sm:$0xff] %v2074_v8  ;;  %v1919_v12 = vadd.f32 %v1918_v11, %v1629_v9  ;;  %v1631_v13 = vpop.f32.mrf.mxu0  ;;  %v482_v9 = vld [vmem:[#allocation2 + $0xe8] sm:$0xff] }
 0x1e3   : > { %v1920_v14 = vpop.f32.mrf.mxu1 }
 0x1e4   : > { %v2075_v15 = vadd.f32 %v1919_v12, %v473_v10  ;;  %v1634_v16 = vpop.f32.mrf.mxu0 }
 0x1e5   : > { %v1923_v18 = vpop.f32.mrf.mxu1 }
 0x1e6   : > { %2139 = vst [vmem:[#allocation2 + $0x1d0] sm:$0xff] %v2075_v15  ;;  %v1924_v19 = vadd.f32 %v1923_v18, %v1634_v16  ;;  %v1636_v20 = vpop.f32.mrf.mxu0  ;;  %v483_v16 = vld [vmem:[#allocation2 + $0x78] sm:$0xff] }
 0x1e7   : > { %v1925_v21 = vpop.f32.mrf.mxu1 }
 0x1e8   : > { %v2076_v22 = vadd.f32 %v1924_v19, %v474_v17  ;;  %v1637_v23 = vpop.f32.mrf.mxu0 }
 0x1e9   : > { %v1926_v25 = vpop.f32.mrf.mxu1 }
 0x1ea   : > { %2140 = vst [vmem:[#allocation2 + $0x100] sm:$0xff] %v2076_v22  ;;  %v1927_v26 = vadd.f32 %v1926_v25, %v1637_v23  ;;  %v1639_v27 = vpop.f32.mrf.mxu0  ;;  %v484_v23 = vld [vmem:[#allocation2 + $0x70] sm:$0xff] }
 0x1eb   : > { %v1928_v28 = vpop.f32.mrf.mxu1 }
 0x1ec   : > { %v2077_v29 = vadd.f32 %v1927_v26, %v475_v24  ;;  %v1642_v30 = vpop.f32.mrf.mxu0 }
 0x1ed   : > { %v1931_v32 = vpop.f32.mrf.mxu1 }
 0x1ee   : > { %2141 = vst [vmem:[#allocation2 + $0xc8] sm:$0xff] %v2077_v29  ;;  %v1932_v33 = vadd.f32 %v1931_v32, %v1642_v30  ;;  %v1644_v34 = vpop.f32.mrf.mxu0  ;;  %v485_v30 = vld [vmem:[#allocation2 + $0x90] sm:$0xff] }
 0x1ef   : > { %v1933_v35 = vpop.f32.mrf.mxu1 }
 0x1f0   : > { %v2078_v36 = vadd.f32 %v1932_v33, %v476_v31  ;;  %v1645_v37 = vpop.f32.mrf.mxu0 }
 0x1f1   : > { %v1934_v39 = vpop.f32.mrf.mxu1 }
 0x1f2   : > { %2142 = vst [vmem:[#allocation2 + $0x40] sm:$0xff] %v2078_v36  ;;  %v1935_v40 = vadd.f32 %v1934_v39, %v1645_v37  ;;  %v1647_v41 = vpop.f32.mrf.mxu0  ;;  %v486_v37 = vld [vmem:[#allocation2 + $0x1d8] sm:$0xff] }
 0x1f3   : > { %v1936_v42 = vpop.f32.mrf.mxu1 }
 0x1f4   : > { %v2079_v43 = vadd.f32 %v1935_v40, %v477_v38  ;;  %v1650_v44 = vpop.f32.mrf.mxu0 }
 0x1f5   : > { %v1939_v46 = vpop.f32.mrf.mxu1 }
 0x1f6   : > { %2143 = vst [vmem:[#allocation2 + $0x1f8] sm:$0xff] %v2079_v43  ;;  %v1940_v47 = vadd.f32 %v1939_v46, %v1650_v44  ;;  %v1652_v48 = vpop.f32.mrf.mxu0  ;;  %v487_v44 = vld [vmem:[#allocation2 + $0xd0] sm:$0xff] }
 0x1f7   : > { %v1941_v49 = vpop.f32.mrf.mxu1 }
 0x1f8   : > { %v2080_v50 = vadd.f32 %v1940_v47, %v478_v45  ;;  %v1653_v51 = vpop.f32.mrf.mxu0 }
 0x1f9   : > { %v1942_v53 = vpop.f32.mrf.mxu1 }
 0x1fa   : > { %2144 = vst [vmem:[#allocation2 + $0x20] sm:$0xff] %v2080_v50  ;;  %v1943_v54 = vadd.f32 %v1942_v53, %v1653_v51  ;;  %v1655_v55 = vpop.f32.mrf.mxu0  ;;  %v488_v51 = vld [vmem:[#allocation2 + $0xb8] sm:$0xff] }
 0x1fb   : > { %v1944_v56 = vpop.f32.mrf.mxu1 }
 0x1fc   : > { %v2081_v57 = vadd.f32 %v1943_v54, %v479_v52  ;;  %v1658_v58 = vpop.f32.mrf.mxu0 }
 0x1fd   : > { %v1947_v60 = vpop.f32.mrf.mxu1 }
 0x1fe   : > { %2145 = vst [vmem:[#allocation2 + $0x128] sm:$0xff] %v2081_v57  ;;  %v1948_v61 = vadd.f32 %v1947_v60, %v1658_v58  ;;  %v1660_v62 = vpop.f32.mrf.mxu0  ;;  %v489_v58 = vld [vmem:[#allocation2 + $0x88] sm:$0xff] }
 0x1ff   : > { %v1949_v63 = vpop.f32.mrf.mxu1 }
 0x200   : > { %v2082_v0 = vadd.f32 %v1948_v61, %v480_v59  ;;  %v1661_v1 = vpop.f32.mrf.mxu0 }
 0x201   : > { %v1950_v3 = vpop.f32.mrf.mxu1 }
 0x202   : > { %2146 = vst [vmem:[#allocation2 + $0x1a0] sm:$0xff] %v2082_v0  ;;  %v1951_v4 = vadd.f32 %v1950_v3, %v1661_v1  ;;  %v1663_v5 = vpop.f32.mrf.mxu0  ;;  %v490_v1 = vld [vmem:[#allocation2 + $0xa8] sm:$0xff] }
 0x203   : > { %v1952_v6 = vpop.f32.mrf.mxu1 }
 0x204   : > { %v2083_v7 = vadd.f32 %v1951_v4, %v481_v2  ;;  %v1666_v8 = vpop.f32.mrf.mxu0 }
 0x205   : > { %v1955_v10 = vpop.f32.mrf.mxu1 }
 0x206   : > { %2147 = vst [vmem:[#allocation2 + $0x1f0] sm:$0xff] %v2083_v7  ;;  %v1956_v11 = vadd.f32 %v1955_v10, %v1666_v8  ;;  %v1668_v12 = vpop.f32.mrf.mxu0  ;;  %v491_v8 = vld [vmem:[#allocation2 + $0x1c8] sm:$0xff] }
 0x207   : > { %v1957_v13 = vpop.f32.mrf.mxu1 }
 0x208   : > { %v2084_v14 = vadd.f32 %v1956_v11, %v482_v9  ;;  %v1669_v15 = vpop.f32.mrf.mxu0 }
 0x209   : > { %v1958_v17 = vpop.f32.mrf.mxu1 }
 0x20a   : > { %2148 = vst [vmem:[#allocation2 + $0xe8] sm:$0xff] %v2084_v14  ;;  %v1959_v18 = vadd.f32 %v1958_v17, %v1669_v15  ;;  %v1671_v19 = vpop.f32.mrf.mxu0  ;;  %v492_v15 = vld [vmem:[#allocation2 + $0x170] sm:$0xff] }
 0x20b   : > { %v1960_v20 = vpop.f32.mrf.mxu1 }
 0x20c   : > { %v2085_v21 = vadd.f32 %v1959_v18, %v483_v16  ;;  %v1674_v22 = vpop.f32.mrf.mxu0 }
 0x20d   : > { %v1963_v24 = vpop.f32.mrf.mxu1 }
 0x20e   : > { %2149 = vst [vmem:[#allocation2 + $0x78] sm:$0xff] %v2085_v21  ;;  %v1964_v25 = vadd.f32 %v1963_v24, %v1674_v22  ;;  %v1676_v26 = vpop.f32.mrf.mxu0  ;;  %v493_v22 = vld [vmem:[#allocation2 + $0x178] sm:$0xff] }
 0x20f   : > { %v1965_v27 = vpop.f32.mrf.mxu1 }
 0x210   : > { %v2086_v28 = vadd.f32 %v1964_v25, %v484_v23  ;;  %v1677_v29 = vpop.f32.mrf.mxu0 }
 0x211   : > { %v1966_v31 = vpop.f32.mrf.mxu1 }
 0x212   : > { %2150 = vst [vmem:[#allocation2 + $0x70] sm:$0xff] %v2086_v28  ;;  %v1967_v32 = vadd.f32 %v1966_v31, %v1677_v29  ;;  %v1679_v33 = vpop.f32.mrf.mxu0  ;;  %v494_v29 = vld [vmem:[#allocation2 + $0x68] sm:$0xff] }
 0x213   : > { %v1968_v34 = vpop.f32.mrf.mxu1 }
 0x214   : > { %v2087_v35 = vadd.f32 %v1967_v32, %v485_v30  ;;  %v1682_v36 = vpop.f32.mrf.mxu0 }
 0x215   : > { %v1971_v38 = vpop.f32.mrf.mxu1 }
 0x216   : > { %2151 = vst [vmem:[#allocation2 + $0x90] sm:$0xff] %v2087_v35  ;;  %v1972_v39 = vadd.f32 %v1971_v38, %v1682_v36  ;;  %v1684_v40 = vpop.f32.mrf.mxu0  ;;  %v495_v36 = vld [vmem:[#allocation2 + $0x190] sm:$0xff] }
 0x217   : > { %v1973_v41 = vpop.f32.mrf.mxu1 }
 0x218   : > { %v2088_v42 = vadd.f32 %v1972_v39, %v486_v37  ;;  %v1685_v43 = vpop.f32.mrf.mxu0 }
 0x219   : > { %v1974_v45 = vpop.f32.mrf.mxu1 }
 0x21a   : > { %2152 = vst [vmem:[#allocation2 + $0x1d8] sm:$0xff] %v2088_v42  ;;  %v1975_v46 = vadd.f32 %v1974_v45, %v1685_v43  ;;  %v1687_v47 = vpop.f32.mrf.mxu0  ;;  %v496_v43 = vld [vmem:[#allocation2 + $0x198] sm:$0xff] }
 0x21b   : > { %v1976_v48 = vpop.f32.mrf.mxu1 }
 0x21c   : > { %v2089_v49 = vadd.f32 %v1975_v46, %v487_v44  ;;  %v1690_v50 = vpop.f32.mrf.mxu0 }
 0x21d   : > { %v1979_v52 = vpop.f32.mrf.mxu1 }
 0x21e   : > { %2153 = vst [vmem:[#allocation2 + $0xd0] sm:$0xff] %v2089_v49  ;;  %v1980_v53 = vadd.f32 %v1979_v52, %v1690_v50  ;;  %v1692_v54 = vpop.f32.mrf.mxu0  ;;  %v497_v50 = vld [vmem:[#allocation2 + $0x38] sm:$0xff] }
 0x21f   : > { %v1981_v55 = vpop.f32.mrf.mxu1 }
 0x220   : > { %v2090_v56 = vadd.f32 %v1980_v53, %v488_v51  ;;  %v1693_v57 = vpop.f32.mrf.mxu0 }
 0x221   : > { %v1982_v59 = vpop.f32.mrf.mxu1 }
 0x222   : > { %2154 = vst [vmem:[#allocation2 + $0xb8] sm:$0xff] %v2090_v56  ;;  %v1983_v60 = vadd.f32 %v1982_v59, %v1693_v57  ;;  %v1695_v61 = vpop.f32.mrf.mxu0  ;;  %v498_v57 = vld [vmem:[#allocation2 + $0xc0] sm:$0xff] }
 0x223   : > { %v1984_v62 = vpop.f32.mrf.mxu1 }
 0x224   : > { %v2091_v63 = vadd.f32 %v1983_v60, %v489_v58  ;;  %v1698_v0 = vpop.f32.mrf.mxu0 }
 0x225   : > { %v1987_v2 = vpop.f32.mrf.mxu1 }
 0x226   : > { %2155 = vst [vmem:[#allocation2 + $0x88] sm:$0xff] %v2091_v63  ;;  %v1988_v3 = vadd.f32 %v1987_v2, %v1698_v0  ;;  %v1700_v4 = vpop.f32.mrf.mxu0  ;;  %v499_v0 = vld [vmem:[#allocation2 + $0x1c0] sm:$0xff] }
 0x227   : > { %v1989_v5 = vpop.f32.mrf.mxu1 }
 0x228   : > { %v2092_v6 = vadd.f32 %v1988_v3, %v490_v1  ;;  %v1701_v7 = vpop.f32.mrf.mxu0 }
 0x229   : > { %v1990_v9 = vpop.f32.mrf.mxu1 }
 0x22a   : > { %2156 = vst [vmem:[#allocation2 + $0xa8] sm:$0xff] %v2092_v6  ;;  %v1991_v10 = vadd.f32 %v1990_v9, %v1701_v7  ;;  %v1703_v11 = vpop.f32.mrf.mxu0  ;;  %v500_v7 = vld [vmem:[#allocation2 + $0x158] sm:$0xff] }
 0x22b   : > { %v1992_v12 = vpop.f32.mrf.mxu1 }
 0x22c   : > { %v2093_v13 = vadd.f32 %v1991_v10, %v491_v8  ;;  %v1706_v14 = vpop.f32.mrf.mxu0 }
 0x22d   : > { %v1995_v16 = vpop.f32.mrf.mxu1 }
 0x22e   : > { %2157 = vst [vmem:[#allocation2 + $0x1c8] sm:$0xff] %v2093_v13  ;;  %v1996_v17 = vadd.f32 %v1995_v16, %v1706_v14  ;;  %v1708_v18 = vpop.f32.mrf.mxu0  ;;  %v501_v14 = vld [vmem:[#allocation2 + $0x10] sm:$0xff] }
 0x22f   : > { %v1997_v19 = vpop.f32.mrf.mxu1 }
 0x230   : > { %v2094_v20 = vadd.f32 %v1996_v17, %v492_v15  ;;  %v1709_v21 = vpop.f32.mrf.mxu0 }
 0x231   : > { %v1998_v23 = vpop.f32.mrf.mxu1 }
 0x232   : > { %2158 = vst [vmem:[#allocation2 + $0x170] sm:$0xff] %v2094_v20  ;;  %v1999_v24 = vadd.f32 %v1998_v23, %v1709_v21  ;;  %v1711_v25 = vpop.f32.mrf.mxu0  ;;  %v502_v21 = vld [vmem:[#allocation2 + $0x58] sm:$0xff] }
 0x233   : > { %v2000_v26 = vpop.f32.mrf.mxu1 }
 0x234   : > { %v2095_v27 = vadd.f32 %v1999_v24, %v493_v22  ;;  %v1714_v28 = vpop.f32.mrf.mxu0 }
 0x235   : > { %v2003_v30 = vpop.f32.mrf.mxu1 }
 0x236   : > { %2159 = vst [vmem:[#allocation2 + $0x178] sm:$0xff] %v2095_v27  ;;  %v2004_v31 = vadd.f32 %v2003_v30, %v1714_v28  ;;  %v1716_v32 = vpop.f32.mrf.mxu0  ;;  %v503_v28 = vld [vmem:[#allocation2 + $0xa0] sm:$0xff] }
 0x237   : > { %v2005_v33 = vpop.f32.mrf.mxu1 }
 0x238   : > { %v2096_v34 = vadd.f32 %v2004_v31, %v494_v29  ;;  %v1717_v35 = vpop.f32.mrf.mxu0 }
 0x239   : > { %v2006_v37 = vpop.f32.mrf.mxu1 }
 0x23a   : > { %2160 = vst [vmem:[#allocation2 + $0x68] sm:$0xff] %v2096_v34  ;;  %v2007_v38 = vadd.f32 %v2006_v37, %v1717_v35  ;;  %v1719_v39 = vpop.f32.mrf.mxu0 }
 0x23b   : > { %v2008_v40 = vpop.f32.mrf.mxu1 }
 0x23c   : > { %v2097_v41 = vadd.f32 %v2007_v38, %v495_v36  ;;  %v1722_v42 = vpop.f32.mrf.mxu0 }
 0x23d   : > { %v2011_v44 = vpop.f32.mrf.mxu1 }
 0x23e   : > { %2161 = vst [vmem:[#allocation2 + $0x190] sm:$0xff] %v2097_v41  ;;  %v2012_v45 = vadd.f32 %v2011_v44, %v1722_v42  ;;  %v1724_v46 = vpop.f32.mrf.mxu0 }
 0x23f   : > { %v2013_v47 = vpop.f32.mrf.mxu1 }
 0x240   : > { %v2098_v48 = vadd.f32 %v2012_v45, %v496_v43  ;;  %v1725_v49 = vpop.f32.mrf.mxu0 }
 0x241   : > { %v2014_v51 = vpop.f32.mrf.mxu1 }
 0x242   : > { %2162 = vst [vmem:[#allocation2 + $0x198] sm:$0xff] %v2098_v48  ;;  %v2015_v52 = vadd.f32 %v2014_v51, %v1725_v49  ;;  %v1727_v53 = vpop.f32.mrf.mxu0 }
 0x243   : > { %v2016_v54 = vpop.f32.mrf.mxu1 }
 0x244   : > { %v2099_v55 = vadd.f32 %v2015_v52, %v497_v50  ;;  %v1730_v56 = vpop.f32.mrf.mxu0 }
 0x245   : > { %v2019_v58 = vpop.f32.mrf.mxu1 }
 0x246   : > { %2163 = vst [vmem:[#allocation2 + $0x38] sm:$0xff] %v2099_v55  ;;  %v2020_v59 = vadd.f32 %v2019_v58, %v1730_v56  ;;  %v1732_v60 = vpop.f32.mrf.mxu0 }
 0x247   : > { %v2021_v61 = vpop.f32.mrf.mxu1 }
 0x248   : > { %v2100_v62 = vadd.f32 %v2020_v59, %v498_v57  ;;  %v1733_v63 = vpop.f32.mrf.mxu0 }
 0x249   : > { %v2022_v1 = vpop.f32.mrf.mxu1 }
 0x24a   : > { %2164 = vst [vmem:[#allocation2 + $0xc0] sm:$0xff] %v2100_v62  ;;  %v2023_v2 = vadd.f32 %v2022_v1, %v1733_v63  ;;  %v1735_v3 = vpop.f32.mrf.mxu0 }
 0x24b   : > { %v2024_v4 = vpop.f32.mrf.mxu1 }
 0x24c   : > { %v2101_v5 = vadd.f32 %v2023_v2, %v499_v0  ;;  %v1738_v6 = vpop.f32.mrf.mxu0 }
 0x24d   : > { %v2027_v8 = vpop.f32.mrf.mxu1 }
 0x24e   : > { %2165 = vst [vmem:[#allocation2 + $0x1c0] sm:$0xff] %v2101_v5  ;;  %v2028_v9 = vadd.f32 %v2027_v8, %v1738_v6  ;;  %v1740_v10 = vpop.f32.mrf.mxu0 }
 0x24f   : > { %v2029_v11 = vpop.f32.mrf.mxu1 }
 0x250   : > { %v2102_v12 = vadd.f32 %v2028_v9, %v500_v7  ;;  %v1741_v13 = vpop.f32.mrf.mxu0 }
 0x251   : > { %v2030_v15 = vpop.f32.mrf.mxu1 }
 0x252   : > { %2166 = vst [vmem:[#allocation2 + $0x158] sm:$0xff] %v2102_v12  ;;  %v2031_v16 = vadd.f32 %v2030_v15, %v1741_v13  ;;  %v1743_v17 = vpop.f32.mrf.mxu0 }
 0x253   : > { %v2032_v18 = vpop.f32.mrf.mxu1 }
 0x254   : > { %v2103_v19 = vadd.f32 %v2031_v16, %v501_v14  ;;  %v1746_v20 = vpop.f32.mrf.mxu0 }
 0x255   : > { %v2035_v22 = vpop.f32.mrf.mxu1 }
 0x256   : > { %2167 = vst [vmem:[#allocation2 + $0x10] sm:$0xff] %v2103_v19  ;;  %v2036_v23 = vadd.f32 %v2035_v22, %v1746_v20  ;;  %v1748_v24 = vpop.f32.mrf.mxu0 }
 0x257   : > { %v2037_v25 = vpop.f32.mrf.mxu1 }
 0x258   : > { %v2104_v26 = vadd.f32 %v2036_v23, %v502_v21  ;;  %v1749_v27 = vpop.f32.mrf.mxu0 }
 0x259   : > { %v2038_v29 = vpop.f32.mrf.mxu1 }
 0x25a   : > { %2168 = vst [vmem:[#allocation2 + $0x58] sm:$0xff] %v2104_v26  ;;  %v2039_v30 = vadd.f32 %v2038_v29, %v1749_v27  ;;  %v1751_v31 = vpop.f32.mrf.mxu0  ;;  %2173 = sbr.rel (%p3126_p10) target bundleno = 688 (0x2b0), region = 48 }
 0x25b   : > { %v2040_v32 = vpop.f32.mrf.mxu1 }
 0x25c   : > { %v2105_v33 = vadd.f32 %v2039_v30, %v503_v28 }
 0x25e   : > { %2169 = vst [vmem:[#allocation2 + $0xa0] sm:$0xff] %v2105_v33 }
 0x25f   : > { %v2174_v34 = vld [vmem:[#allocation2 + $0xb0] sm:$0xff]  ;;  %s2622_s20 = sld [smem:[#allocation3]]  ;;  %v2176_v37 = vld [vmem:[#allocation2 + $0xd8] sm:$0xff]  ;;  %v2179_v41 = vld [vmem:[#allocation2 + $0x168] sm:$0xff] }
 0x260   : > { %v2175_v35 = vld [vmem:[#allocation2 + $0x1b0] sm:$0xff]  ;;  %v2177_v38 = vld [vmem:[#allocation2 + $0x18] sm:$0xff]  ;;  %v2558_v42 = vld [vmem:[%s3982_s30] sm:$0xff] }
 0x261   : > { %v3261_v36 = vpack.c.bf16 %v2175_v35, %v2174_v34  ;;  %v3266_v39 = vpack.c.bf16 %v2177_v38, %v2176_v37  ;;  %v2178_v40 = vld [vmem:[#allocation2 + $0x50] sm:$0xff]  ;;  %v2181_v45 = vld [vmem:[#allocation2 + $0x48] sm:$0xff]  ;;  %v2182_v48 = vld [vmem:[#allocation2 + $0x180] sm:$0xff] }
 0x262   : > { %v3271_v43 = vpack.c.bf16 %v2179_v41, %v2178_v40  ;;  %v2180_v44 = vld [vmem:[#allocation2 + $0x130] sm:$0xff]  ;;  %v2559_v46 = vld [vmem:[%s3982_s30 + $0x8] sm:$0xff]  ;;  %v2561_v52 = vld [vmem:[%s3982_s30 + $0x18] sm:$0xff] }
 0x263   : > { %3262 = vst [vmem:[%s3987_s13] sm:$0xff] %v3261_v36   ;;  %3418 = vst [vmem:[%s3987_s13 + $0x8] sm:$0xff] %v3266_v39   ;;  %v3276_v47 = vpack.c.bf16 %v2181_v45, %v2180_v44  ;;  %v2183_v49 = vld [vmem:[#allocation2 + $0x110] sm:$0xff]  ;;  %v2562_v53 = vld [vmem:[%s3982_s30 + $0x20] sm:$0xff] }
 0x264   : > { %v2560_v51 = vld [vmem:[%s3982_s30 + $0x10] sm:$0xff]  ;;  %3419 = vst [vmem:[%s3987_s13 + $0x10] sm:$0xff] %v3271_v43   ;;  %v3281_v54 = vpack.c.bf16 %v2183_v49, %v2182_v48  ;;  %v2563_v59 = vld [vmem:[%s3982_s30 + $0x28] sm:$0xff]  ;;  %v2565_v61 = vld [vmem:[%s3982_s30 + $0x38] sm:$0xff] }
 0x265   : > { %v4262_v50 = vstv %s2622_s20  ;;  %3420 = vst [vmem:[%s3987_s13 + $0x18] sm:$0xff] %v3276_v47   ;;  %v2564_v60 = vld [vmem:[%s3982_s30 + $0x30] sm:$0xff]  ;;  %v2566_v2 = vld [vmem:[%s3982_s30 + $0x40] sm:$0xff]  ;;  %v2184_v4 = vld [vmem:[#allocation2 + $0x118] sm:$0xff] }
 0x266   : > { %v2624_v55 = vmul.f32 %v4262_v50, %v2174_v34  ;;  %v2625_v56 = vmul.f32 %v4262_v50, %v2175_v35  ;;  %v2626_v57 = vmul.f32 %v4262_v50, %v2176_v37  ;;  %v2627_v58 = vmul.f32 %v4262_v50, %v2177_v38  ;;  %3421 = vst [vmem:[%s3987_s13 + $0x20] sm:$0xff] %v3281_v54   ;;  %v2567_v3 = vld [vmem:[%s3982_s30 + $0x48] sm:$0xff]  ;;  %v2185_v5 = vld [vmem:[#allocation2 + $0x98] sm:$0xff]  ;;  %v2568_v6 = vld [vmem:[%s3982_s30 + $0x50] sm:$0xff] }
 0x267   : > { %v2628_v62 = vmul.f32 %v4262_v50, %v2178_v40  ;;  %v2629_v63 = vmul.f32 %v4262_v50, %v2179_v41  ;;  %v2630_v0 = vmul.f32 %v4262_v50, %v2180_v44  ;;  %v2631_v1 = vmul.f32 %v4262_v50, %v2181_v45  ;;  %v2569_v11 = vld [vmem:[%s3982_s30 + $0x58] sm:$0xff]  ;;  %v2186_v12 = vld [vmem:[#allocation2 + $0x120] sm:$0xff]  ;;  %v2187_v13 = vld [vmem:[#allocation2 + $0x150] sm:$0xff] }
 0x268   : > { %v4284_v7 = vadd.f32 %v2624_v55, %v2558_v42  ;;  %v4286_v8 = vadd.f32 %v2625_v56, %v2559_v46  ;;  %v4288_v9 = vadd.f32 %v2626_v57, %v2560_v51  ;;  %v4290_v10 = vadd.f32 %v2627_v58, %v2561_v52  ;;  %v2570_v18 = vld [vmem:[%s3982_s30 + $0x60] sm:$0xff]  ;;  %v2571_v19 = vld [vmem:[%s3982_s30 + $0x68] sm:$0xff]  ;;  %v2572_v26 = vld [vmem:[%s3982_s30 + $0x70] sm:$0xff] }
 0x269   : > { %v4293_v14 = vadd.f32 %v2628_v62, %v2562_v53  ;;  %v4295_v15 = vadd.f32 %v2629_v63, %v2563_v59  ;;  %v4297_v16 = vadd.f32 %v2630_v0, %v2564_v60  ;;  %v4299_v17 = vadd.f32 %v2631_v1, %v2565_v61  ;;  %v2188_v20 = vld [vmem:[#allocation2 + $0x108] sm:$0xff]  ;;  %v2189_v25 = vld [vmem:[#allocation2 + $0x60] sm:$0xff]  ;;  %v2573_v32 = vld [vmem:[%s3982_s30 + $0x78] sm:$0xff] }
 0x26a   : > { %v2632_v21 = vmul.f32 %v4262_v50, %v2182_v48  ;;  %v2633_v22 = vmul.f32 %v4262_v50, %v2183_v49  ;;  %v3286_v23 = vpack.c.bf16 %v2185_v5, %v2184_v4  ;;  %v2634_v24 = vmul.f32 %v4262_v50, %v2184_v4  ;;  %v2190_v27 = vld [vmem:[#allocation2 + $0xe0] sm:$0xff]  ;;  %v2191_v33 = vld [vmem:[#allocation2 + $0x188] sm:$0xff]  ;;  %v2192_v40 = vld [vmem:[#allocation2 + $0x138] sm:$0xff] }
 0x26b   : > { %v2635_v28 = vmul.f32 %v4262_v50, %v2185_v5  ;;  %v3291_v29 = vpack.c.bf16 %v2187_v13, %v2186_v12  ;;  %v2636_v30 = vmul.f32 %v4262_v50, %v2186_v12  ;;  %v2637_v31 = vmul.f32 %v4262_v50, %v2187_v13  ;;  %v2574_v34 = vld [vmem:[%s3982_s30 + $0x80] sm:$0xff]  ;;  %v2575_v35 = vld [vmem:[%s3982_s30 + $0x88] sm:$0xff]  ;;  %v2576_v42 = vld [vmem:[%s3982_s30 + $0x90] sm:$0xff] }
 0x26c   : > { %v4313_v36 = vadd.f32 %v2632_v21, %v2566_v2  ;;  %v4315_v37 = vadd.f32 %v2633_v22, %v2567_v3  ;;  %3422 = vst [vmem:[%s3987_s13 + $0x28] sm:$0xff] %v3286_v23   ;;  %v4318_v38 = vadd.f32 %v2634_v24, %v2568_v6  ;;  %v3296_v39 = vpack.c.bf16 %v2189_v25, %v2188_v20  ;;  %v2193_v41 = vld [vmem:[#allocation2 + $0x140] sm:$0xff]  ;;  %v2577_v47 = vld [vmem:[%s3982_s30 + $0x98] sm:$0xff]  ;;  %v2195_v49 = vld [vmem:[#allocation2 + $0x1a8] sm:$0xff] }
 0x26d   : > { %v4321_v43 = vadd.f32 %v2635_v28, %v2569_v11  ;;  %3423 = vst [vmem:[%s3987_s13 + $0x30] sm:$0xff] %v3291_v29   ;;  %v4324_v44 = vadd.f32 %v2636_v30, %v2570_v18  ;;  %v4326_v45 = vadd.f32 %v2637_v31, %v2571_v19  ;;  %v2638_v46 = vmul.f32 %v4262_v50, %v2188_v20  ;;  %v2194_v48 = vld [vmem:[#allocation2 + $0x80] sm:$0xff]  ;;  %v2579_v56 = vld [vmem:[%s3982_s30 + $0xa8] sm:$0xff]  ;;  %v2196_v57 = vld [vmem:[#allocation2 + $0x1b8] sm:$0xff] }
 0x26e   : > { %3424 = vst [vmem:[%s3987_s13 + $0x38] sm:$0xff] %v3296_v39   ;;  %v2639_v51 = vmul.f32 %v4262_v50, %v2189_v25  ;;  %v3301_v52 = vpack.c.bf16 %v2191_v33, %v2190_v27  ;;  %v2640_v53 = vmul.f32 %v4262_v50, %v2190_v27  ;;  %v2641_v54 = vmul.f32 %v4262_v50, %v2191_v33  ;;  %v2578_v55 = vld [vmem:[%s3982_s30 + $0xa0] sm:$0xff]  ;;  %v2197_v58 = vld [vmem:[#allocation2 + $0x28] sm:$0xff]  ;;  %v2580_v63 = vld [vmem:[%s3982_s30 + $0xb0] sm:$0xff] }
 0x26f   : > { %v4336_v59 = vadd.f32 %v2638_v46, %v2572_v26  ;;  %v3306_v60 = vpack.c.bf16 %v2193_v41, %v2192_v40  ;;  %v2642_v61 = vmul.f32 %v4262_v50, %v2192_v40  ;;  %v2643_v62 = vmul.f32 %v4262_v50, %v2193_v41  ;;  %v2581_v0 = vld [vmem:[%s3982_s30 + $0xb8] sm:$0xff]  ;;  %v2198_v1 = vld [vmem:[#allocation2 + $0x1e8] sm:$0xff]  ;;  %v2582_v11 = vld [vmem:[%s3982_s30 + $0xc0] sm:$0xff] }
 0x270   : > { %v4342_v2 = vadd.f32 %v2639_v51, %v2573_v32  ;;  %3425 = vst [vmem:[%s3987_s13 + $0x40] sm:$0xff] %v3301_v52   ;;  %v4345_v3 = vadd.f32 %v2640_v53, %v2574_v34  ;;  %v4347_v4 = vadd.f32 %v2641_v54, %v2575_v35  ;;  %v3311_v5 = vpack.c.bf16 %v2195_v49, %v2194_v48  ;;  %v2199_v6 = vld [vmem:[#allocation2 + $0xf8] sm:$0xff]  ;;  %v2583_v12 = vld [vmem:[%s3982_s30 + $0xc8] sm:$0xff]  ;;  %v2200_v21 = vld [vmem:[#allocation2 + $0x160] sm:$0xff] }
 0x271   : > { %3426 = vst [vmem:[%s3987_s13 + $0x48] sm:$0xff] %v3306_v60   ;;  %v4352_v13 = vadd.f32 %v2642_v61, %v2576_v42  ;;  %v4354_v18 = vadd.f32 %v2643_v62, %v2577_v47  ;;  %v2644_v19 = vmul.f32 %v4262_v50, %v2194_v48  ;;  %v2645_v20 = vmul.f32 %v4262_v50, %v2195_v49  ;;  %v2201_v22 = vld [vmem:[#allocation2 + $0x30] sm:$0xff]  ;;  %v2585_v28 = vld [vmem:[%s3982_s30 + $0xd8] sm:$0xff]  ;;  %v2202_v29 = vld [vmem:[#allocation2 + $0x1e0] sm:$0xff] }
 0x272   : > { %v2584_v23 = vld [vmem:[%s3982_s30 + $0xd0] sm:$0xff]  ;;  %3427 = vst [vmem:[%s3987_s13 + $0x50] sm:$0xff] %v3311_v5   ;;  %v3316_v24 = vpack.c.bf16 %v2197_v58, %v2196_v57  ;;  %v2646_v25 = vmul.f32 %v4262_v50, %v2196_v57  ;;  %v2647_v26 = vmul.f32 %v4262_v50, %v2197_v58  ;;  %v3321_v27 = vpack.c.bf16 %v2199_v6, %v2198_v1  ;;  %v2203_v30 = vld [vmem:[#allocation2] sm:$0xff]  ;;  %v2587_v39 = vld [vmem:[%s3982_s30 + $0xe8] sm:$0xff] }
 0x273   : > { %v4363_v31 = vadd.f32 %v2644_v19, %v2578_v55  ;;  %v4365_v32 = vadd.f32 %v2645_v20, %v2579_v56  ;;  %v2648_v33 = vmul.f32 %v4262_v50, %v2198_v1  ;;  %v2649_v34 = vmul.f32 %v4262_v50, %v2199_v6  ;;  %v2586_v35 = vld [vmem:[%s3982_s30 + $0xe0] sm:$0xff]  ;;  %v2204_v40 = vld [vmem:[#allocation2 + $0xf0] sm:$0xff]  ;;  %v2205_v41 = vld [vmem:[#allocation2 + $0x8] sm:$0xff] }
 0x274   : > { %3428 = vst [vmem:[%s3987_s13 + $0x58] sm:$0xff] %v3316_v24   ;;  %v4372_v42 = vadd.f32 %v2646_v25, %v2580_v63  ;;  %v4374_v46 = vadd.f32 %v2647_v26, %v2581_v0  ;;  %3429 = vst [vmem:[%s3987_s13 + $0x60] sm:$0xff] %v3321_v27   ;;  %v3326_v47 = vpack.c.bf16 %v2201_v22, %v2200_v21  ;;  %v2588_v49 = vld [vmem:[%s3982_s30 + $0xf0] sm:$0xff]  ;;  %v2589_v51 = vld [vmem:[%s3982_s30 + $0xf8] sm:$0xff] }
 0x275   : > { %v2650_v48 = vmul.f32 %v4262_v50, %v2200_v21  ;;  %v2206_v52 = vld [vmem:[#allocation2 + $0x148] sm:$0xff]  ;;  %v4380_v53 = vadd.f32 %v2648_v33, %v2582_v11  ;;  %v4382_v54 = vadd.f32 %v2649_v34, %v2583_v12  ;;  %v2651_v55 = vmul.f32 %v4262_v50, %v2201_v22  ;;  %v2207_v57 = vld [vmem:[#allocation2 + $0x1d0] sm:$0xff]  ;;  %v2590_v58 = vld [vmem:[%s3982_s30 + $0x100] sm:$0xff] }
 0x276   : > { %v3331_v56 = vpack.c.bf16 %v2203_v30, %v2202_v29  ;;  %v2591_v60 = vld [vmem:[%s3982_s30 + $0x108] sm:$0xff]  ;;  %3430 = vst [vmem:[%s3987_s13 + $0x68] sm:$0xff] %v3326_v47   ;;  %v2652_v62 = vmul.f32 %v4262_v50, %v2202_v29  ;;  %v2653_v63 = vmul.f32 %v4262_v50, %v2203_v30  ;;  %v3336_v0 = vpack.c.bf16 %v2205_v41, %v2204_v40  ;;  %v2208_v1 = vld [vmem:[#allocation2 + $0x100] sm:$0xff]  ;;  %v2592_v6 = vld [vmem:[%s3982_s30 + $0x110] sm:$0xff] }
 0x277   : > { %v4388_v61 = vadd.f32 %v2650_v48, %v2584_v23  ;;  %v2209_v5 = vld [vmem:[#allocation2 + $0xc8] sm:$0xff]  ;;  %v4393_v11 = vadd.f32 %v2651_v55, %v2585_v28  ;;  %v2654_v12 = vmul.f32 %v4262_v50, %v2204_v40  ;;  %v2655_v19 = vmul.f32 %v4262_v50, %v2205_v41  ;;  %v2593_v21 = vld [vmem:[%s3982_s30 + $0x118] sm:$0xff]  ;;  %v2210_v22 = vld [vmem:[#allocation2 + $0x40] sm:$0xff] }
 0x278   : > { %3431 = vst [vmem:[%s3987_s13 + $0x70] sm:$0xff] %v3331_v56   ;;  %v3341_v20 = vpack.c.bf16 %v2207_v57, %v2206_v52  ;;  %v2211_v23 = vld [vmem:[#allocation2 + $0x1f8] sm:$0xff]  ;;  %v4399_v24 = vadd.f32 %v2652_v62, %v2586_v35  ;;  %v4401_v25 = vadd.f32 %v2653_v63, %v2587_v39  ;;  %3432 = vst [vmem:[%s3987_s13 + $0x78] sm:$0xff] %v3336_v0   ;;  %v2594_v28 = vld [vmem:[%s3982_s30 + $0x120] sm:$0xff] }
 0x279   : > { %v2656_v26 = vmul.f32 %v4262_v50, %v2206_v52  ;;  %v2657_v27 = vmul.f32 %v4262_v50, %v2207_v57  ;;  %v2595_v29 = vld [vmem:[%s3982_s30 + $0x128] sm:$0xff]  ;;  %v2212_v30 = vld [vmem:[#allocation2 + $0x20] sm:$0xff]  ;;  %v4408_v33 = vadd.f32 %v2654_v12, %v2588_v49  ;;  %v4410_v34 = vadd.f32 %v2655_v19, %v2589_v51  ;;  %v2596_v41 = vld [vmem:[%s3982_s30 + $0x130] sm:$0xff] }
 0x27a   : > { %3433 = vst [vmem:[%s3987_s13 + $0x80] sm:$0xff] %v3341_v20   ;;  %v3346_v40 = vpack.c.bf16 %v2209_v5, %v2208_v1  ;;  %v2658_v35 = vmul.f32 %v4262_v50, %v2208_v1  ;;  %v2213_v39 = vld [vmem:[#allocation2 + $0x128] sm:$0xff]  ;;  %v2597_v47 = vld [vmem:[%s3982_s30 + $0x138] sm:$0xff]  ;;  %v2659_v55 = vmul.f32 %v4262_v50, %v2209_v5  ;;  %v3351_v56 = vpack.c.bf16 %v2211_v23, %v2210_v22  ;;  %v2214_v49 = vld [vmem:[#allocation2 + $0x1a0] sm:$0xff] }
 0x27b   : > { %v4416_v48 = vadd.f32 %v2656_v26, %v2590_v58  ;;  %v4418_v52 = vadd.f32 %v2657_v27, %v2591_v60  ;;  %v2215_v51 = vld [vmem:[#allocation2 + $0x1f0] sm:$0xff]  ;;  %v2598_v57 = vld [vmem:[%s3982_s30 + $0x140] sm:$0xff]  ;;  %v2660_v63 = vmul.f32 %v4262_v50, %v2210_v22  ;;  %v2661_v58 = vmul.f32 %v4262_v50, %v2211_v23  ;;  %v2599_v1 = vld [vmem:[%s3982_s30 + $0x148] sm:$0xff] }
 0x27c   : > { %3434 = vst [vmem:[%s3987_s13 + $0x88] sm:$0xff] %v3346_v40   ;;  %v4423_v62 = vadd.f32 %v2658_v35, %v2592_v6  ;;  %v3356_v0 = vpack.c.bf16 %v2213_v39, %v2212_v30  ;;  %v2216_v60 = vld [vmem:[#allocation2 + $0xe8] sm:$0xff]  ;;  %v2217_v12 = vld [vmem:[#allocation2 + $0x78] sm:$0xff]  ;;  %v4428_v5 = vadd.f32 %v2659_v55, %v2593_v21  ;;  %3435 = vst [vmem:[%s3987_s13 + $0x90] sm:$0xff] %v3351_v56  }
 0x27d   : > { %v2662_v19 = vmul.f32 %v4262_v50, %v2212_v30  ;;  %v2663_v6 = vmul.f32 %v4262_v50, %v2213_v39  ;;  %v3361_v20 = vpack.c.bf16 %v2215_v51, %v2214_v49  ;;  %v2600_v26 = vld [vmem:[%s3982_s30 + $0x150] sm:$0xff]  ;;  %v2601_v22 = vld [vmem:[%s3982_s30 + $0x158] sm:$0xff]  ;;  %v4435_v23 = vadd.f32 %v2660_v63, %v2594_v28  ;;  %v2602_v30 = vld [vmem:[%s3982_s30 + $0x160] sm:$0xff] }
 0x27e   : > { %4742 = vst [vmem:[#allocation8_spill] sm:$0xff] %v4423_v62  ;;  %4743 = vst [vmem:[#allocation9_spill] sm:$0xff] %v4428_v5  ;;  %v2218_v27 = vld [vmem:[#allocation2 + $0x70] sm:$0xff]  ;;  %v4437_v40 = vadd.f32 %v2661_v58, %v2595_v29  ;;  %v2664_v35 = vmul.f32 %v4262_v50, %v2214_v49  ;;  %v2665_v21 = vmul.f32 %v4262_v50, %v2215_v51  ;;  %v2603_v56 = vld [vmem:[%s3982_s30 + $0x168] sm:$0xff] }
 0x27f   : > { %3436 = vst [vmem:[%s3987_s13 + $0x98] sm:$0xff] %v3356_v0   ;;  %v2219_v55 = vld [vmem:[#allocation2 + $0x90] sm:$0xff]  ;;  %v4444_v39 = vadd.f32 %v2662_v19, %v2596_v41  ;;  %v4446_v5 = vadd.f32 %v2663_v6, %v2597_v47  ;;  %3437 = vst [vmem:[%s3987_s13 + $0xa0] sm:$0xff] %v3361_v20   ;;  %v3366_v62 = vpack.c.bf16 %v2217_v12, %v2216_v60  ;;  %v2220_v29 = vld [vmem:[#allocation2 + $0x1d8] sm:$0xff] }
 0x280   : > { %4744 = vst [vmem:[#allocation10_spill] sm:$0xff] %v4437_v40  ;;  %v2666_v28 = vmul.f32 %v4262_v50, %v2216_v60  ;;  %v2221_v63 = vld [vmem:[#allocation2 + $0xd0] sm:$0xff]  ;;  %v4451_v58 = vadd.f32 %v2664_v35, %v2598_v57  ;;  %v4453_v51 = vadd.f32 %v2665_v21, %v2599_v1  ;;  %v2667_v0 = vmul.f32 %v4262_v50, %v2217_v12  ;;  %v2605_v19 = vld [vmem:[%s3982_s30 + $0x178] sm:$0xff]  ;;  %v2223_v6 = vld [vmem:[#allocation2 + $0x88] sm:$0xff] }
 0x281   : > { %4745 = vst [vmem:[#allocation11_spill] sm:$0xff] %v4444_v39  ;;  %4746 = vst [vmem:[#allocation12_spill] sm:$0xff] %v4446_v5  ;;  %v2604_v49 = vld [vmem:[%s3982_s30 + $0x170] sm:$0xff]  ;;  %v3371_v41 = vpack.c.bf16 %v2219_v55, %v2218_v27  ;;  %v2222_v47 = vld [vmem:[#allocation2 + $0xb8] sm:$0xff]  ;;  %v2668_v20 = vmul.f32 %v4262_v50, %v2218_v27  ;;  %v2669_v57 = vmul.f32 %v4262_v50, %v2219_v55 }
 0x282   : > { %4747 = vst [vmem:[#allocation13_spill] sm:$0xff] %v4451_v58  ;;  %4748 = vst [vmem:[#allocation14_spill] sm:$0xff] %v4453_v51  ;;  %v4458_v60 = vadd.f32 %v2666_v28, %v2600_v26  ;;  %v3376_v35 = vpack.c.bf16 %v2221_v63, %v2220_v29  ;;  %v2606_v58 = vld [vmem:[%s3982_s30 + $0x180] sm:$0xff]  ;;  %v2607_v1 = vld [vmem:[%s3982_s30 + $0x188] sm:$0xff]  ;;  %v4464_v12 = vadd.f32 %v2667_v0, %v2601_v22 }
 0x283   : > { %3438 = vst [vmem:[%s3987_s13 + $0xa8] sm:$0xff] %v3366_v62   ;;  %v2224_v21 = vld [vmem:[#allocation2 + $0xa8] sm:$0xff]  ;;  %3439 = vst [vmem:[%s3987_s13 + $0xb0] sm:$0xff] %v3371_v41   ;;  %v2670_v51 = vmul.f32 %v4262_v50, %v2220_v29  ;;  %v2671_v62 = vmul.f32 %v4262_v50, %v2221_v63  ;;  %v3381_v26 = vpack.c.bf16 %v2223_v6, %v2222_v47  ;;  %v2608_v27 = vld [vmem:[%s3982_s30 + $0x190] sm:$0xff] }
 0x284   : > { %4749 = vst [vmem:[#allocation15_spill] sm:$0xff] %v4458_v60  ;;  %4750 = vst [vmem:[#allocation16_spill] sm:$0xff] %v4464_v12  ;;  %v2225_v28 = vld [vmem:[#allocation2 + $0x1c8] sm:$0xff]  ;;  %v2609_v60 = vld [vmem:[%s3982_s30 + $0x198] sm:$0xff]  ;;  %v4471_v5 = vadd.f32 %v2668_v20, %v2602_v30  ;;  %v4473_v55 = vadd.f32 %v2669_v57, %v2603_v56  ;;  %v2672_v39 = vmul.f32 %v4262_v50, %v2222_v47 }
 0x285   : > { %3440 = vst [vmem:[%s3987_s13 + $0xb8] sm:$0xff] %v3376_v35   ;;  %v2673_v22 = vmul.f32 %v4262_v50, %v2223_v6  ;;  %v2226_v0 = vld [vmem:[#allocation2 + $0x170] sm:$0xff]  ;;  %v2227_v29 = vld [vmem:[#allocation2 + $0x178] sm:$0xff]  ;;  %v2610_v41 = vld [vmem:[%s3982_s30 + $0x1a0] sm:$0xff]  ;;  %v4479_v63 = vadd.f32 %v2670_v51, %v2604_v49  ;;  %v4481_v12 = vadd.f32 %v2671_v62, %v2605_v19  ;;  %v3386_v40 = vpack.c.bf16 %v2225_v28, %v2224_v21 }
 0x286   : > { %3441 = vst [vmem:[%s3987_s13 + $0xc0] sm:$0xff] %v3381_v26   ;;  %v2674_v30 = vmul.f32 %v4262_v50, %v2224_v21  ;;  %v2611_v56 = vld [vmem:[%s3982_s30 + $0x1a8] sm:$0xff]  ;;  %v2229_v47 = vld [vmem:[#allocation2 + $0x190] sm:$0xff]  ;;  %v4486_v57 = vadd.f32 %v2672_v39, %v2606_v58  ;;  %v2675_v35 = vmul.f32 %v4262_v50, %v2225_v28  ;;  %v3391_v49 = vpack.c.bf16 %v2227_v29, %v2226_v0  ;;  %v2230_v19 = vld [vmem:[#allocation2 + $0x198] sm:$0xff] }
 0x287   : > { %4751 = vst [vmem:[#allocation17_spill] sm:$0xff] %v4479_v63  ;;  %4752 = vst [vmem:[#allocation18_spill] sm:$0xff] %v4481_v12  ;;  %v2228_v20 = vld [vmem:[#allocation2 + $0x68] sm:$0xff]  ;;  %v4488_v6 = vadd.f32 %v2673_v22, %v2607_v1  ;;  %v2612_v51 = vld [vmem:[%s3982_s30 + $0x1b0] sm:$0xff]  ;;  %v2676_v26 = vmul.f32 %v4262_v50, %v2226_v0  ;;  %v2677_v39 = vmul.f32 %v4262_v50, %v2227_v29 }
 0x288   : > { %4753 = vst [vmem:[#allocation19_spill] sm:$0xff] %v4486_v57  ;;  %v2231_v62 = vld [vmem:[#allocation2 + $0x38] sm:$0xff]  ;;  %3442 = vst [vmem:[%s3987_s13 + $0xc8] sm:$0xff] %v3386_v40   ;;  %v4493_v21 = vadd.f32 %v2674_v30, %v2608_v27  ;;  %v3396_v58 = vpack.c.bf16 %v2229_v47, %v2228_v20  ;;  %v2614_v1 = vld [vmem:[%s3982_s30 + $0x1c0] sm:$0xff]  ;;  %v4499_v28 = vadd.f32 %v2675_v35, %v2609_v60 }
 0x289   : > { %4754 = vst [vmem:[#allocation20_spill] sm:$0xff] %v4488_v6  ;;  %v2613_v57 = vld [vmem:[%s3982_s30 + $0x1b8] sm:$0xff]  ;;  %v2232_v22 = vld [vmem:[#allocation2 + $0xc0] sm:$0xff]  ;;  %3443 = vst [vmem:[%s3987_s13 + $0xd0] sm:$0xff] %v3391_v49   ;;  %v2678_v6 = vmul.f32 %v4262_v50, %v2228_v20  ;;  %v2679_v40 = vmul.f32 %v4262_v50, %v2229_v47  ;;  %v3401_v27 = vpack.c.bf16 %v2231_v62, %v2230_v19 }
 0x28a   : > { %4755 = vst [vmem:[#allocation21_spill] sm:$0xff] %v4493_v21  ;;  %v2615_v30 = vld [vmem:[%s3982_s30 + $0x1c8] sm:$0xff]  ;;  %v2233_v0 = vld [vmem:[#allocation2 + $0x1c0] sm:$0xff]  ;;  %v2616_v21 = vld [vmem:[%s3982_s30 + $0x1d0] sm:$0xff]  ;;  %v4506_v12 = vadd.f32 %v2676_v26, %v2610_v41  ;;  %v4508_v29 = vadd.f32 %v2677_v39, %v2611_v56  ;;  %v2680_v63 = vmul.f32 %v4262_v50, %v2230_v19  ;;  %v2681_v60 = vmul.f32 %v4262_v50, %v2231_v62 }
 0x28b   : > { %3444 = vst [vmem:[%s3987_s13 + $0xd8] sm:$0xff] %v3396_v58   ;;  %v4514_v35 = vld [vmem:[%s3982_s30 + $0x1d8] sm:$0xff]  ;;  %v4518_v47 = vld [vmem:[#allocation2 + $0x10] sm:$0xff]  ;;  %v4520_v49 = vadd.f32 %v2678_v6, %v2612_v51  ;;  %v4522_v41 = vadd.f32 %v2679_v40, %v2613_v57  ;;  %3445 = vst [vmem:[%s3987_s13 + $0xe0] sm:$0xff] %v3401_v27   ;;  %v3406_v56 = vpack.c.bf16 %v2233_v0, %v2232_v22 }
 0x28c   : > { %v4516_v20 = vld [vmem:[#allocation2 + $0x158] sm:$0xff]  ;;  %v2682_v19 = vmul.f32 %v4262_v50, %v2232_v22  ;;  %v4527_v62 = vld [vmem:[%s3982_s30 + $0x1e0] sm:$0xff]  ;;  %v4533_v58 = vadd.f32 %v2680_v63, %v2614_v1  ;;  %v4535_v6 = vadd.f32 %v2681_v60, %v2615_v30  ;;  %v4538_v57 = vmul.f32 %v4262_v50, %v2233_v0  ;;  %v4543_v22 = vld [vmem:[%s3982_s30 + $0x1e8] sm:$0xff] }
 0x28d   : > { %v4529_v26 = vld [vmem:[#allocation2 + $0x58] sm:$0xff]  ;;  %v4531_v39 = vld [vmem:[#allocation2 + $0xa0] sm:$0xff]  ;;  %v3411_v51 = vpack.c.bf16 %v4518_v47, %v4516_v20  ;;  %v4546_v40 = vld [vmem:[%s3982_s30 + $0x1f0] sm:$0xff]  ;;  %3446 = vst [vmem:[%s3987_s13 + $0xe8] sm:$0xff] %v3406_v56   ;;  %v4556_v27 = vmul.f32 %v4262_v50, %v4516_v20  ;;  %v4560_v30 = vmul.f32 %v4262_v50, %v4518_v47 }
 0x28e   : > { %v4549_v63 = vld [vmem:[%s3982_s30 + $0x1f8] sm:$0xff]  ;;  %v4552_v1 = vadd.f32 %v2682_v19, %v2616_v21  ;;  %v3416_v0 = vpack.c.bf16 %v4531_v39, %v4529_v26 }
 0x28f   : > { %2752 = vst [vmem:[%s3992_s8] sm:$0xff] %v4284_v7  ;;  %2753 = vst [vmem:[%s3992_s8 + $0x8] sm:$0xff] %v4286_v8  ;;  %v4756_v7 = vld [vmem:[#allocation8_spill] sm:$0xff]  ;;  %v4757_v8 = vld [vmem:[#allocation9_spill] sm:$0xff] }
 0x290   : > { %2754 = vst [vmem:[%s3992_s8 + $0x10] sm:$0xff] %v4288_v9  ;;  %2755 = vst [vmem:[%s3992_s8 + $0x18] sm:$0xff] %v4290_v10  ;;  %v4758_v9 = vld [vmem:[#allocation10_spill] sm:$0xff]  ;;  %v4759_v10 = vld [vmem:[#allocation11_spill] sm:$0xff] }
 0x291   : > { %2756 = vst [vmem:[%s3992_s8 + $0x20] sm:$0xff] %v4293_v14  ;;  %2757 = vst [vmem:[%s3992_s8 + $0x28] sm:$0xff] %v4295_v15  ;;  %v4760_v14 = vld [vmem:[#allocation12_spill] sm:$0xff]  ;;  %v4761_v15 = vld [vmem:[#allocation13_spill] sm:$0xff] }
 0x292   : > { %2758 = vst [vmem:[%s3992_s8 + $0x30] sm:$0xff] %v4297_v16  ;;  %2759 = vst [vmem:[%s3992_s8 + $0x38] sm:$0xff] %v4299_v17  ;;  %v4762_v16 = vld [vmem:[#allocation14_spill] sm:$0xff]  ;;  %v4763_v17 = vld [vmem:[#allocation15_spill] sm:$0xff] }
 0x293   : > { %2760 = vst [vmem:[%s3992_s8 + $0x40] sm:$0xff] %v4313_v36  ;;  %2761 = vst [vmem:[%s3992_s8 + $0x48] sm:$0xff] %v4315_v37  ;;  %v4764_v36 = vld [vmem:[#allocation16_spill] sm:$0xff]  ;;  %v4765_v37 = vld [vmem:[#allocation17_spill] sm:$0xff] }
 0x294   : > { %2762 = vst [vmem:[%s3992_s8 + $0x50] sm:$0xff] %v4318_v38  ;;  %2763 = vst [vmem:[%s3992_s8 + $0x58] sm:$0xff] %v4321_v43  ;;  %v4766_v38 = vld [vmem:[#allocation18_spill] sm:$0xff]  ;;  %v4767_v43 = vld [vmem:[#allocation19_spill] sm:$0xff] }
 0x295   : > { %2764 = vst [vmem:[%s3992_s8 + $0x60] sm:$0xff] %v4324_v44  ;;  %2765 = vst [vmem:[%s3992_s8 + $0x68] sm:$0xff] %v4326_v45  ;;  %v4768_v44 = vld [vmem:[#allocation20_spill] sm:$0xff]  ;;  %v4769_v45 = vld [vmem:[#allocation21_spill] sm:$0xff] }
 0x296   : > { %2766 = vst [vmem:[%s3992_s8 + $0x70] sm:$0xff] %v4336_v59  ;;  %2767 = vst [vmem:[%s3992_s8 + $0x78] sm:$0xff] %v4342_v2  ;;  %v2747_v59 = vadd.f32 %v4538_v57, %v4514_v35  ;;  %v2686_v2 = vmul.f32 %v4262_v50, %v4529_v26 }
 0x297   : > { %2768 = vst [vmem:[%s3992_s8 + $0x80] sm:$0xff] %v4345_v3  ;;  %2769 = vst [vmem:[%s3992_s8 + $0x88] sm:$0xff] %v4347_v4  ;;  %v2687_v3 = vmul.f32 %v4262_v50, %v4531_v39  ;;  %v2748_v4 = vadd.f32 %v4556_v27, %v4527_v62 }
 0x298   : > { %2770 = vst [vmem:[%s3992_s8 + $0x90] sm:$0xff] %v4352_v13  ;;  %2771 = vst [vmem:[%s3992_s8 + $0x98] sm:$0xff] %v4354_v18  ;;  %v2749_v13 = vadd.f32 %v4560_v30, %v4543_v22  ;;  %v2750_v18 = vadd.f32 %v2686_v2, %v4546_v40 }
 0x299   : > { %2772 = vst [vmem:[%s3992_s8 + $0xa0] sm:$0xff] %v4363_v31  ;;  %2773 = vst [vmem:[%s3992_s8 + $0xa8] sm:$0xff] %v4365_v32  ;;  %v2751_v50 = vadd.f32 %v2687_v3, %v4549_v63 }
 0x29a   : > { %2774 = vst [vmem:[%s3992_s8 + $0xb0] sm:$0xff] %v4372_v42  ;;  %2775 = vst [vmem:[%s3992_s8 + $0xb8] sm:$0xff] %v4374_v46 }
 0x29b   : > { %2776 = vst [vmem:[%s3992_s8 + $0xc0] sm:$0xff] %v4380_v53  ;;  %2777 = vst [vmem:[%s3992_s8 + $0xc8] sm:$0xff] %v4382_v54 }
 0x29c   : > { %2778 = vst [vmem:[%s3992_s8 + $0xd0] sm:$0xff] %v4388_v61  ;;  %2779 = vst [vmem:[%s3992_s8 + $0xd8] sm:$0xff] %v4393_v11 }
 0x29d   : > { %2780 = vst [vmem:[%s3992_s8 + $0xe0] sm:$0xff] %v4399_v24  ;;  %2781 = vst [vmem:[%s3992_s8 + $0xe8] sm:$0xff] %v4401_v25 }
 0x29e   : > { %2782 = vst [vmem:[%s3992_s8 + $0xf0] sm:$0xff] %v4408_v33  ;;  %2783 = vst [vmem:[%s3992_s8 + $0xf8] sm:$0xff] %v4410_v34 }
 0x29f   : > { %2784 = vst [vmem:[%s3992_s8 + $0x100] sm:$0xff] %v4416_v48  ;;  %2785 = vst [vmem:[%s3992_s8 + $0x108] sm:$0xff] %v4418_v52 }
 0x2a0   : > { %2786 = vst [vmem:[%s3992_s8 + $0x110] sm:$0xff] %v4756_v7  ;;  %2787 = vst [vmem:[%s3992_s8 + $0x118] sm:$0xff] %v4757_v8 }
 0x2a1   : > { %2788 = vst [vmem:[%s3992_s8 + $0x120] sm:$0xff] %v4435_v23  ;;  %2789 = vst [vmem:[%s3992_s8 + $0x128] sm:$0xff] %v4758_v9 }
 0x2a2   : > { %2790 = vst [vmem:[%s3992_s8 + $0x130] sm:$0xff] %v4759_v10  ;;  %2791 = vst [vmem:[%s3992_s8 + $0x138] sm:$0xff] %v4760_v14 }
 0x2a3   : > { %2792 = vst [vmem:[%s3992_s8 + $0x140] sm:$0xff] %v4761_v15  ;;  %2793 = vst [vmem:[%s3992_s8 + $0x148] sm:$0xff] %v4762_v16 }
 0x2a4   : > { %2794 = vst [vmem:[%s3992_s8 + $0x150] sm:$0xff] %v4763_v17  ;;  %2795 = vst [vmem:[%s3992_s8 + $0x158] sm:$0xff] %v4764_v36 }
 0x2a5   : > { %2796 = vst [vmem:[%s3992_s8 + $0x160] sm:$0xff] %v4471_v5  ;;  %2797 = vst [vmem:[%s3992_s8 + $0x168] sm:$0xff] %v4473_v55 }
 0x2a6   : > { %2798 = vst [vmem:[%s3992_s8 + $0x170] sm:$0xff] %v4765_v37  ;;  %2799 = vst [vmem:[%s3992_s8 + $0x178] sm:$0xff] %v4766_v38 }
 0x2a7   : > { %2800 = vst [vmem:[%s3992_s8 + $0x180] sm:$0xff] %v4767_v43  ;;  %2801 = vst [vmem:[%s3992_s8 + $0x188] sm:$0xff] %v4768_v44 }
 0x2a8   : > { %2802 = vst [vmem:[%s3992_s8 + $0x190] sm:$0xff] %v4769_v45  ;;  %2803 = vst [vmem:[%s3992_s8 + $0x198] sm:$0xff] %v4499_v28 }
 0x2a9   : > { %2804 = vst [vmem:[%s3992_s8 + $0x1a0] sm:$0xff] %v4506_v12  ;;  %2805 = vst [vmem:[%s3992_s8 + $0x1a8] sm:$0xff] %v4508_v29 }
 0x2aa   : > { %2806 = vst [vmem:[%s3992_s8 + $0x1b0] sm:$0xff] %v4520_v49  ;;  %2807 = vst [vmem:[%s3992_s8 + $0x1b8] sm:$0xff] %v4522_v41 }
 0x2ab   : > { %3447 = vst [vmem:[%s3987_s13 + $0xf0] sm:$0xff] %v3411_v51   ;;  %2808 = vst [vmem:[%s3992_s8 + $0x1c0] sm:$0xff] %v4533_v58 }
 0x2ac   : > { %2809 = vst [vmem:[%s3992_s8 + $0x1c8] sm:$0xff] %v4535_v6  ;;  %3448 = vst [vmem:[%s3987_s13 + $0xf8] sm:$0xff] %v3416_v0  }
 0x2ad   : > { %2810 = vst [vmem:[%s3992_s8 + $0x1d0] sm:$0xff] %v4552_v1  ;;  %2811 = vst [vmem:[%s3992_s8 + $0x1d8] sm:$0xff] %v2747_v59 }
 0x2ae   : > { %2812 = vst [vmem:[%s3992_s8 + $0x1e0] sm:$0xff] %v2748_v4  ;;  %2813 = vst [vmem:[%s3992_s8 + $0x1e8] sm:$0xff] %v2749_v13 }
 0x2af   : > { %2814 = vst [vmem:[%s3992_s8 + $0x1f0] sm:$0xff] %v2750_v18  ;;  %2815 = vst [vmem:[%s3992_s8 + $0x1f8] sm:$0xff] %v2751_v50 }
 0x2b0 PF: > { %s20_s27 = sadd.s32 1, %s3843_s27   ;;  %s4770_s28 = sld [smem:[#allocation7_spill]] }
 0x2b1   : > { %p17_p11 = scmp.ge.s32.totalorder %s20_s27, 6   ;;  %s4771_s20 = smov %s3819_s21 }
 0x2b2   : > { %s4772_s21 = smov %s3823_s22  ;;  %s4773_s22 = smov %s3951_s14 }
 0x2b3   : > { %s4774_s23 = smov %s3835_s25  ;;  %s4775_s24 = smov %s3839_s26 }
 0x2b4   : > { %s4777_s26 = smov %s4783_s29  ;;  %19 = sbr.rel (!%p17_p11) target bundleno = 7 (0x7), region = 100 }
 0x2b6   : > { %s4776_s25 = smov %s4770_s28 }
 0x2b9   :  { %2855 = vsyncpa [#allocation5], 1 }
 0x2ba   :  { %2857 = vsyncpa [#allocation5 + $0x1], 1 }

// kernel: gprgnn_forward.1
= control target key start
LH: loop header
LB: loop body
LE: loop exit
PB: predicated region body
PF: predicated region fallthrough
CT: control target
= control target key end

     0   :  { %s5561_s0 = inlined_call_operand.<no memory space> [shape: f32[1], index: 0, kind: input, shape index: {}]   ;;  %s5562_s1 = inlined_call_operand.hbm [shape: f32[1024,128], index: 1, kind: input, shape index: {}]   ;;  %s5563_s2 = inlined_call_operand.hbm [shape: f32[128,128], index: 2, kind: input, shape index: {}]   ;;  %s5564_s3 = inlined_call_operand.hbm [shape: f32[1,128], index: 3, kind: input, shape index: {}]   ;;  %s5565_s4 = inlined_call_operand.hbm [shape: f32[1,128], index: 4, kind: input, shape index: {}]   ;;  %s5566_s5 = inlined_call_operand.hbm [shape: f32[1,128], index: 5, kind: input, shape index: {}]   ;;  %s5567_s6 = inlined_call_operand.hbm [shape: f32[128,128], index: 6, kind: input, shape index: {}]   ;;  %s5568_s7 = inlined_call_operand.hbm [shape: f32[1,128], index: 7, kind: input, shape index: {}]   ;;  %s5569_s8 = inlined_call_operand.hbm [shape: f32[1,128], index: 8, kind: input, shape index: {}]   ;;  %s5570_s9 = inlined_call_operand.hbm [shape: f32[1,128], index: 9, kind: input, shape index: {}]   ;;  %s5571_s10 = inlined_call_operand.hbm [shape: f32[128,128], index: 10, kind: input, shape index: {}]   ;;  %s5572_s11 = inlined_call_operand.hbm [shape: f32[1,128], index: 11, kind: input, shape index: {}]   ;;  %s5573_s12 = inlined_call_operand.vmem [shape: bf16[1024,128], index: 12, kind: output, shape index: {0}]   ;;  %s5574_s13 = inlined_call_operand.vmem [shape: f32[1024,128], index: 13, kind: output, shape index: {1}]  }
   0x1   :  { %5582 = sst [smem:[#allocation26_spill]] %s5563_s2 }
   0x2   :  { %5583 = sst [smem:[#allocation27_spill]] %s5564_s3 }
   0x3   :  { %5584 = sst [smem:[#allocation28_spill]] %s5573_s12 }
   0x4   :  { %19 = sst [smem:[#allocation2]] %s5561_s0 }
   0x5   :  { %20 = vsyncpa [#allocation4], 0 }
   0x6   :  { %22 = vsyncpa [#allocation4 + $0x1], 0 }
   0x7   :  { %23 = vsyncpa [#allocation6], 0 }
   0x8   :  { %24 = vsyncpa [#allocation9], 0 }
   0x9   :  { %25 = vsyncpa [#allocation12], 0 }
   0xa   :  { %26 = vsyncpa [#allocation15], 0 }
   0xb   :  { %27 = vsyncpa [#allocation18], 0  ;;  %s4545_s27 = smov 0   ;;  %s4547_s28 = smov 0  }
   0xc   :  { %s4549_s29 = smov 0   ;;  %s4551_s30 = smov 0  }
   0xd LB: > { %s4459_s0 = smov [#allocation5]   ;;  %s5575_s15 = sadd.s32 4294967295, %s4457_s30   ;;  %s4457_s30 = sphi %s4551_s30, %s5604_s30   ;;  %s4453_s29 = sphi %s4549_s29, %s5603_s29   ;;  %s4449_s28 = sphi %s4547_s28, %s5602_s28   ;;  %s4445_s27 = sphi %s4545_s27, %s5601_s27  }
   0xe   : > { %s362_s14 = sshll.u32 %s4459_s0, 4  ;;  %p2957_p0 = scmp.ge.s32.totalorder %s4457_s30, 1  ;;  %s363_s14 = int_to_ptr.vmem [resolvable:$true] %s362_s14 }
   0xf   : > { %p4569_p1 = scmp.eq.s32.totalorder %s5575_s15, 0  ;;  %p347_p2 = scmp.lt.s32.totalorder %s4457_s30, 3 }
  0x10   : > { %s4460_s18 = smov [#allocation8]   ;;  %s4461_s21 = smov [#allocation11]  }
  0x11   : > { %s5585_s16 = scalar_select %p4569_p1, 1, 0 }
  0x12   : > { %p4574_p3 = pnand %p2957_p0, %p347_p2  ;;  %s387_s19 = sshll.u32 %s4460_s18, 4  ;;  %s388_s19 = int_to_ptr.vmem [resolvable:$true] %s387_s19 }
  0x13   : > { %s408_s22 = sshll.u32 %s4461_s21, 4  ;;  %s4126_s24 = scalar_lea.vmem %s363_s14, 2048  ;;  %s4586_s22 = int_to_ptr.vmem [resolvable:$true] %s408_s22 }
  0x14   : > { %s5586_s17 = scalar_select %p4574_p3, 1, 0 }
  0x15   : > { %p4015_p4 = pneg %p4574_p3  ;;  %p4127_p7 = scmp.ne.s32.totalorder %s363_s14, %s4126_s24 }
  0x16   : > { %p4134_p10 = scmp.lt.s32.totalorder %s363_s14, %s363_s14  ;;  %p4135_p11 = scmp.lt.s32.totalorder %s4126_s24, %s4126_s24 }
  0x17   : > { %p4582_p5 = pnand %p4015_p4, %p4569_p1 }
  0x18   : > { %p4136_p12 = por %p4135_p11, %p4134_p10 }
  0x19   : > { %p4590_p6 = pneg %p4582_p5 }
  0x1b   : > { %p4129_p8 = pnand %p4127_p7, %p4590_p6 }
  0x1d   : > { %p4130_p9 = pneg %p4129_p8 }
  0x1f   : > { %p4137_p13 = pnand %p4136_p12, %p4130_p9 }
  0x21   : > { %4140 = shalt.err (!%p4137_p13)
}
  0x22   : > { %s5579_s25 = smov 128   ;;  %s5580_s26 = smov 8  }
  0x23   : > { %s5589_s2 = sld [smem:[#allocation26_spill]]  ;;  %s4152_s21 = scalar_lea.vmem %s388_s19, 16 }
  0x24   : > { %p4153_p0 = scmp.ne.s32.totalorder %s388_s19, %s4152_s21  ;;  %s4159_s24 = scalar_lea.vmem %s388_s19, 32 }
  0x25   : > { %p4160_p7 = scmp.lt.s32.totalorder %s388_s19, %s388_s19  ;;  %p4161_p8 = scmp.lt.s32.totalorder %s4159_s24, %s4152_s21 }
  0x26   : > { %p4155_p2 = pnand %p4153_p0, %p4590_p6 }
  0x27   : > { %p4162_p9 = por %p4161_p8, %p4160_p7 }
  0x28   : > { %p4156_p4 = pneg %p4155_p2 }
  0x29   : > { %4018 = dma.hbm_to_vmem [thread:$0]  (!%p4582_p5), %s5589_s2, 2048, %s363_s14, [#allocation6], %s5579_s25, %s5579_s25, %s5580_s26  }
  0x2a   : > { %p4163_p10 = pnand %p4162_p9, %p4156_p4 }
  0x2c   : > { %4166 = shalt.err (!%p4163_p10)
}
  0x2d   : > { %4024 = dma.hbm_to_vmem [thread:$0]  (!%p4582_p5), %s5565_s4, 16, %s388_s19, [#allocation9]  }
  0x2e   : > { %s4178_s14 = scalar_lea.vmem %s4586_s22, 2048  ;;  %p4186_p0 = scmp.lt.s32.totalorder %s4586_s22, %s4586_s22 }
  0x2f   : > { %p4179_p11 = scmp.ne.s32.totalorder %s4586_s22, %s4178_s14  ;;  %p4187_p2 = scmp.lt.s32.totalorder %s4178_s14, %s4178_s14 }
  0x31   : > { %p4181_p12 = pnand %p4179_p11, %p4590_p6  ;;  %p4188_p4 = por %p4187_p2, %p4186_p0 }
  0x33   : > { %p4182_p13 = pneg %p4181_p12 }
  0x35   : > { %p4189_p7 = pnand %p4188_p4, %p4182_p13 }
  0x37   : > { %4192 = shalt.err (!%p4189_p7)
}
  0x38   : > { %4030 = dma.hbm_to_vmem [thread:$0]  (!%p4582_p5), %s5567_s6, 2048, %s4586_s22, [#allocation12], %s5579_s25, %s5579_s25, %s5580_s26  }
  0x39   : > { %s4464_s19 = smov [#allocation14]   ;;  %s4465_s18 = smov [#allocation17]  }
  0x3a   : > { %s433_s0 = sshll.u32 %s4464_s19, 4  ;;  %s454_s21 = sshll.u32 %s4465_s18, 4  ;;  %s434_s0 = int_to_ptr.vmem [resolvable:$true] %s433_s0  ;;  %s455_s21 = int_to_ptr.vmem [resolvable:$true] %s454_s21 }
  0x3b   : > { %s4204_s24 = scalar_lea.vmem %s434_s0, 16  ;;  %s4211_s14 = scalar_lea.vmem %s434_s0, 32 }
  0x3c   : > { %p4205_p8 = scmp.ne.s32.totalorder %s434_s0, %s4204_s24  ;;  %p4212_p11 = scmp.lt.s32.totalorder %s434_s0, %s434_s0 }
  0x3d   : > { %p4213_p12 = scmp.lt.s32.totalorder %s4211_s14, %s4204_s24 }
  0x3e   : > { %p4207_p9 = pnand %p4205_p8, %p4590_p6 }
  0x3f   : > { %p4214_p13 = por %p4213_p12, %p4212_p11 }
  0x40   : > { %p4208_p10 = pneg %p4207_p9 }
  0x42   : > { %p4215_p0 = pnand %p4214_p13, %p4208_p10 }
  0x44   : > { %4218 = shalt.err (!%p4215_p0)
}
  0x45   : > { %4036 = dma.hbm_to_vmem [thread:$0]  (!%p4582_p5), %s5569_s8, 16, %s434_s0, [#allocation15]  }
  0x46   : > { %s4230_s15 = scalar_lea.vmem %s455_s21, 2048  ;;  %p4238_p8 = scmp.lt.s32.totalorder %s455_s21, %s455_s21 }
  0x47   : > { %p4231_p2 = scmp.ne.s32.totalorder %s455_s21, %s4230_s15  ;;  %p4239_p9 = scmp.lt.s32.totalorder %s4230_s15, %s4230_s15 }
  0x49   : > { %p4233_p4 = pnand %p4231_p2, %p4590_p6  ;;  %p4240_p3 = por %p4239_p9, %p4238_p8 }
  0x4b   : > { %p4234_p7 = pneg %p4233_p4 }
  0x4d   : > { %p4241_p1 = pnand %p4240_p3, %p4234_p7 }
  0x4f   : > { %4244 = shalt.err (!%p4241_p1)
}
  0x50   : > { %4042 = dma.hbm_to_vmem [thread:$0]  (!%p4582_p5), %s5571_s10, 2048, %s455_s21, [#allocation18], %s5579_s25, %s5579_s25, %s5580_s26  }
  0x51   : > { %s4466_s0 = smov [#allocation7]   ;;  %s4467_s14 = smov [#allocation10]  }
  0x52   : > { %s376_s24 = sshll.u32 %s4466_s0, 4  ;;  %s398_s12 = sshll.u32 %s4467_s14, 4  ;;  %s377_s24 = int_to_ptr.vmem [resolvable:$true] %s376_s24  ;;  %s399_s12 = int_to_ptr.vmem [resolvable:$true] %s398_s12 }
  0x53   : > { %s4256_s22 = scalar_lea.vmem %s377_s24, 16  ;;  %s4263_s15 = scalar_lea.vmem %s377_s24, 32 }
  0x54   : > { %p4257_p10 = scmp.ne.s32.totalorder %s377_s24, %s4256_s22  ;;  %p4264_p11 = scmp.lt.s32.totalorder %s377_s24, %s377_s24 }
  0x55   : > { %p4265_p12 = scmp.lt.s32.totalorder %s4263_s15, %s4256_s22 }
  0x56   : > { %p4259_p3 = pnand %p4257_p10, %p4590_p6 }
  0x57   : > { %p4266_p13 = por %p4265_p12, %p4264_p11 }
  0x58   : > { %p4260_p1 = pneg %p4259_p3 }
  0x5a   : > { %p4267_p0 = pnand %p4266_p13, %p4260_p1 }
  0x5c   : > { %4270 = shalt.err (!%p4267_p0)
}
  0x5d   : > { %s5590_s3 = sld [smem:[#allocation27_spill]]  ;;  %s4282_s18 = scalar_lea.vmem %s399_s12, 16 }
  0x5e   : > { %p4283_p2 = scmp.ne.s32.totalorder %s399_s12, %s4282_s18  ;;  %s4289_s0 = scalar_lea.vmem %s399_s12, 32 }
  0x5f   : > { %p4290_p8 = scmp.lt.s32.totalorder %s399_s12, %s399_s12  ;;  %p4291_p9 = scmp.lt.s32.totalorder %s4289_s0, %s4282_s18 }
  0x60   : > { %p4285_p4 = pnand %p4283_p2, %p4590_p6 }
  0x61   : > { %p4292_p10 = por %p4291_p9, %p4290_p8 }
  0x62   : > { %p4286_p7 = pneg %p4285_p4 }
  0x63   : > { %4021 = dma.hbm_to_vmem [thread:$0]  (!%p4582_p5), %s5590_s3, 16, %s377_s24, [#allocation6]  }
  0x64   : > { %p4293_p3 = pnand %p4292_p10, %p4286_p7 }
  0x66   : > { %4296 = shalt.err (!%p4293_p3)
}
  0x67   : > { %4027 = dma.hbm_to_vmem [thread:$0]  (!%p4582_p5), %s5566_s5, 16, %s399_s12, [#allocation9]  }
  0x68   : > { %s4468_s24 = smov [#allocation13]   ;;  %s4469_s19 = smov [#allocation16]  }
  0x69   : > { %s422_s15 = sshll.u32 %s4468_s24, 4  ;;  %s444_s21 = sshll.u32 %s4469_s19, 4  ;;  %s423_s15 = int_to_ptr.vmem [resolvable:$true] %s422_s15  ;;  %s445_s21 = int_to_ptr.vmem [resolvable:$true] %s444_s21 }
  0x6a   : > { %s4308_s25 = scalar_lea.vmem %s423_s15, 16  ;;  %s4315_s18 = scalar_lea.vmem %s423_s15, 32 }
  0x6b   : > { %p4309_p1 = scmp.ne.s32.totalorder %s423_s15, %s4308_s25  ;;  %p4316_p13 = scmp.lt.s32.totalorder %s423_s15, %s423_s15 }
  0x6c   : > { %p4317_p0 = scmp.lt.s32.totalorder %s4315_s18, %s4308_s25 }
  0x6d   : > { %p4311_p11 = pnand %p4309_p1, %p4590_p6 }
  0x6e   : > { %p4318_p2 = por %p4317_p0, %p4316_p13 }
  0x6f   : > { %p4312_p12 = pneg %p4311_p11 }
  0x71   : > { %p4319_p4 = pnand %p4318_p2, %p4312_p12 }
  0x73   : > { %4322 = shalt.err (!%p4319_p4)
}
  0x74   : > { %4033 = dma.hbm_to_vmem [thread:$0]  (!%p4582_p5), %s5568_s7, 16, %s423_s15, [#allocation12]  }
  0x75   : > { %s4334_s14 = scalar_lea.vmem %s445_s21, 16  ;;  %s4341_s22 = scalar_lea.vmem %s445_s21, 32 }
  0x76   : > { %p4335_p7 = scmp.ne.s32.totalorder %s445_s21, %s4334_s14  ;;  %p4342_p10 = scmp.lt.s32.totalorder %s445_s21, %s445_s21 }
  0x77   : > { %p4343_p3 = scmp.lt.s32.totalorder %s4341_s22, %s4334_s14 }
  0x78   : > { %p4337_p8 = pnand %p4335_p7, %p4590_p6 }
  0x79   : > { %p4344_p1 = por %p4343_p3, %p4342_p10 }
  0x7a   : > { %p4338_p9 = pneg %p4337_p8 }
  0x7c   : > { %p4345_p11 = pnand %p4344_p1, %p4338_p9 }
  0x7e   : > { %4348 = shalt.err (!%p4345_p11)
}
  0x7f   : > { %4039 = dma.hbm_to_vmem [thread:$0]  (!%p4582_p5), %s5570_s9, 16, %s445_s21, [#allocation15]  }
  0x80   : > { %s4470_s15 = smov [#allocation19]  }
  0x81   : > { %s468_s19 = sshll.u32 %s4470_s15, 4  ;;  %s469_s19 = int_to_ptr.vmem [resolvable:$true] %s468_s19 }
  0x82   : > { %s4360_s18 = scalar_lea.vmem %s469_s19, 16  ;;  %s4367_s0 = scalar_lea.vmem %s469_s19, 32 }
  0x83   : > { %p4361_p12 = scmp.ne.s32.totalorder %s469_s19, %s4360_s18  ;;  %p4368_p2 = scmp.lt.s32.totalorder %s469_s19, %s469_s19 }
  0x84   : > { %p4369_p4 = scmp.lt.s32.totalorder %s4367_s0, %s4360_s18 }
  0x85   : > { %p4363_p13 = pnand %p4361_p12, %p4590_p6 }
  0x86   : > { %p4370_p7 = por %p4369_p4, %p4368_p2 }
  0x87   : > { %p4364_p0 = pneg %p4363_p13 }
  0x89   : > { %p4371_p8 = pnand %p4370_p7, %p4364_p0 }
  0x8b   : > { %4374 = shalt.err (!%p4371_p8)
}
  0x8c   : > { %4045 = dma.hbm_to_vmem [thread:$0]  (!%p4582_p5), %s5572_s11, 16, %s469_s19, [#allocation18]  }
  0x8d   : > { %s4679_s23 = sadd.s32 1, %s4457_s30   ;;  %s61_s20 = sadd.s32 1, %s4453_s29 }
  0x8e   : > { %s58_s21 = ssub.s32 %s4457_s30, %s4679_s23  ;;  %p68_p6 = scmp.ne.s32.totalorder %s4453_s29, %s4449_s28 }
  0x8f   : > { %p59_p9 = scmp.eq.s32.totalorder %s58_s21, 0  ;;  %p69_p10 = scmp.eq.s32.totalorder %s4457_s30, 0 }
  0x90   : > { %p74_p3 = scmp.ne.s32.totalorder %s4449_s28, %s4445_s27  ;;  %p4060_p1 = scmp.lt.s32.totalorder %s4457_s30, 2 }
  0x91   : > { %s4691_s22 = scalar_select %p59_p9, %s4453_s29, %s61_s20  }
  0x92   : > { %p70_p11 = por %p69_p10, %p68_p6  ;;  %p5591_p12 = scmp.ne.s32.totalorder %s5585_s16, 0 }
  0x93   : > { %s479_s24 = sand.u32 1, %s4453_s29   ;;  %s3061_s15 = sshll.u32 %s4457_s30, 13 }
  0x94   : > { %p4695_p13 = por %p5591_p12, %p74_p3  ;;  %s2969_s19 = sshll.u32 %s479_s24, 9 }
  0x95   : > { %s4704_s12 = scalar_lea.hbm %s5562_s1, %s3061_s15  ;;  %s483_s27 = scalar_lea.vmem [#allocation3], %s2969_s19 }
  0x96   : > { %s5592_s25 = scalar_select %p4695_p13, 1, 0 }
  0x97   : > { %s490_s14 = sshll.u32 %s483_s27, 4  ;;  %p4706_p5 = pnand %p4060_p1, %p70_p11  ;;  %s4710_s14 = int_to_ptr.vmem [resolvable:$true] %s490_s14 }
  0x98   : > { %s4712_s21 = scalar_lea.sflag [#allocation4], %s479_s24  ;;  %s4375_s26 = scalar_lea.hbm %s4704_s12, 8192 }
  0x99   : > { %p4376_p0 = scmp.ne.s32.totalorder %s4704_s12, %s4375_s26  ;;  %p4377_p2 = pneg %p4706_p5 }
  0x9a   : > { %s4380_s19 = scalar_lea.hbm %s5562_s1, 16384  ;;  %p4381_p8 = scmp.lt.s32.totalorder %s4704_s12, %s5562_s1 }
  0x9b   : > { %p4378_p4 = pnand %p4377_p2, %p4376_p0  ;;  %p4382_p6 = scmp.lt.s32.totalorder %s4380_s19, %s4375_s26 }
  0x9d   : > { %p4379_p7 = pneg %p4378_p4  ;;  %p4383_p9 = por %p4382_p6, %p4381_p8 }
  0x9f   : > { %p4384_p10 = pnand %p4383_p9, %p4379_p7 }
  0xa1   : > { %4387 = shalt.err (!%p4384_p10)
}
  0xa2   : > { %s4388_s24 = scalar_lea.vmem %s4710_s14, 8192  ;;  %s4471_s2 = smov [#allocation3]  }
  0xa3   : > { %p4389_p3 = scmp.ne.s32.totalorder %s4710_s14, %s4388_s24  ;;  %s4393_s3 = sshll.u32 %s4471_s2, 4  ;;  %s4394_s3 = int_to_ptr.vmem [resolvable:$false] %s4393_s3 }
  0xa4   : > { %s4395_s15 = scalar_lea.vmem %s4394_s3, 16384  ;;  %p4396_p12 = scmp.lt.s32.totalorder %s4710_s14, %s4394_s3 }
  0xa5   : > { %p4391_p1 = pnand %p4389_p3, %p4377_p2  ;;  %p4397_p0 = scmp.lt.s32.totalorder %s4395_s15, %s4388_s24 }
  0xa7   : > { %p4392_p11 = pneg %p4391_p1  ;;  %p4398_p4 = por %p4397_p0, %p4396_p12 }
  0xa9   : > { %p4399_p13 = pnand %p4398_p4, %p4392_p11 }
  0xab   : > { %4402 = shalt.err (!%p4399_p13)
}
  0xac   : > { %s5594_s26 = smov 8   ;;  %s5595_s18 = smov 128  }
  0xad   : > { %4049 = dma.hbm_to_vmem [thread:$0]  (!%p4706_p5), %s4704_s12, 8192, %s4710_s14, %s4712_s21, %s5595_s18, %s5595_s18, %s5594_s26  }
  0xae   : > { %p5596_p2 = scmp.ne.s32.totalorder %s5586_s17, 0 }
  0xaf   : > { %s504_s2 = sand.u32 (!%p5596_p2), 1, %s4449_s28   ;;  %p5597_p13 = scmp.ne.s32.totalorder (!%p5596_p2), %s5592_s25, 0 }
  0xb0   : > { %502 = sbr.rel (%p5596_p2) target bundleno = 958 (0x3be), region = 68  ;;  %s2973_s3 = sshll.u32 (!%p5596_p2), %s504_s2, 9 }
  0xb1   : > { %s505_s19 = scalar_lea.sflag (!%p5596_p2), [#allocation4], %s504_s2  ;;  %s4739_s0 = scalar_lea.vmem (!%p5596_p2), [#allocation3], %s2973_s3 }
  0xb5   : > { %4420 = dma.done.wait (%p5597_p13), %s505_s19, 8192  }
  0xb6   : > { %4422 = vsyncadd (%p5597_p13), %s505_s19, 4294959104  ;;  %p5598_p7 = scmp.ne.s32.totalorder %s5585_s16, 0 }
  0xb8   : > { %4424 = dma.done.wait (%p5598_p7), [#allocation6], 2064  }
  0xb9   : > { %4426 = vsyncadd (%p5598_p7), [#allocation6], 4294965232 }
  0xba   : > { %4428 = dma.done.wait (%p5598_p7), [#allocation9], 32  }
  0xbb   : > { %4430 = vsyncadd (%p5598_p7), [#allocation9], 4294967264 }
  0xbc   : > { %4432 = dma.done.wait (%p5598_p7), [#allocation12], 2064  }
  0xbd   : > { %4434 = vsyncadd (%p5598_p7), [#allocation12], 4294965232 }
  0xbe   : > { %4436 = dma.done.wait (%p5598_p7), [#allocation15], 32  }
  0xbf   : > { %4438 = vsyncadd (%p5598_p7), [#allocation15], 4294967264 }
  0xc0   : > { %4440 = dma.done.wait (%p5598_p7), [#allocation18], 2064  }
  0xc1   : > { %4442 = vsyncadd (%p5598_p7), [#allocation18], 4294965232  ;;  %v688_v0 = vld [vmem:[#allocation5 + $0x78] sm:$0xff]  ;;  %v687_v1 = vld [vmem:[#allocation5 + $0x70] sm:$0xff]  ;;  %s5599_s16 = sadd.s32 4294967295, %s4457_s30   ;;  %s2629_s25 = sld [smem:[#allocation2]] }
  0xc2   : > { %3557 = vmatprep.subr.mxu0 %v688_v0  ;;  %3941 = vmatprep.subr.mxu1 %v688_v0  ;;  %v686_v2 = vld [vmem:[#allocation5 + $0x68] sm:$0xff]  ;;  %v685_v3 = vld [vmem:[#allocation5 + $0x60] sm:$0xff]  ;;  %v684_v5 = vld [vmem:[#allocation5 + $0x58] sm:$0xff]  ;;  %s2984_s17 = sshll.u32 %s5599_s16, 6  ;;  %s5600_s15 = sld [smem:[#allocation28_spill]] }
  0xc3   : > { %3558 = vmatpush3.msra.mxu0 %v688_v0  ;;  %3957 = vmatpush3.msra.mxu1 %v688_v0  ;;  %v609_v4 = vld [vmem:[%s4739_s0] sm:$0xff]  ;;  %v683_v6 = vld [vmem:[#allocation5 + $0x50] sm:$0xff]  ;;  %v682_v7 = vld [vmem:[#allocation5 + $0x48] sm:$0xff]  ;;  %p598_p5 = scmp.lt.s32.totalorder %s2984_s17, 127 }
  0xc4   : > { %3559 = vmatprep.subr.mxu0 %v687_v1  ;;  %3942 = vmatprep.subr.mxu1 %v687_v1  ;;  %v681_v8 = vld [vmem:[#allocation5 + $0x40] sm:$0xff]  ;;  %v680_v9 = vld [vmem:[#allocation5 + $0x38] sm:$0xff]  ;;  %v679_v10 = vld [vmem:[#allocation5 + $0x30] sm:$0xff] }
  0xc5   : > { %3560 = vmatpush3.msra.mxu0 %v687_v1  ;;  %3958 = vmatpush3.msra.mxu1 %v687_v1  ;;  %v678_v11 = vld [vmem:[#allocation5 + $0x28] sm:$0xff]  ;;  %v677_v12 = vld [vmem:[#allocation5 + $0x20] sm:$0xff]  ;;  %v676_v13 = vld [vmem:[#allocation5 + $0x18] sm:$0xff]  ;;  %s5606_s17 = smov (!%p598_p5, %s2984_s17), 127 }
  0xc6   : > { %3561 = vmatprep.subr.mxu0 %v686_v2  ;;  %3943 = vmatprep.subr.mxu1 %v686_v2  ;;  %v675_v14 = vld [vmem:[#allocation5 + $0x10] sm:$0xff]  ;;  %v674_v15 = vld [vmem:[#allocation5 + $0x8] sm:$0xff]  ;;  %v673_v16 = vld [vmem:[#allocation5] sm:$0xff]  ;;  %s2987_s12 = sshll.u32 %s5606_s17, 3  ;;  %s2985_s14 = sshll.u32 %s5606_s17, 2 }
  0xc7   : > { %3562 = vmatpush3.msra.mxu0 %v686_v2  ;;  %3589 = vmatprep.mubr.f32.mxu0 %v609_v4  ;;  %v610_v17 = vld [vmem:[%s4739_s0 + $0x8] sm:$0xff]  ;;  %v611_v18 = vld [vmem:[%s4739_s0 + $0x10] sm:$0xff]  ;;  %v641_v19 = vld [vmem:[%s4739_s0 + $0x100] sm:$0xff]  ;;  %s5318_s27 = scalar_lea.vmem %s5574_s13, %s2987_s12 }
  0xc8   : > { %3563 = vmatprep.subr.mxu0 %v685_v3  ;;  %3959 = vmatpush3.msra.mxu1 %v686_v2  ;;  %v642_v20 = vld [vmem:[%s4739_s0 + $0x108] sm:$0xff]  ;;  %v1302_v21 = vld [vmem:[#allocation11 + $0x78] sm:$0xff]  ;;  %v643_v22 = vld [vmem:[%s4739_s0 + $0x110] sm:$0xff]  ;;  %s5325_s26 = scalar_lea.vmem %s5600_s15, %s2985_s14 }
  0xc9   : > { %3564 = vmatpush3.msra.mxu0 %v685_v3  ;;  %3944 = vmatprep.subr.mxu1 %v685_v3  ;;  %v612_v23 = vld [vmem:[%s4739_s0 + $0x18] sm:$0xff]  ;;  %v613_v25 = vld [vmem:[%s4739_s0 + $0x20] sm:$0xff]  ;;  %v1300_v27 = vld [vmem:[#allocation11 + $0x68] sm:$0xff] }
  0xca   : > { %3565 = vmatprep.subr.mxu0 %v684_v5  ;;  %3960 = vmatpush3.msra.mxu1 %v685_v3  ;;  %v1301_v24 = vld [vmem:[#allocation11 + $0x70] sm:$0xff]  ;;  %v645_v28 = vld [vmem:[%s4739_s0 + $0x120] sm:$0xff]  ;;  %v614_v29 = vld [vmem:[%s4739_s0 + $0x28] sm:$0xff] }
  0xcb   : > { %3566 = vmatpush3.msra.mxu0 %v684_v5  ;;  %3945 = vmatprep.subr.mxu1 %v684_v5  ;;  %v644_v26 = vld [vmem:[%s4739_s0 + $0x118] sm:$0xff]  ;;  %v1299_v30 = vld [vmem:[#allocation11 + $0x60] sm:$0xff]  ;;  %v615_v31 = vld [vmem:[%s4739_s0 + $0x30] sm:$0xff] }
  0xcc   : > { %3567 = vmatprep.subr.mxu0 %v683_v6  ;;  %3961 = vmatpush3.msra.mxu1 %v684_v5  ;;  %v646_v32 = vld [vmem:[%s4739_s0 + $0x128] sm:$0xff]  ;;  %v1298_v33 = vld [vmem:[#allocation11 + $0x58] sm:$0xff]  ;;  %v647_v34 = vld [vmem:[%s4739_s0 + $0x130] sm:$0xff] }
  0xcd   : > { %3568 = vmatpush3.msra.mxu0 %v683_v6  ;;  %3946 = vmatprep.subr.mxu1 %v683_v6  ;;  %v616_v35 = vld [vmem:[%s4739_s0 + $0x38] sm:$0xff]  ;;  %v617_v37 = vld [vmem:[%s4739_s0 + $0x40] sm:$0xff]  ;;  %v1296_v39 = vld [vmem:[#allocation11 + $0x48] sm:$0xff] }
  0xce   : > { %3569 = vmatprep.subr.mxu0 %v682_v7  ;;  %3962 = vmatpush3.msra.mxu1 %v683_v6  ;;  %v1297_v36 = vld [vmem:[#allocation11 + $0x50] sm:$0xff]  ;;  %v649_v40 = vld [vmem:[%s4739_s0 + $0x140] sm:$0xff]  ;;  %v618_v41 = vld [vmem:[%s4739_s0 + $0x48] sm:$0xff] }
  0xcf   : > { %3570 = vmatpush3.msra.mxu0 %v682_v7  ;;  %3947 = vmatprep.subr.mxu1 %v682_v7  ;;  %v648_v38 = vld [vmem:[%s4739_s0 + $0x138] sm:$0xff]  ;;  %v1295_v42 = vld [vmem:[#allocation11 + $0x40] sm:$0xff]  ;;  %v619_v43 = vld [vmem:[%s4739_s0 + $0x50] sm:$0xff] }
  0xd0   : > { %3571 = vmatprep.subr.mxu0 %v681_v8  ;;  %3963 = vmatpush3.msra.mxu1 %v682_v7  ;;  %v650_v44 = vld [vmem:[%s4739_s0 + $0x148] sm:$0xff]  ;;  %v1294_v45 = vld [vmem:[#allocation11 + $0x38] sm:$0xff]  ;;  %v651_v46 = vld [vmem:[%s4739_s0 + $0x150] sm:$0xff] }
  0xd1   : > { %3572 = vmatpush3.msra.mxu0 %v681_v8  ;;  %3948 = vmatprep.subr.mxu1 %v681_v8  ;;  %v620_v47 = vld [vmem:[%s4739_s0 + $0x58] sm:$0xff]  ;;  %v621_v49 = vld [vmem:[%s4739_s0 + $0x60] sm:$0xff]  ;;  %v1292_v51 = vld [vmem:[#allocation11 + $0x28] sm:$0xff] }
  0xd2   : > { %3573 = vmatprep.subr.mxu0 %v680_v9  ;;  %3964 = vmatpush3.msra.mxu1 %v681_v8  ;;  %v1293_v48 = vld [vmem:[#allocation11 + $0x30] sm:$0xff]  ;;  %v653_v52 = vld [vmem:[%s4739_s0 + $0x160] sm:$0xff]  ;;  %v622_v53 = vld [vmem:[%s4739_s0 + $0x68] sm:$0xff] }
  0xd3   : > { %3574 = vmatpush3.msra.mxu0 %v680_v9  ;;  %3949 = vmatprep.subr.mxu1 %v680_v9  ;;  %v652_v50 = vld [vmem:[%s4739_s0 + $0x158] sm:$0xff]  ;;  %v1291_v54 = vld [vmem:[#allocation11 + $0x20] sm:$0xff]  ;;  %v623_v55 = vld [vmem:[%s4739_s0 + $0x70] sm:$0xff] }
  0xd4   : > { %3575 = vmatprep.subr.mxu0 %v679_v10  ;;  %3965 = vmatpush3.msra.mxu1 %v680_v9  ;;  %v654_v56 = vld [vmem:[%s4739_s0 + $0x168] sm:$0xff]  ;;  %v1290_v57 = vld [vmem:[#allocation11 + $0x18] sm:$0xff]  ;;  %v655_v58 = vld [vmem:[%s4739_s0 + $0x170] sm:$0xff] }
  0xd5   : > { %3576 = vmatpush3.msra.mxu0 %v679_v10  ;;  %3950 = vmatprep.subr.mxu1 %v679_v10  ;;  %v624_v59 = vld [vmem:[%s4739_s0 + $0x78] sm:$0xff]  ;;  %v625_v61 = vld [vmem:[%s4739_s0 + $0x80] sm:$0xff]  ;;  %v626_v0 = vld [vmem:[%s4739_s0 + $0x88] sm:$0xff] }
  0xd6   : > { %3577 = vmatprep.subr.mxu0 %v678_v11  ;;  %3966 = vmatpush3.msra.mxu1 %v679_v10  ;;  %v1289_v60 = vld [vmem:[#allocation11 + $0x10] sm:$0xff]  ;;  %v657_v63 = vld [vmem:[%s4739_s0 + $0x180] sm:$0xff]  ;;  %v658_v2 = vld [vmem:[%s4739_s0 + $0x188] sm:$0xff] }
  0xd7   : > { %3578 = vmatpush3.msra.mxu0 %v678_v11  ;;  %3951 = vmatprep.subr.mxu1 %v678_v11  ;;  %v656_v62 = vld [vmem:[%s4739_s0 + $0x178] sm:$0xff]  ;;  %v627_v1 = vld [vmem:[%s4739_s0 + $0x90] sm:$0xff]  ;;  %v629_v5 = vld [vmem:[%s4739_s0 + $0xa0] sm:$0xff] }
  0xd8   : > { %3579 = vmatprep.subr.mxu0 %v677_v12  ;;  %3967 = vmatpush3.msra.mxu1 %v678_v11  ;;  %v659_v3 = vld [vmem:[%s4739_s0 + $0x190] sm:$0xff]  ;;  %v628_v4 = vld [vmem:[%s4739_s0 + $0x98] sm:$0xff]  ;;  %v661_v7 = vld [vmem:[%s4739_s0 + $0x1a0] sm:$0xff] }
  0xd9   : > { %3580 = vmatpush3.msra.mxu0 %v677_v12  ;;  %3952 = vmatprep.subr.mxu1 %v677_v12  ;;  %v660_v6 = vld [vmem:[%s4739_s0 + $0x198] sm:$0xff]  ;;  %v630_v8 = vld [vmem:[%s4739_s0 + $0xa8] sm:$0xff]  ;;  %v631_v9 = vld [vmem:[%s4739_s0 + $0xb0] sm:$0xff] }
  0xda   : > { %3581 = vmatprep.subr.mxu0 %v676_v13  ;;  %3968 = vmatpush3.msra.mxu1 %v677_v12  ;;  %v662_v10 = vld [vmem:[%s4739_s0 + $0x1a8] sm:$0xff]  ;;  %v663_v11 = vld [vmem:[%s4739_s0 + $0x1b0] sm:$0xff]  ;;  %v632_v12 = vld [vmem:[%s4739_s0 + $0xb8] sm:$0xff] }
  0xdb   : > { %3582 = vmatpush3.msra.mxu0 %v676_v13  ;;  %3953 = vmatprep.subr.mxu1 %v676_v13 }
  0xdc   : > { %3583 = vmatprep.subr.mxu0 %v675_v14  ;;  %3969 = vmatpush3.msra.mxu1 %v676_v13  ;;  %v633_v13 = vld [vmem:[%s4739_s0 + $0xc0] sm:$0xff] }
  0xdd   : > { %3584 = vmatpush3.msra.mxu0 %v675_v14  ;;  %3954 = vmatprep.subr.mxu1 %v675_v14 }
  0xde   : > { %3585 = vmatprep.subr.mxu0 %v674_v15  ;;  %3970 = vmatpush3.msra.mxu1 %v675_v14  ;;  %v664_v14 = vld [vmem:[%s4739_s0 + $0x1b8] sm:$0xff] }
  0xdf   : > { %3586 = vmatpush3.msra.mxu0 %v674_v15  ;;  %3955 = vmatprep.subr.mxu1 %v674_v15 }
  0xe0   : > { %3587 = vmatprep.subr.mxu0 %v673_v16  ;;  %3971 = vmatpush3.msra.mxu1 %v674_v15  ;;  %v665_v15 = vld [vmem:[%s4739_s0 + $0x1c0] sm:$0xff] }
  0xe1   : > { %3588 = vmatpush3.msra.mxu0 %v673_v16  ;;  %3956 = vmatprep.subr.mxu1 %v673_v16 }
  0xe2   : > { %3590 = vmatmul.mubr.f32.vlgmr.msra.gmra.mxu0 %v610_v17  ;;  %3972 = vmatpush3.msra.mxu1 %v673_v16  ;;  %v634_v16 = vld [vmem:[%s4739_s0 + $0xc8] sm:$0xff]  ;;  %v635_v17 = vld [vmem:[%s4739_s0 + $0xd0] sm:$0xff] }
  0xe3   : > { %3592 = vmatprep.mubr.f32.mxu0 %v611_v18  ;;  %3637 = vmatprep.mubr.f32.mxu1 %v641_v19  ;;  %v666_v18 = vld [vmem:[%s4739_s0 + $0x1c8] sm:$0xff]  ;;  %v667_v19 = vld [vmem:[%s4739_s0 + $0x1d0] sm:$0xff] }
  0xe4   : > { %3638 = vmatmul.mubr.f32.vlgmr.msra.gmra.mxu1 %v642_v20  ;;  %3685 = vmatprep.subr.mxu1 %v1302_v21  ;;  %v636_v20 = vld [vmem:[%s4739_s0 + $0xd8] sm:$0xff] }
  0xe5   : > { %3640 = vmatprep.mubr.f32.mxu1 %v643_v22  ;;  %3686 = vmatpush3.msra.mxu1 %v1302_v21  ;;  %v637_v21 = vld [vmem:[%s4739_s0 + $0xe0] sm:$0xff]  ;;  %v668_v22 = vld [vmem:[%s4739_s0 + $0x1d8] sm:$0xff] }
  0xe6   : > { %3593 = vmatmul.mubr.f32.gmra.mxu0 %v612_v23  ;;  %3687 = vmatprep.subr.mxu1 %v1301_v24  ;;  %v669_v23 = vld [vmem:[%s4739_s0 + $0x1e0] sm:$0xff] }
  0xe7   : > { %3595 = vmatprep.mubr.f32.mxu0 %v613_v25  ;;  %3688 = vmatpush3.msra.mxu1 %v1301_v24  ;;  %v638_v24 = vld [vmem:[%s4739_s0 + $0xe8] sm:$0xff]  ;;  %v639_v25 = vld [vmem:[%s4739_s0 + $0xf0] sm:$0xff] }
  0xe8   : > { %3641 = vmatmul.mubr.f32.gmra.mxu1 %v644_v26  ;;  %3689 = vmatprep.subr.mxu1 %v1300_v27  ;;  %v670_v26 = vld [vmem:[%s4739_s0 + $0x1e8] sm:$0xff] }
  0xe9   : > { %3643 = vmatprep.mubr.f32.mxu1 %v645_v28  ;;  %3690 = vmatpush3.msra.mxu1 %v1300_v27  ;;  %v671_v27 = vld [vmem:[%s4739_s0 + $0x1f0] sm:$0xff]  ;;  %v640_v28 = vld [vmem:[%s4739_s0 + $0xf8] sm:$0xff] }
  0xea   : > { %3596 = vmatmul.mubr.f32.gmra.mxu0 %v614_v29  ;;  %3691 = vmatprep.subr.mxu1 %v1299_v30  ;;  %v672_v29 = vld [vmem:[%s4739_s0 + $0x1f8] sm:$0xff] }
  0xeb   : > { %3598 = vmatprep.mubr.f32.mxu0 %v615_v31  ;;  %3692 = vmatpush3.msra.mxu1 %v1299_v30  ;;  %v1288_v30 = vld [vmem:[#allocation11 + $0x8] sm:$0xff]  ;;  %v1287_v31 = vld [vmem:[#allocation11] sm:$0xff] }
  0xec   : > { %3644 = vmatmul.mubr.f32.gmra.mxu1 %v646_v32  ;;  %3693 = vmatprep.subr.mxu1 %v1298_v33  ;;  %v4829_v32 = vld [vmem:[#allocation7] ss:$0 sm:$0xff] }
  0xed   : > { %3646 = vmatprep.mubr.f32.mxu1 %v647_v34  ;;  %3694 = vmatpush3.msra.mxu1 %v1298_v33 }
  0xee   : > { %3599 = vmatmul.mubr.f32.gmra.mxu0 %v616_v35  ;;  %3695 = vmatprep.subr.mxu1 %v1297_v36 }
  0xef   : > { %3601 = vmatprep.mubr.f32.mxu0 %v617_v37  ;;  %3696 = vmatpush3.msra.mxu1 %v1297_v36 }
  0xf0   : > { %3647 = vmatmul.mubr.f32.gmra.mxu1 %v648_v38  ;;  %3697 = vmatprep.subr.mxu1 %v1296_v39  ;;  %v4832_v38 = vld [vmem:[#allocation8] ss:$0 sm:$0xff] }
  0xf1   : > { %3649 = vmatprep.mubr.f32.mxu1 %v649_v40  ;;  %3698 = vmatpush3.msra.mxu1 %v1296_v39 }
  0xf2   : > { %3602 = vmatmul.mubr.f32.gmra.mxu0 %v618_v41  ;;  %3699 = vmatprep.subr.mxu1 %v1295_v42 }
  0xf3   : > { %3604 = vmatprep.mubr.f32.mxu0 %v619_v43  ;;  %3700 = vmatpush3.msra.mxu1 %v1295_v42 }
  0xf4   : > { %3650 = vmatmul.mubr.f32.gmra.mxu1 %v650_v44  ;;  %3701 = vmatprep.subr.mxu1 %v1294_v45 }
  0xf5   : > { %3652 = vmatprep.mubr.f32.mxu1 %v651_v46  ;;  %3702 = vmatpush3.msra.mxu1 %v1294_v45 }
  0xf6   : > { %3605 = vmatmul.mubr.f32.gmra.mxu0 %v620_v47  ;;  %3703 = vmatprep.subr.mxu1 %v1293_v48 }
  0xf7   : > { %3607 = vmatprep.mubr.f32.mxu0 %v621_v49  ;;  %3704 = vmatpush3.msra.mxu1 %v1293_v48  ;;  %v4838_v49 = vld [vmem:[#allocation10] ss:$0 sm:$0xff] }
  0xf8   : > { %3653 = vmatmul.mubr.f32.gmra.mxu1 %v652_v50  ;;  %3705 = vmatprep.subr.mxu1 %v1292_v51 }
  0xf9   : > { %3655 = vmatprep.mubr.f32.mxu1 %v653_v52  ;;  %3706 = vmatpush3.msra.mxu1 %v1292_v51 }
  0xfa   : > { %3608 = vmatmul.mubr.f32.gmra.mxu0 %v622_v53  ;;  %3707 = vmatprep.subr.mxu1 %v1291_v54 }
  0xfb   : > { %3610 = vmatprep.mubr.f32.mxu0 %v623_v55  ;;  %3708 = vmatpush3.msra.mxu1 %v1291_v54 }
  0xfc   : > { %3656 = vmatmul.mubr.f32.gmra.mxu1 %v654_v56  ;;  %3709 = vmatprep.subr.mxu1 %v1290_v57 }
  0xfd   : > { %3658 = vmatprep.mubr.f32.mxu1 %v655_v58  ;;  %3710 = vmatpush3.msra.mxu1 %v1290_v57  ;;  %v1916_v58 = vld [vmem:[#allocation17 + $0x78] sm:$0xff] }
  0xfe   : > { %3611 = vmatmul.mubr.f32.gmra.mxu0 %v624_v59  ;;  %3711 = vmatprep.subr.mxu1 %v1289_v60  ;;  %v1915_v59 = vld [vmem:[#allocation17 + $0x70] sm:$0xff] }
  0xff   : > { %3613 = vmatprep.mubr.f32.mxu0 %v625_v61  ;;  %3712 = vmatpush3.msra.mxu1 %v1289_v60 }
 0x100   : > { %3659 = vmatmul.mubr.f32.gmra.mxu1 %v656_v62  ;;  %3713 = vmatprep.subr.mxu1 %v1288_v30 }
 0x101   : > { %3661 = vmatprep.mubr.f32.mxu1 %v657_v63  ;;  %3714 = vmatpush3.msra.mxu1 %v1288_v30 }
 0x102   : > { %3614 = vmatmul.mubr.f32.gmra.mxu0 %v626_v0  ;;  %3715 = vmatprep.subr.mxu1 %v1287_v31 }
 0x103   : > { %3616 = vmatprep.mubr.f32.mxu0 %v627_v1  ;;  %3716 = vmatpush3.msra.mxu1 %v1287_v31 }
 0x104   : > { %3662 = vmatmul.mubr.f32.gmra.mxu1 %v658_v2  ;;  %3813 = vmatprep.subr.mxu0 %v1916_v58 }
 0x105   : > { %3664 = vmatprep.mubr.f32.mxu1 %v659_v3  ;;  %3814 = vmatpush3.msra.mxu0 %v1916_v58 }
 0x106   : > { %3617 = vmatmul.mubr.f32.gmra.mxu0 %v628_v4  ;;  %3815 = vmatprep.subr.mxu0 %v1915_v59 }
 0x107   : > { %3619 = vmatprep.mubr.f32.mxu0 %v629_v5  ;;  %3816 = vmatpush3.msra.mxu0 %v1915_v59 }
 0x108   : > { %3665 = vmatmul.mubr.f32.gmra.mxu1 %v660_v6  ;;  %v1914_v6 = vld [vmem:[#allocation17 + $0x68] sm:$0xff] }
 0x109   : > { %3667 = vmatprep.mubr.f32.mxu1 %v661_v7  ;;  %3817 = vmatprep.subr.mxu0 %v1914_v6 }
 0x10a   : > { %3620 = vmatmul.mubr.f32.gmra.mxu0 %v630_v8 }
 0x10b   : > { %3622 = vmatprep.mubr.f32.mxu0 %v631_v9  ;;  %3818 = vmatpush3.msra.mxu0 %v1914_v6 }
 0x10c   : > { %3668 = vmatmul.mubr.f32.gmra.mxu1 %v662_v10 }
 0x10d   : > { %3670 = vmatprep.mubr.f32.mxu1 %v663_v11 }
 0x10e   : > { %3623 = vmatmul.mubr.f32.gmra.mxu0 %v632_v12 }
 0x10f   : > { %3625 = vmatprep.mubr.f32.mxu0 %v633_v13 }
 0x110   : > { %3671 = vmatmul.mubr.f32.gmra.mxu1 %v664_v14 }
 0x111   : > { %3673 = vmatprep.mubr.f32.mxu1 %v665_v15 }
 0x112   : > { %3626 = vmatmul.mubr.f32.gmra.mxu0 %v634_v16 }
 0x113   : > { %3628 = vmatprep.mubr.f32.mxu0 %v635_v17  ;;  %v1913_v17 = vld [vmem:[#allocation17 + $0x60] sm:$0xff] }
 0x114   : > { %3674 = vmatmul.mubr.f32.gmra.mxu1 %v666_v18  ;;  %3819 = vmatprep.subr.mxu0 %v1913_v17 }
 0x115   : > { %3676 = vmatprep.mubr.f32.mxu1 %v667_v19  ;;  %3820 = vmatpush3.msra.mxu0 %v1913_v17 }
 0x116   : > { %3629 = vmatmul.mubr.f32.gmra.mxu0 %v636_v20 }
 0x117   : > { %3631 = vmatprep.mubr.f32.mxu0 %v637_v21 }
 0x118   : > { %3677 = vmatmul.mubr.f32.gmra.mxu1 %v668_v22 }
 0x119   : > { %3679 = vmatprep.mubr.f32.mxu1 %v669_v23 }
 0x11a   : > { %3632 = vmatmul.mubr.f32.gmra.mxu0 %v638_v24 }
 0x11b   : > { %3634 = vmatprep.mubr.f32.mxu0 %v639_v25 }
 0x11c   : > { %3680 = vmatmul.mubr.f32.gmra.mxu1 %v670_v26 }
 0x11d   : > { %3682 = vmatprep.mubr.f32.mxu1 %v671_v27 }
 0x11e   : > { %3635 = vmatmul.mubr.f32.gmra.mxu0 %v640_v28  ;;  %v1912_v28 = vld [vmem:[#allocation17 + $0x58] sm:$0xff] }
 0x11f   : > { %3821 = vmatprep.subr.mxu0 %v1912_v28 }
 0x120   : > { %3683 = vmatmul.mubr.f32.gmra.mxu1 %v672_v29  ;;  %3822 = vmatpush3.msra.mxu0 %v1912_v28 }
 0x1a2   : > { %v3591_v33 = vpop.f32.mrf.mxu0 }
 0x1a3   : > { %v768_v34 = vadd.f32 %v3591_v33, %v4829_v32 }
 0x1a4   : > { %v762_v35 = vpop.f32.mrf.mxu0  ;;  %v3639_v36 = vpop.f32.mrf.mxu1 }
 0x1a5   : > { %v1082_v37 = vmax.f32 %v768_v34, 0.0  ;;  %v763_v39 = vadd.f32 %v4829_v32, %v762_v35  ;;  %v928_v40 = vadd.f32 %v3639_v36, %v4829_v32 }
 0x1a6   : > { %v3594_v41 = vpop.f32.mrf.mxu0  ;;  %v922_v42 = vpop.f32.mrf.mxu1 }
 0x1a7   : > { %v1081_v43 = vmax.f32 %v763_v39, 0.0  ;;  %v778_v44 = vadd.f32 %v3594_v41, %v4829_v32  ;;  %v1114_v45 = vmax.f32 %v928_v40, 0.0  ;;  %v1153_v46 = vmul.f32 %v4832_v38, %v1082_v37  ;;  %v1911_v41 = vld [vmem:[#allocation17 + $0x50] sm:$0xff] }
 0x1a8   : > { %v772_v47 = vpop.f32.mrf.mxu0  ;;  %v3642_v48 = vpop.f32.mrf.mxu1  ;;  %v4843_v53 = vadd.f32 %v4829_v32, %v922_v42  ;;  %3823 = vmatprep.subr.mxu0 %v1911_v41 }
 0x1a9   : > { %v1152_v50 = vmul.f32 %v4832_v38, %v1081_v43  ;;  %v1084_v51 = vmax.f32 %v778_v44, 0.0  ;;  %v773_v52 = vadd.f32 %v4829_v32, %v772_v47  ;;  %v1185_v55 = vmul.f32 %v4832_v38, %v1114_v45  ;;  %3824 = vmatpush3.msra.mxu0 %v1911_v41 }
 0x1aa   : > { %v3597_v54 = vpop.f32.mrf.mxu0  ;;  %v938_v56 = vadd.f32 %v3642_v48, %v4829_v32  ;;  %v932_v57 = vpop.f32.mrf.mxu1  ;;  %v1224_v0 = vadd.f32 %v4838_v49, %v1153_v46  ;;  %v1113_v10 = vmax.f32 %v4843_v53, 0.0 }
 0x1ab   : > { %v1155_v60 = vmul.f32 %v4832_v38, %v1084_v51  ;;  %v1083_v61 = vmax.f32 %v773_v52, 0.0  ;;  %v788_v62 = vadd.f32 %v3597_v54, %v4829_v32  ;;  %v1223_v63 = vadd.f32 %v4838_v49, %v1152_v50  ;;  %v1910_v54 = vld [vmem:[#allocation17 + $0x48] sm:$0xff] }
 0x1ac   : > { %v782_v1 = vpop.f32.mrf.mxu0  ;;  %v1116_v2 = vmax.f32 %v938_v56, 0.0  ;;  %v933_v3 = vadd.f32 %v4829_v32, %v932_v57  ;;  %v3645_v4 = vpop.f32.mrf.mxu1  ;;  %v4853_v5 = vadd.f32 %v4838_v49, %v1185_v55  ;;  %3825 = vmatprep.subr.mxu0 %v1910_v54 }
 0x1ad   : > { %v1154_v7 = vmul.f32 %v4832_v38, %v1083_v61  ;;  %v1086_v8 = vmax.f32 %v788_v62, 0.0  ;;  %v783_v9 = vadd.f32 %v4829_v32, %v782_v1  ;;  %3717 = vmatprep.mubr.f32.mxu1 %v1223_v63  ;;  %v1226_v12 = vadd.f32 %v4838_v49, %v1155_v60  ;;  %v1909_v1 = vld [vmem:[#allocation17 + $0x40] sm:$0xff]  ;;  %3826 = vmatpush3.msra.mxu0 %v1910_v54 }
 0x1ae   : > { %v3600_v11 = vpop.f32.mrf.mxu0  ;;  %3718 = vmatmul.mubr.f32.vlgmr.msra.gmra.mxu1 %v1224_v0  ;;  %v1187_v13 = vmul.f32 %v4832_v38, %v1116_v2  ;;  %v1115_v14 = vmax.f32 %v933_v3, 0.0  ;;  %v948_v15 = vadd.f32 %v3645_v4, %v4829_v32  ;;  %v942_v16 = vpop.f32.mrf.mxu1  ;;  %3827 = vmatprep.subr.mxu0 %v1909_v1  ;;  %v1905_v54 = vld [vmem:[#allocation17 + $0x20] sm:$0xff] }
 0x1af   : > { %v1157_v18 = vmul.f32 %v4832_v38, %v1086_v8  ;;  %v1085_v19 = vmax.f32 %v783_v9, 0.0  ;;  %v798_v20 = vadd.f32 %v3600_v11, %v4829_v32  ;;  %v1225_v21 = vadd.f32 %v4838_v49, %v1154_v7  ;;  %3828 = vmatpush3.msra.mxu0 %v1909_v1 }
 0x1b0   : > { %v792_v22 = vpop.f32.mrf.mxu0  ;;  %v1186_v23 = vmul.f32 %v4832_v38, %v1115_v14  ;;  %v1118_v24 = vmax.f32 %v948_v15, 0.0  ;;  %v943_v25 = vadd.f32 %v4829_v32, %v942_v16  ;;  %v3648_v26 = vpop.f32.mrf.mxu1  ;;  %v4867_v27 = vadd.f32 %v4838_v49, %v1187_v13  ;;  %v1908_v14 = vld [vmem:[#allocation17 + $0x38] sm:$0xff] }
 0x1b1   : > { %v1156_v29 = vmul.f32 %v4832_v38, %v1085_v19  ;;  %v1088_v30 = vmax.f32 %v798_v20, 0.0  ;;  %v793_v31 = vadd.f32 %v4829_v32, %v792_v22  ;;  %3720 = vmatprep.mubr.f32.mxu1 %v1225_v21  ;;  %v1228_v33 = vadd.f32 %v4838_v49, %v1157_v18  ;;  %3829 = vmatprep.subr.mxu0 %v1908_v14 }
 0x1b2   : > { %v3603_v34 = vpop.f32.mrf.mxu0  ;;  %3721 = vmatmul.mubr.f32.gmra.mxu1 %v1226_v12  ;;  %v1189_v35 = vmul.f32 %v4832_v38, %v1118_v24  ;;  %v1117_v36 = vmax.f32 %v943_v25, 0.0  ;;  %v958_v37 = vadd.f32 %v3648_v26, %v4829_v32  ;;  %v952_v39 = vpop.f32.mrf.mxu1  ;;  %v4875_v40 = vadd.f32 %v4838_v49, %v1186_v23  ;;  %v1907_v25 = vld [vmem:[#allocation17 + $0x30] sm:$0xff]  ;;  %3830 = vmatpush3.msra.mxu0 %v1908_v14 }
 0x1b3   : > { %v1159_v42 = vmul.f32 %v4832_v38, %v1088_v30  ;;  %v1087_v43 = vmax.f32 %v793_v31, 0.0  ;;  %v808_v44 = vadd.f32 %v3603_v34, %v4829_v32  ;;  %v1227_v45 = vadd.f32 %v4838_v49, %v1156_v29  ;;  %3831 = vmatprep.subr.mxu0 %v1907_v25 }
 0x1b4   : > { %v802_v46 = vpop.f32.mrf.mxu0  ;;  %v1188_v47 = vmul.f32 %v4832_v38, %v1117_v36  ;;  %v1120_v48 = vmax.f32 %v958_v37, 0.0  ;;  %v953_v50 = vadd.f32 %v4829_v32, %v952_v39  ;;  %v3651_v51 = vpop.f32.mrf.mxu1  ;;  %v4883_v52 = vadd.f32 %v4838_v49, %v1189_v35  ;;  %v1906_v39 = vld [vmem:[#allocation17 + $0x28] sm:$0xff]  ;;  %3832 = vmatpush3.msra.mxu0 %v1907_v25 }
 0x1b5   : > { %v1158_v55 = vmul.f32 %v4832_v38, %v1087_v43  ;;  %v1090_v56 = vmax.f32 %v808_v44, 0.0  ;;  %v803_v57 = vadd.f32 %v4829_v32, %v802_v46  ;;  %3723 = vmatprep.mubr.f32.mxu1 %v1227_v45  ;;  %v1230_v58 = vadd.f32 %v4838_v49, %v1159_v42  ;;  %3833 = vmatprep.subr.mxu0 %v1906_v39 }
 0x1b6   : > { %v3606_v59 = vpop.f32.mrf.mxu0  ;;  %3724 = vmatmul.mubr.f32.gmra.mxu1 %v1228_v33  ;;  %v1191_v60 = vmul.f32 %v4832_v38, %v1120_v48  ;;  %v1119_v61 = vmax.f32 %v953_v50, 0.0  ;;  %v968_v62 = vadd.f32 %v3651_v51, %v4829_v32  ;;  %v962_v63 = vpop.f32.mrf.mxu1  ;;  %v4891_v0 = vadd.f32 %v4838_v49, %v1188_v47  ;;  %3834 = vmatpush3.msra.mxu0 %v1906_v39 }
 0x1b7   : > { %v1161_v2 = vmul.f32 %v4832_v38, %v1090_v56  ;;  %v1089_v3 = vmax.f32 %v803_v57, 0.0  ;;  %v818_v4 = vadd.f32 %v3606_v59, %v4829_v32  ;;  %v1229_v6 = vadd.f32 %v4838_v49, %v1158_v55  ;;  %3835 = vmatprep.subr.mxu0 %v1905_v54 }
 0x1b8   : > { %v812_v7 = vpop.f32.mrf.mxu0  ;;  %v1190_v8 = vmul.f32 %v4832_v38, %v1119_v61  ;;  %v1122_v9 = vmax.f32 %v968_v62, 0.0  ;;  %v963_v11 = vadd.f32 %v4829_v32, %v962_v63  ;;  %v3654_v12 = vpop.f32.mrf.mxu1  ;;  %v4899_v13 = vadd.f32 %v4838_v49, %v1191_v60  ;;  %3836 = vmatpush3.msra.mxu0 %v1905_v54 }
 0x1b9   : > { %v1160_v15 = vmul.f32 %v4832_v38, %v1089_v3  ;;  %v1092_v16 = vmax.f32 %v818_v4, 0.0  ;;  %v813_v17 = vadd.f32 %v4829_v32, %v812_v7  ;;  %3726 = vmatprep.mubr.f32.mxu1 %v1229_v6  ;;  %v1232_v18 = vadd.f32 %v4838_v49, %v1161_v2  ;;  %v1904_v2 = vld [vmem:[#allocation17 + $0x18] sm:$0xff] }
 0x1ba   : > { %v3609_v19 = vpop.f32.mrf.mxu0  ;;  %3727 = vmatmul.mubr.f32.gmra.mxu1 %v1230_v58  ;;  %v1193_v20 = vmul.f32 %v4832_v38, %v1122_v9  ;;  %v1121_v21 = vmax.f32 %v963_v11, 0.0  ;;  %v978_v22 = vadd.f32 %v3654_v12, %v4829_v32  ;;  %v972_v23 = vpop.f32.mrf.mxu1  ;;  %v4907_v24 = vadd.f32 %v4838_v49, %v1190_v8  ;;  %3837 = vmatprep.subr.mxu0 %v1904_v2 }
 0x1bb   : > { %v1163_v26 = vmul.f32 %v4832_v38, %v1092_v16  ;;  %v1091_v28 = vmax.f32 %v813_v17, 0.0  ;;  %v828_v29 = vadd.f32 %v3609_v19, %v4829_v32  ;;  %v1231_v30 = vadd.f32 %v4838_v49, %v1160_v15  ;;  %v1903_v16 = vld [vmem:[#allocation17 + $0x10] sm:$0xff]  ;;  %3838 = vmatpush3.msra.mxu0 %v1904_v2 }
 0x1bc   : > { %v822_v31 = vpop.f32.mrf.mxu0  ;;  %v1192_v33 = vmul.f32 %v4832_v38, %v1121_v21  ;;  %v1124_v34 = vmax.f32 %v978_v22, 0.0  ;;  %v973_v35 = vadd.f32 %v4829_v32, %v972_v23  ;;  %v3657_v36 = vpop.f32.mrf.mxu1  ;;  %v4915_v37 = vadd.f32 %v4838_v49, %v1193_v20  ;;  %3839 = vmatprep.subr.mxu0 %v1903_v16 }
 0x1bd   : > { %v1162_v41 = vmul.f32 %v4832_v38, %v1091_v28  ;;  %v1094_v42 = vmax.f32 %v828_v29, 0.0  ;;  %v823_v43 = vadd.f32 %v4829_v32, %v822_v31  ;;  %3729 = vmatprep.mubr.f32.mxu1 %v1231_v30  ;;  %v1234_v44 = vadd.f32 %v4838_v49, %v1163_v26  ;;  %3840 = vmatpush3.msra.mxu0 %v1903_v16 }
 0x1be   : > { %v3612_v45 = vpop.f32.mrf.mxu0  ;;  %3730 = vmatmul.mubr.f32.gmra.mxu1 %v1232_v18  ;;  %v1195_v46 = vmul.f32 %v4832_v38, %v1124_v34  ;;  %v1123_v47 = vmax.f32 %v973_v35, 0.0  ;;  %v988_v48 = vadd.f32 %v3657_v36, %v4829_v32  ;;  %v982_v50 = vpop.f32.mrf.mxu1  ;;  %v4923_v51 = vadd.f32 %v4838_v49, %v1192_v33 }
 0x1bf   : > { %v1165_v55 = vmul.f32 %v4832_v38, %v1094_v42  ;;  %v1093_v56 = vmax.f32 %v823_v43, 0.0  ;;  %v838_v57 = vadd.f32 %v3612_v45, %v4829_v32  ;;  %v1233_v58 = vadd.f32 %v4838_v49, %v1162_v41 }
 0x1c0   : > { %v832_v59 = vpop.f32.mrf.mxu0  ;;  %v1194_v60 = vmul.f32 %v4832_v38, %v1123_v47  ;;  %v1126_v61 = vmax.f32 %v988_v48, 0.0  ;;  %v983_v62 = vadd.f32 %v4829_v32, %v982_v50  ;;  %v3660_v63 = vpop.f32.mrf.mxu1  ;;  %v4931_v1 = vadd.f32 %v4838_v49, %v1195_v46 }
 0x1c1   : > { %v1164_v3 = vmul.f32 %v4832_v38, %v1093_v56  ;;  %v1096_v4 = vmax.f32 %v838_v57, 0.0  ;;  %v833_v6 = vadd.f32 %v4829_v32, %v832_v59  ;;  %3732 = vmatprep.mubr.f32.mxu1 %v1233_v58  ;;  %v1236_v7 = vadd.f32 %v4838_v49, %v1165_v55 }
 0x1c2   : > { %v3615_v8 = vpop.f32.mrf.mxu0  ;;  %3733 = vmatmul.mubr.f32.gmra.mxu1 %v1234_v44  ;;  %v1197_v9 = vmul.f32 %v4832_v38, %v1126_v61  ;;  %v1125_v11 = vmax.f32 %v983_v62, 0.0  ;;  %v998_v12 = vadd.f32 %v3660_v63, %v4829_v32  ;;  %v992_v14 = vpop.f32.mrf.mxu1  ;;  %v4939_v15 = vadd.f32 %v4838_v49, %v1194_v60 }
 0x1c3   : > { %v1167_v17 = vmul.f32 %v4832_v38, %v1096_v4  ;;  %v1095_v18 = vmax.f32 %v833_v6, 0.0  ;;  %v848_v19 = vadd.f32 %v3615_v8, %v4829_v32  ;;  %v1235_v20 = vadd.f32 %v4838_v49, %v1164_v3 }
 0x1c4   : > { %v842_v21 = vpop.f32.mrf.mxu0  ;;  %v1196_v22 = vmul.f32 %v4832_v38, %v1125_v11  ;;  %v1128_v23 = vmax.f32 %v998_v12, 0.0  ;;  %v993_v25 = vadd.f32 %v4829_v32, %v992_v14  ;;  %v3663_v26 = vpop.f32.mrf.mxu1  ;;  %v4947_v28 = vadd.f32 %v4838_v49, %v1197_v9 }
 0x1c5   : > { %v1166_v29 = vmul.f32 %v4832_v38, %v1095_v18  ;;  %v1098_v30 = vmax.f32 %v848_v19, 0.0  ;;  %v843_v31 = vadd.f32 %v4829_v32, %v842_v21  ;;  %3735 = vmatprep.mubr.f32.mxu1 %v1235_v20  ;;  %v1238_v33 = vadd.f32 %v4838_v49, %v1167_v17 }
 0x1c6   : > { %v3618_v34 = vpop.f32.mrf.mxu0  ;;  %3736 = vmatmul.mubr.f32.gmra.mxu1 %v1236_v7  ;;  %v1199_v35 = vmul.f32 %v4832_v38, %v1128_v23  ;;  %v1127_v36 = vmax.f32 %v993_v25, 0.0  ;;  %v1008_v39 = vadd.f32 %v3663_v26, %v4829_v32  ;;  %v1002_v41 = vpop.f32.mrf.mxu1  ;;  %v4955_v42 = vadd.f32 %v4838_v49, %v1196_v22 }
 0x1c7   : > { %v1169_v43 = vmul.f32 %v4832_v38, %v1098_v30  ;;  %v1097_v44 = vmax.f32 %v843_v31, 0.0  ;;  %v858_v45 = vadd.f32 %v3618_v34, %v4829_v32  ;;  %v1237_v46 = vadd.f32 %v4838_v49, %v1166_v29 }
 0x1c8   : > { %v852_v47 = vpop.f32.mrf.mxu0  ;;  %v1198_v48 = vmul.f32 %v4832_v38, %v1127_v36  ;;  %v1130_v50 = vmax.f32 %v1008_v39, 0.0  ;;  %v1003_v54 = vadd.f32 %v4829_v32, %v1002_v41  ;;  %v3666_v55 = vpop.f32.mrf.mxu1  ;;  %v4963_v56 = vadd.f32 %v4838_v49, %v1199_v35 }
 0x1c9   : > { %v1168_v57 = vmul.f32 %v4832_v38, %v1097_v44  ;;  %v1100_v58 = vmax.f32 %v858_v45, 0.0  ;;  %v853_v59 = vadd.f32 %v4829_v32, %v852_v47  ;;  %3738 = vmatprep.mubr.f32.mxu1 %v1237_v46  ;;  %v1240_v60 = vadd.f32 %v4838_v49, %v1169_v43 }
 0x1ca   : > { %v3621_v61 = vpop.f32.mrf.mxu0  ;;  %3739 = vmatmul.mubr.f32.gmra.mxu1 %v1238_v33  ;;  %v1201_v62 = vmul.f32 %v4832_v38, %v1130_v50  ;;  %v1129_v63 = vmax.f32 %v1003_v54, 0.0  ;;  %v1018_v2 = vadd.f32 %v3666_v55, %v4829_v32  ;;  %v1012_v3 = vpop.f32.mrf.mxu1  ;;  %v4971_v4 = vadd.f32 %v4838_v49, %v1198_v48 }
 0x1cb   : > { %v1171_v6 = vmul.f32 %v4832_v38, %v1100_v58  ;;  %v1099_v7 = vmax.f32 %v853_v59, 0.0  ;;  %v868_v8 = vadd.f32 %v3621_v61, %v4829_v32  ;;  %v1239_v9 = vadd.f32 %v4838_v49, %v1168_v57 }
 0x1cc   : > { %v862_v11 = vpop.f32.mrf.mxu0  ;;  %v1200_v12 = vmul.f32 %v4832_v38, %v1129_v63  ;;  %v1132_v14 = vmax.f32 %v1018_v2, 0.0  ;;  %v1013_v16 = vadd.f32 %v4829_v32, %v1012_v3  ;;  %v3669_v17 = vpop.f32.mrf.mxu1  ;;  %v4979_v18 = vadd.f32 %v4838_v49, %v1201_v62 }
 0x1cd   : > { %v1170_v19 = vmul.f32 %v4832_v38, %v1099_v7  ;;  %v1102_v20 = vmax.f32 %v868_v8, 0.0  ;;  %v863_v21 = vadd.f32 %v4829_v32, %v862_v11  ;;  %3741 = vmatprep.mubr.f32.mxu1 %v1239_v9  ;;  %v1242_v22 = vadd.f32 %v4838_v49, %v1171_v6 }
 0x1ce   : > { %v3624_v23 = vpop.f32.mrf.mxu0  ;;  %3742 = vmatmul.mubr.f32.gmra.mxu1 %v1240_v60  ;;  %v1203_v25 = vmul.f32 %v4832_v38, %v1132_v14  ;;  %v1131_v26 = vmax.f32 %v1013_v16, 0.0  ;;  %v1028_v29 = vadd.f32 %v3669_v17, %v4829_v32  ;;  %v1022_v30 = vpop.f32.mrf.mxu1  ;;  %v4987_v31 = vadd.f32 %v4838_v49, %v1200_v12 }
 0x1cf   : > { %v1173_v33 = vmul.f32 %v4832_v38, %v1102_v20  ;;  %v1101_v34 = vmax.f32 %v863_v21, 0.0  ;;  %v878_v35 = vadd.f32 %v3624_v23, %v4829_v32  ;;  %v1241_v36 = vadd.f32 %v4838_v49, %v1170_v19 }
 0x1d0   : > { %v872_v39 = vpop.f32.mrf.mxu0  ;;  %v1202_v41 = vmul.f32 %v4832_v38, %v1131_v26  ;;  %v1134_v43 = vmax.f32 %v1028_v29, 0.0  ;;  %v1023_v44 = vadd.f32 %v4829_v32, %v1022_v30  ;;  %v3672_v45 = vpop.f32.mrf.mxu1  ;;  %v4995_v46 = vadd.f32 %v4838_v49, %v1203_v25 }
 0x1d1   : > { %v1172_v47 = vmul.f32 %v4832_v38, %v1101_v34  ;;  %v1104_v48 = vmax.f32 %v878_v35, 0.0  ;;  %v873_v50 = vadd.f32 %v4829_v32, %v872_v39  ;;  %3744 = vmatprep.mubr.f32.mxu1 %v1241_v36  ;;  %v1244_v54 = vadd.f32 %v4838_v49, %v1173_v33 }
 0x1d2   : > { %v3627_v55 = vpop.f32.mrf.mxu0  ;;  %3745 = vmatmul.mubr.f32.gmra.mxu1 %v1242_v22  ;;  %v1205_v57 = vmul.f32 %v4832_v38, %v1134_v43  ;;  %v1133_v58 = vmax.f32 %v1023_v44, 0.0  ;;  %v1038_v59 = vadd.f32 %v3672_v45, %v4829_v32  ;;  %v1032_v60 = vpop.f32.mrf.mxu1  ;;  %v5003_v61 = vadd.f32 %v4838_v49, %v1202_v41 }
 0x1d3   : > { %v1175_v62 = vmul.f32 %v4832_v38, %v1104_v48  ;;  %v1103_v63 = vmax.f32 %v873_v50, 0.0  ;;  %v888_v2 = vadd.f32 %v3627_v55, %v4829_v32  ;;  %v1243_v3 = vadd.f32 %v4838_v49, %v1172_v47 }
 0x1d4   : > { %v882_v6 = vpop.f32.mrf.mxu0  ;;  %v1204_v7 = vmul.f32 %v4832_v38, %v1133_v58  ;;  %v1136_v8 = vmax.f32 %v1038_v59, 0.0  ;;  %v1033_v9 = vadd.f32 %v4829_v32, %v1032_v60  ;;  %v3675_v11 = vpop.f32.mrf.mxu1  ;;  %v5011_v12 = vadd.f32 %v4838_v49, %v1205_v57 }
 0x1d5   : > { %v1174_v14 = vmul.f32 %v4832_v38, %v1103_v63  ;;  %v1106_v16 = vmax.f32 %v888_v2, 0.0  ;;  %v883_v17 = vadd.f32 %v4829_v32, %v882_v6  ;;  %3747 = vmatprep.mubr.f32.mxu1 %v1243_v3  ;;  %v1246_v19 = vadd.f32 %v4838_v49, %v1175_v62 }
 0x1d6   : > { %v3630_v20 = vpop.f32.mrf.mxu0  ;;  %3748 = vmatmul.mubr.f32.gmra.mxu1 %v1244_v54  ;;  %v1207_v21 = vmul.f32 %v4832_v38, %v1136_v8  ;;  %v1135_v22 = vmax.f32 %v1033_v9, 0.0  ;;  %v1048_v23 = vadd.f32 %v3675_v11, %v4829_v32  ;;  %v1042_v25 = vpop.f32.mrf.mxu1  ;;  %v5019_v26 = vadd.f32 %v4838_v49, %v1204_v7 }
 0x1d7   : > { %v1177_v29 = vmul.f32 %v4832_v38, %v1106_v16  ;;  %v1105_v30 = vmax.f32 %v883_v17, 0.0  ;;  %v898_v33 = vadd.f32 %v3630_v20, %v4829_v32  ;;  %v1245_v34 = vadd.f32 %v4838_v49, %v1174_v14 }
 0x1d8   : > { %v892_v35 = vpop.f32.mrf.mxu0  ;;  %v1206_v36 = vmul.f32 %v4832_v38, %v1135_v22  ;;  %v1138_v39 = vmax.f32 %v1048_v23, 0.0  ;;  %v1043_v41 = vadd.f32 %v4829_v32, %v1042_v25  ;;  %v3678_v43 = vpop.f32.mrf.mxu1  ;;  %v5027_v44 = vadd.f32 %v4838_v49, %v1207_v21 }
 0x1d9   : > { %v1176_v45 = vmul.f32 %v4832_v38, %v1105_v30  ;;  %v1108_v47 = vmax.f32 %v898_v33, 0.0  ;;  %v893_v48 = vadd.f32 %v4829_v32, %v892_v35  ;;  %3750 = vmatprep.mubr.f32.mxu1 %v1245_v34  ;;  %v1248_v50 = vadd.f32 %v4838_v49, %v1177_v29 }
 0x1da   : > { %v3633_v54 = vpop.f32.mrf.mxu0  ;;  %3751 = vmatmul.mubr.f32.gmra.mxu1 %v1246_v19  ;;  %v1209_v55 = vmul.f32 %v4832_v38, %v1138_v39  ;;  %v1137_v57 = vmax.f32 %v1043_v41, 0.0  ;;  %v1058_v58 = vadd.f32 %v3678_v43, %v4829_v32  ;;  %v1052_v59 = vpop.f32.mrf.mxu1  ;;  %v5035_v60 = vadd.f32 %v4838_v49, %v1206_v36 }
 0x1db   : > { %v1179_v62 = vmul.f32 %v4832_v38, %v1108_v47  ;;  %v1107_v63 = vmax.f32 %v893_v48, 0.0  ;;  %v908_v2 = vadd.f32 %v3633_v54, %v4829_v32  ;;  %v1247_v3 = vadd.f32 %v4838_v49, %v1176_v45 }
 0x1dc   : > { %v902_v6 = vpop.f32.mrf.mxu0  ;;  %v1208_v7 = vmul.f32 %v4832_v38, %v1137_v57  ;;  %v1140_v8 = vmax.f32 %v1058_v58, 0.0  ;;  %v1053_v9 = vadd.f32 %v4829_v32, %v1052_v59  ;;  %v3681_v11 = vpop.f32.mrf.mxu1  ;;  %v5043_v14 = vadd.f32 %v4838_v49, %v1209_v55 }
 0x1dd   : > { %v1178_v16 = vmul.f32 %v4832_v38, %v1107_v63  ;;  %v1110_v17 = vmax.f32 %v908_v2, 0.0  ;;  %v903_v19 = vadd.f32 %v4829_v32, %v902_v6  ;;  %3753 = vmatprep.mubr.f32.mxu1 %v1247_v3  ;;  %v1250_v20 = vadd.f32 %v4838_v49, %v1179_v62 }
 0x1de   : > { %v3636_v21 = vpop.f32.mrf.mxu0  ;;  %3754 = vmatmul.mubr.f32.gmra.mxu1 %v1248_v50  ;;  %v1211_v22 = vmul.f32 %v4832_v38, %v1140_v8  ;;  %v1139_v23 = vmax.f32 %v1053_v9, 0.0  ;;  %v1068_v25 = vadd.f32 %v3681_v11, %v4829_v32  ;;  %v1062_v29 = vpop.f32.mrf.mxu1  ;;  %v5051_v30 = vadd.f32 %v4838_v49, %v1208_v7 }
 0x1df   : > { %v1181_v33 = vmul.f32 %v4832_v38, %v1110_v17  ;;  %v1109_v34 = vmax.f32 %v903_v19, 0.0  ;;  %v918_v35 = vadd.f32 %v3636_v21, %v4829_v32  ;;  %v1249_v36 = vadd.f32 %v4838_v49, %v1178_v16 }
 0x1e0   : > { %v912_v39 = vpop.f32.mrf.mxu0  ;;  %v1210_v41 = vmul.f32 %v4832_v38, %v1139_v23  ;;  %v1142_v43 = vmax.f32 %v1068_v25, 0.0  ;;  %v1063_v45 = vadd.f32 %v4829_v32, %v1062_v29  ;;  %v3684_v47 = vpop.f32.mrf.mxu1  ;;  %v5059_v48 = vadd.f32 %v4838_v49, %v1211_v22 }
 0x1e1   : > { %v1180_v50 = vmul.f32 %v4832_v38, %v1109_v34  ;;  %v1112_v54 = vmax.f32 %v918_v35, 0.0  ;;  %v913_v55 = vadd.f32 %v4829_v32, %v912_v39  ;;  %3756 = vmatprep.mubr.f32.mxu1 %v1249_v36  ;;  %v1184_v57 = vmul.f32 %v4832_v38, %v1113_v10 }
 0x1e2   : > { %3757 = vmatmul.mubr.f32.gmra.mxu1 %v1250_v20  ;;  %v1213_v58 = vmul.f32 %v4832_v38, %v1142_v43  ;;  %v1141_v59 = vmax.f32 %v1063_v45, 0.0  ;;  %v1078_v62 = vadd.f32 %v3684_v47, %v4829_v32  ;;  %v1072_v63 = vpop.f32.mrf.mxu1  ;;  %v1281_v2 = vadd.f32 %v4838_v49, %v1210_v41 }
 0x1e3   : > { %v1111_v3 = vmax.f32 %v913_v55, 0.0  ;;  %v1251_v6 = vadd.f32 %v4838_v49, %v1180_v50  ;;  %v1252_v7 = vadd.f32 %v4838_v49, %v1181_v33  ;;  %v1073_v8 = vadd.f32 %v4829_v32, %v1072_v63  ;;  %v1902_v33 = vld [vmem:[#allocation17 + $0x8] sm:$0xff] }
 0x1e4   : > { %v1183_v53 = vmul.f32 %v4832_v38, %v1112_v54  ;;  %v1212_v10 = vmul.f32 %v4832_v38, %v1141_v59  ;;  %v1144_v9 = vmax.f32 %v1078_v62, 0.0  ;;  %v1284_v11 = vadd.f32 %v4838_v49, %v1213_v58  ;;  %3841 = vmatprep.subr.mxu0 %v1902_v33 }
 0x1e5   : > { %v1182_v16 = vmul.f32 %v4832_v38, %v1111_v3  ;;  %3759 = vmatprep.mubr.f32.mxu1 %v1251_v6  ;;  %v1143_v17 = vmax.f32 %v1073_v8, 0.0  ;;  %v1255_v32 = vadd.f32 %v4838_v49, %v1184_v57  ;;  %3842 = vmatpush3.msra.mxu0 %v1902_v33 }
 0x1e6   : > { %3760 = vmatmul.mubr.f32.gmra.mxu1 %v1252_v7  ;;  %v1215_v19 = vmul.f32 %v4832_v38, %v1144_v9  ;;  %v1283_v20 = vadd.f32 %v4838_v49, %v1212_v10  ;;  %v1254_v23 = vadd.f32 %v4838_v49, %v1183_v53 }
 0x1e7   : > { %v1253_v21 = vadd.f32 %v4838_v49, %v1182_v16  ;;  %v1214_v22 = vmul.f32 %v4832_v38, %v1143_v17  ;;  %v1901_v38 = vld [vmem:[#allocation17] sm:$0xff] }
 0x1e8   : > { %v1286_v25 = vadd.f32 %v4838_v49, %v1215_v19  ;;  %3843 = vmatprep.subr.mxu0 %v1901_v38 }
 0x1e9   : > { %3762 = vmatprep.mubr.f32.mxu1 %v1253_v21  ;;  %v1285_v29 = vadd.f32 %v4838_v49, %v1214_v22  ;;  %3844 = vmatpush3.msra.mxu0 %v1901_v38  ;;  %v5110_v49 = vld [vmem:[#allocation13] ss:$0 sm:$0xff] }
 0x1ea   : > { %3763 = vmatmul.mubr.f32.gmra.mxu1 %v1254_v23 }
 0x1eb   : > { %3765 = vmatprep.mubr.f32.mxu1 %v1255_v32 }
 0x1ee   : > { %3766 = vmatmul.mubr.f32.gmra.mxu1 %v4853_v5 }
 0x1ef   : > { %3768 = vmatprep.mubr.f32.mxu1 %v4875_v40 }
 0x1f2   : > { %3769 = vmatmul.mubr.f32.gmra.mxu1 %v4867_v27 }
 0x1f3   : > { %3771 = vmatprep.mubr.f32.mxu1 %v4891_v0  ;;  %v5113_v0 = vld [vmem:[#allocation14] ss:$0 sm:$0xff] }
 0x1f6   : > { %3772 = vmatmul.mubr.f32.gmra.mxu1 %v4883_v52 }
 0x1f7   : > { %3774 = vmatprep.mubr.f32.mxu1 %v4907_v24 }
 0x1fa   : > { %3775 = vmatmul.mubr.f32.gmra.mxu1 %v4899_v13 }
 0x1fb   : > { %3777 = vmatprep.mubr.f32.mxu1 %v4923_v51 }
 0x1fe   : > { %3778 = vmatmul.mubr.f32.gmra.mxu1 %v4915_v37 }
 0x1ff   : > { %3780 = vmatprep.mubr.f32.mxu1 %v4939_v15 }
 0x202   : > { %3781 = vmatmul.mubr.f32.gmra.mxu1 %v4931_v1 }
 0x203   : > { %3783 = vmatprep.mubr.f32.mxu1 %v4955_v42 }
 0x206   : > { %3784 = vmatmul.mubr.f32.gmra.mxu1 %v4947_v28  ;;  %v5118_v28 = vld [vmem:[#allocation16] ss:$0 sm:$0xff] }
 0x207   : > { %3786 = vmatprep.mubr.f32.mxu1 %v4971_v4 }
 0x20a   : > { %3787 = vmatmul.mubr.f32.gmra.mxu1 %v4963_v56 }
 0x20b   : > { %3789 = vmatprep.mubr.f32.mxu1 %v4987_v31 }
 0x20e   : > { %3790 = vmatmul.mubr.f32.gmra.mxu1 %v4979_v18 }
 0x20f   : > { %3792 = vmatprep.mubr.f32.mxu1 %v5003_v61 }
 0x212   : > { %3793 = vmatmul.mubr.f32.gmra.mxu1 %v4995_v46 }
 0x213   : > { %3795 = vmatprep.mubr.f32.mxu1 %v5019_v26 }
 0x216   : > { %3796 = vmatmul.mubr.f32.gmra.mxu1 %v5011_v12 }
 0x217   : > { %3798 = vmatprep.mubr.f32.mxu1 %v5035_v60 }
 0x21a   : > { %3799 = vmatmul.mubr.f32.gmra.mxu1 %v5027_v44 }
 0x21b   : > { %3801 = vmatprep.mubr.f32.mxu1 %v5051_v30 }
 0x21e   : > { %3802 = vmatmul.mubr.f32.gmra.mxu1 %v5043_v14 }
 0x21f   : > { %3804 = vmatprep.mubr.f32.mxu1 %v1281_v2 }
 0x222   : > { %3805 = vmatmul.mubr.f32.gmra.mxu1 %v5059_v48 }
 0x223   : > { %3807 = vmatprep.mubr.f32.mxu1 %v1283_v20 }
 0x226   : > { %3808 = vmatmul.mubr.f32.gmra.mxu1 %v1284_v11 }
 0x227   : > { %3810 = vmatprep.mubr.f32.mxu1 %v1285_v29 }
 0x22a   : > { %3811 = vmatmul.mubr.f32.gmra.mxu1 %v1286_v25 }
 0x26e   : > { %v3719_v5 = vpop.f32.mrf.mxu1 }
 0x26f   : > { %v1382_v27 = vadd.f32 %v3719_v5, %v5110_v49 }
 0x270   : > { %v1376_v40 = vpop.f32.mrf.mxu1 }
 0x271   : > { %v1696_v52 = vmax.f32 %v1382_v27, 0.0  ;;  %v1377_v13 = vadd.f32 %v5110_v49, %v1376_v40 }
 0x272   : > { %v3722_v24 = vpop.f32.mrf.mxu1 }
 0x273   : > { %v1695_v37 = vmax.f32 %v1377_v13, 0.0  ;;  %v1392_v51 = vadd.f32 %v3722_v24, %v5110_v49  ;;  %v1767_v1 = vmul.f32 %v5113_v0, %v1696_v52 }
 0x274   : > { %v1386_v15 = vpop.f32.mrf.mxu1 }
 0x275   : > { %v1766_v42 = vmul.f32 %v5113_v0, %v1695_v37  ;;  %v1698_v56 = vmax.f32 %v1392_v51, 0.0  ;;  %v1387_v4 = vadd.f32 %v5110_v49, %v1386_v15  ;;  %v1838_v12 = vadd.f32 %v5118_v28, %v1767_v1 }
 0x276   : > { %v3725_v18 = vpop.f32.mrf.mxu1 }
 0x277   : > { %v1697_v31 = vmax.f32 %v1387_v4, 0.0  ;;  %v1402_v46 = vadd.f32 %v3725_v18, %v5110_v49  ;;  %v1837_v61 = vadd.f32 %v5118_v28, %v1766_v42  ;;  %v1769_v26 = vmul.f32 %v5113_v0, %v1698_v56 }
 0x278   : > { %v1396_v44 = vpop.f32.mrf.mxu1 }
 0x279   : > { %v1768_v60 = vmul.f32 %v5113_v0, %v1697_v31  ;;  %v1700_v14 = vmax.f32 %v1402_v46, 0.0  ;;  %v1397_v30 = vadd.f32 %v5110_v49, %v1396_v44  ;;  %3845 = vmatprep.mubr.f32.mxu0 %v1837_v61  ;;  %v1840_v45 = vadd.f32 %v5118_v28, %v1769_v26 }
 0x27a   : > { %v3728_v34 = vpop.f32.mrf.mxu1  ;;  %3846 = vmatmul.mubr.f32.vlgmr.msra.gmra.mxu0 %v1838_v12 }
 0x27b   : > { %v1699_v35 = vmax.f32 %v1397_v30, 0.0  ;;  %v1412_v36 = vadd.f32 %v3728_v34, %v5110_v49  ;;  %v1839_v39 = vadd.f32 %v5118_v28, %v1768_v60  ;;  %v1771_v41 = vmul.f32 %v5113_v0, %v1700_v14 }
 0x27c   : > { %v1406_v43 = vpop.f32.mrf.mxu1 }
 0x27d   : > { %v1770_v47 = vmul.f32 %v5113_v0, %v1699_v35  ;;  %v1702_v48 = vmax.f32 %v1412_v36, 0.0  ;;  %v1407_v50 = vadd.f32 %v5110_v49, %v1406_v43  ;;  %3848 = vmatprep.mubr.f32.mxu0 %v1839_v39  ;;  %v1842_v63 = vadd.f32 %v5118_v28, %v1771_v41 }
 0x27e   : > { %v3731_v54 = vpop.f32.mrf.mxu1  ;;  %3849 = vmatmul.mubr.f32.gmra.mxu0 %v1840_v45 }
 0x27f   : > { %v1701_v55 = vmax.f32 %v1407_v50, 0.0  ;;  %v1422_v57 = vadd.f32 %v3731_v54, %v5110_v49  ;;  %v1841_v58 = vadd.f32 %v5118_v28, %v1770_v47  ;;  %v1773_v59 = vmul.f32 %v5113_v0, %v1702_v48 }
 0x280   : > { %v1416_v62 = vpop.f32.mrf.mxu1 }
 0x281   : > { %v1772_v2 = vmul.f32 %v5113_v0, %v1701_v55  ;;  %v1704_v3 = vmax.f32 %v1422_v57, 0.0  ;;  %v1417_v6 = vadd.f32 %v5110_v49, %v1416_v62  ;;  %3851 = vmatprep.mubr.f32.mxu0 %v1841_v58  ;;  %v1844_v16 = vadd.f32 %v5118_v28, %v1773_v59 }
 0x282   : > { %v3734_v7 = vpop.f32.mrf.mxu1  ;;  %3852 = vmatmul.mubr.f32.gmra.mxu0 %v1842_v63 }
 0x283   : > { %v1703_v8 = vmax.f32 %v1417_v6, 0.0  ;;  %v1432_v53 = vadd.f32 %v3734_v7, %v5110_v49  ;;  %v1843_v10 = vadd.f32 %v5118_v28, %v1772_v2  ;;  %v1775_v9 = vmul.f32 %v5113_v0, %v1704_v3 }
 0x284   : > { %v1426_v11 = vpop.f32.mrf.mxu1 }
 0x285   : > { %v1774_v17 = vmul.f32 %v5113_v0, %v1703_v8  ;;  %v1706_v19 = vmax.f32 %v1432_v53, 0.0  ;;  %v1427_v20 = vadd.f32 %v5110_v49, %v1426_v11  ;;  %3854 = vmatprep.mubr.f32.mxu0 %v1843_v10  ;;  %v1846_v33 = vadd.f32 %v5118_v28, %v1775_v9 }
 0x286   : > { %v3737_v21 = vpop.f32.mrf.mxu1  ;;  %3855 = vmatmul.mubr.f32.gmra.mxu0 %v1844_v16 }
 0x287   : > { %v1705_v32 = vmax.f32 %v1427_v20, 0.0  ;;  %v1442_v22 = vadd.f32 %v3737_v21, %v5110_v49  ;;  %v1845_v23 = vadd.f32 %v5118_v28, %v1774_v17  ;;  %v1777_v25 = vmul.f32 %v5113_v0, %v1706_v19 }
 0x288   : > { %v1436_v29 = vpop.f32.mrf.mxu1 }
 0x289   : > { %v1776_v38 = vmul.f32 %v5113_v0, %v1705_v32  ;;  %v1708_v5 = vmax.f32 %v1442_v22, 0.0  ;;  %v1437_v27 = vadd.f32 %v5110_v49, %v1436_v29  ;;  %3857 = vmatprep.mubr.f32.mxu0 %v1845_v23  ;;  %v1848_v1 = vadd.f32 %v5118_v28, %v1777_v25 }
 0x28a   : > { %v3740_v40 = vpop.f32.mrf.mxu1  ;;  %3858 = vmatmul.mubr.f32.gmra.mxu0 %v1846_v33 }
 0x28b   : > { %v1707_v52 = vmax.f32 %v1437_v27, 0.0  ;;  %v1452_v13 = vadd.f32 %v3740_v40, %v5110_v49  ;;  %v1847_v24 = vadd.f32 %v5118_v28, %v1776_v38  ;;  %v1779_v37 = vmul.f32 %v5113_v0, %v1708_v5 }
 0x28c   : > { %v1446_v51 = vpop.f32.mrf.mxu1 }
 0x28d   : > { %v1778_v15 = vmul.f32 %v5113_v0, %v1707_v52  ;;  %v1710_v42 = vmax.f32 %v1452_v13, 0.0  ;;  %v1447_v56 = vadd.f32 %v5110_v49, %v1446_v51  ;;  %3860 = vmatprep.mubr.f32.mxu0 %v1847_v24  ;;  %v1850_v26 = vadd.f32 %v5118_v28, %v1779_v37 }
 0x28e   : > { %v3743_v4 = vpop.f32.mrf.mxu1  ;;  %3861 = vmatmul.mubr.f32.gmra.mxu0 %v1848_v1 }
 0x28f   : > { %v1709_v18 = vmax.f32 %v1447_v56, 0.0  ;;  %v1462_v31 = vadd.f32 %v3743_v4, %v5110_v49  ;;  %v1849_v46 = vadd.f32 %v5118_v28, %v1778_v15  ;;  %v1781_v61 = vmul.f32 %v5113_v0, %v1710_v42 }
 0x290   : > { %v1456_v12 = vpop.f32.mrf.mxu1 }
 0x291   : > { %v1780_v44 = vmul.f32 %v5113_v0, %v1709_v18  ;;  %v1712_v60 = vmax.f32 %v1462_v31, 0.0  ;;  %v1457_v14 = vadd.f32 %v5110_v49, %v1456_v12  ;;  %3863 = vmatprep.mubr.f32.mxu0 %v1849_v46  ;;  %v1852_v43 = vadd.f32 %v5118_v28, %v1781_v61 }
 0x292   : > { %v3746_v30 = vpop.f32.mrf.mxu1  ;;  %3864 = vmatmul.mubr.f32.gmra.mxu0 %v1850_v26 }
 0x293   : > { %v1711_v34 = vmax.f32 %v1457_v14, 0.0  ;;  %v1472_v35 = vadd.f32 %v3746_v30, %v5110_v49  ;;  %v1851_v36 = vadd.f32 %v5118_v28, %v1780_v44  ;;  %v1783_v39 = vmul.f32 %v5113_v0, %v1712_v60 }
 0x294   : > { %v1466_v41 = vpop.f32.mrf.mxu1 }
 0x295   : > { %v1782_v45 = vmul.f32 %v5113_v0, %v1711_v34  ;;  %v1714_v47 = vmax.f32 %v1472_v35, 0.0  ;;  %v1467_v48 = vadd.f32 %v5110_v49, %v1466_v41  ;;  %3866 = vmatprep.mubr.f32.mxu0 %v1851_v36  ;;  %v1854_v62 = vadd.f32 %v5118_v28, %v1783_v39 }
 0x296   : > { %v3749_v50 = vpop.f32.mrf.mxu1  ;;  %3867 = vmatmul.mubr.f32.gmra.mxu0 %v1852_v43 }
 0x297   : > { %v1713_v54 = vmax.f32 %v1467_v48, 0.0  ;;  %v1482_v55 = vadd.f32 %v3749_v50, %v5110_v49  ;;  %v1853_v57 = vadd.f32 %v5118_v28, %v1782_v45  ;;  %v1785_v58 = vmul.f32 %v5113_v0, %v1714_v47 }
 0x298   : > { %v1476_v59 = vpop.f32.mrf.mxu1 }
 0x299   : > { %v1784_v63 = vmul.f32 %v5113_v0, %v1713_v54  ;;  %v1716_v2 = vmax.f32 %v1482_v55, 0.0  ;;  %v1477_v3 = vadd.f32 %v5110_v49, %v1476_v59  ;;  %3869 = vmatprep.mubr.f32.mxu0 %v1853_v57  ;;  %v1856_v11 = vadd.f32 %v5118_v28, %v1785_v58 }
 0x29a   : > { %v3752_v6 = vpop.f32.mrf.mxu1  ;;  %3870 = vmatmul.mubr.f32.gmra.mxu0 %v1854_v62 }
 0x29b   : > { %v1715_v7 = vmax.f32 %v1477_v3, 0.0  ;;  %v1492_v8 = vadd.f32 %v3752_v6, %v5110_v49  ;;  %v1855_v53 = vadd.f32 %v5118_v28, %v1784_v63  ;;  %v1787_v10 = vmul.f32 %v5113_v0, %v1716_v2 }
 0x29c   : > { %v1486_v9 = vpop.f32.mrf.mxu1 }
 0x29d   : > { %v1786_v16 = vmul.f32 %v5113_v0, %v1715_v7  ;;  %v1718_v17 = vmax.f32 %v1492_v8, 0.0  ;;  %v1487_v19 = vadd.f32 %v5110_v49, %v1486_v9  ;;  %3872 = vmatprep.mubr.f32.mxu0 %v1855_v53  ;;  %v1858_v29 = vadd.f32 %v5118_v28, %v1787_v10 }
 0x29e   : > { %v3755_v20 = vpop.f32.mrf.mxu1  ;;  %3873 = vmatmul.mubr.f32.gmra.mxu0 %v1856_v11 }
 0x29f   : > { %v1717_v21 = vmax.f32 %v1487_v19, 0.0  ;;  %v1502_v32 = vadd.f32 %v3755_v20, %v5110_v49  ;;  %v1857_v22 = vadd.f32 %v5118_v28, %v1786_v16  ;;  %v1789_v23 = vmul.f32 %v5113_v0, %v1718_v17 }
 0x2a0   : > { %v1496_v25 = vpop.f32.mrf.mxu1 }
 0x2a1   : > { %v1788_v33 = vmul.f32 %v5113_v0, %v1717_v21  ;;  %v1720_v38 = vmax.f32 %v1502_v32, 0.0  ;;  %v1497_v5 = vadd.f32 %v5110_v49, %v1496_v25  ;;  %3875 = vmatprep.mubr.f32.mxu0 %v1857_v22  ;;  %v1860_v51 = vadd.f32 %v5118_v28, %v1789_v23 }
 0x2a2   : > { %v3758_v27 = vpop.f32.mrf.mxu1  ;;  %3876 = vmatmul.mubr.f32.gmra.mxu0 %v1858_v29 }
 0x2a3   : > { %v1719_v40 = vmax.f32 %v1497_v5, 0.0  ;;  %v1512_v52 = vadd.f32 %v3758_v27, %v5110_v49  ;;  %v1859_v13 = vadd.f32 %v5118_v28, %v1788_v33  ;;  %v1791_v24 = vmul.f32 %v5113_v0, %v1720_v38 }
 0x2a4   : > { %v1506_v37 = vpop.f32.mrf.mxu1 }
 0x2a5   : > { %v1790_v1 = vmul.f32 %v5113_v0, %v1719_v40  ;;  %v1722_v15 = vmax.f32 %v1512_v52, 0.0  ;;  %v1507_v42 = vadd.f32 %v5110_v49, %v1506_v37  ;;  %3878 = vmatprep.mubr.f32.mxu0 %v1859_v13  ;;  %v1862_v12 = vadd.f32 %v5118_v28, %v1791_v24 }
 0x2a6   : > { %v3761_v56 = vpop.f32.mrf.mxu1  ;;  %3879 = vmatmul.mubr.f32.gmra.mxu0 %v1860_v51 }
 0x2a7   : > { %v1721_v4 = vmax.f32 %v1507_v42, 0.0  ;;  %v1522_v18 = vadd.f32 %v3761_v56, %v5110_v49  ;;  %v1861_v31 = vadd.f32 %v5118_v28, %v1790_v1  ;;  %v1793_v46 = vmul.f32 %v5113_v0, %v1722_v15 }
 0x2a8   : > { %v1516_v61 = vpop.f32.mrf.mxu1 }
 0x2a9   : > { %v1792_v26 = vmul.f32 %v5113_v0, %v1721_v4  ;;  %v1724_v44 = vmax.f32 %v1522_v18, 0.0  ;;  %v1517_v60 = vadd.f32 %v5110_v49, %v1516_v61  ;;  %3881 = vmatprep.mubr.f32.mxu0 %v1861_v31  ;;  %v1864_v41 = vadd.f32 %v5118_v28, %v1793_v46 }
 0x2aa   : > { %v3764_v14 = vpop.f32.mrf.mxu1  ;;  %3882 = vmatmul.mubr.f32.gmra.mxu0 %v1862_v12 }
 0x2ab   : > { %v1723_v30 = vmax.f32 %v1517_v60, 0.0  ;;  %v1532_v34 = vadd.f32 %v3764_v14, %v5110_v49  ;;  %v1863_v35 = vadd.f32 %v5118_v28, %v1792_v26  ;;  %v1795_v36 = vmul.f32 %v5113_v0, %v1724_v44 }
 0x2ac   : > { %v1526_v39 = vpop.f32.mrf.mxu1 }
 0x2ad   : > { %v1794_v43 = vmul.f32 %v5113_v0, %v1723_v30  ;;  %v1726_v45 = vmax.f32 %v1532_v34, 0.0  ;;  %v1527_v47 = vadd.f32 %v5110_v49, %v1526_v39  ;;  %3884 = vmatprep.mubr.f32.mxu0 %v1863_v35  ;;  %v1866_v59 = vadd.f32 %v5118_v28, %v1795_v36 }
 0x2ae   : > { %v3767_v48 = vpop.f32.mrf.mxu1  ;;  %3885 = vmatmul.mubr.f32.gmra.mxu0 %v1864_v41 }
 0x2af   : > { %v1725_v50 = vmax.f32 %v1527_v47, 0.0  ;;  %v1542_v54 = vadd.f32 %v3767_v48, %v5110_v49  ;;  %v1865_v55 = vadd.f32 %v5118_v28, %v1794_v43  ;;  %v1797_v57 = vmul.f32 %v5113_v0, %v1726_v45 }
 0x2b0   : > { %v1536_v58 = vpop.f32.mrf.mxu1 }
 0x2b1   : > { %v1796_v62 = vmul.f32 %v5113_v0, %v1725_v50  ;;  %v1728_v63 = vmax.f32 %v1542_v54, 0.0  ;;  %v1537_v2 = vadd.f32 %v5110_v49, %v1536_v58  ;;  %3887 = vmatprep.mubr.f32.mxu0 %v1865_v55  ;;  %v1868_v9 = vadd.f32 %v5118_v28, %v1797_v57 }
 0x2b2   : > { %v3770_v3 = vpop.f32.mrf.mxu1  ;;  %3888 = vmatmul.mubr.f32.gmra.mxu0 %v1866_v59 }
 0x2b3   : > { %v1727_v6 = vmax.f32 %v1537_v2, 0.0  ;;  %v1552_v7 = vadd.f32 %v3770_v3, %v5110_v49  ;;  %v1867_v8 = vadd.f32 %v5118_v28, %v1796_v62  ;;  %v1799_v53 = vmul.f32 %v5113_v0, %v1728_v63 }
 0x2b4   : > { %v1546_v10 = vpop.f32.mrf.mxu1 }
 0x2b5   : > { %v1798_v11 = vmul.f32 %v5113_v0, %v1727_v6  ;;  %v1730_v16 = vmax.f32 %v1552_v7, 0.0  ;;  %v1547_v17 = vadd.f32 %v5110_v49, %v1546_v10  ;;  %3890 = vmatprep.mubr.f32.mxu0 %v1867_v8  ;;  %v1870_v25 = vadd.f32 %v5118_v28, %v1799_v53 }
 0x2b6   : > { %v3773_v19 = vpop.f32.mrf.mxu1  ;;  %3891 = vmatmul.mubr.f32.gmra.mxu0 %v1868_v9 }
 0x2b7   : > { %v1729_v20 = vmax.f32 %v1547_v17, 0.0  ;;  %v1562_v21 = vadd.f32 %v3773_v19, %v5110_v49  ;;  %v1869_v32 = vadd.f32 %v5118_v28, %v1798_v11  ;;  %v1801_v22 = vmul.f32 %v5113_v0, %v1730_v16 }
 0x2b8   : > { %v1556_v23 = vpop.f32.mrf.mxu1 }
 0x2b9   : > { %v1800_v29 = vmul.f32 %v5113_v0, %v1729_v20  ;;  %v1732_v33 = vmax.f32 %v1562_v21, 0.0  ;;  %v1557_v38 = vadd.f32 %v5110_v49, %v1556_v23  ;;  %3893 = vmatprep.mubr.f32.mxu0 %v1869_v32  ;;  %v1872_v37 = vadd.f32 %v5118_v28, %v1801_v22 }
 0x2ba   : > { %v3776_v5 = vpop.f32.mrf.mxu1  ;;  %3894 = vmatmul.mubr.f32.gmra.mxu0 %v1870_v25 }
 0x2bb   : > { %v1731_v27 = vmax.f32 %v1557_v38, 0.0  ;;  %v1572_v40 = vadd.f32 %v3776_v5, %v5110_v49  ;;  %v1871_v52 = vadd.f32 %v5118_v28, %v1800_v29  ;;  %v1803_v13 = vmul.f32 %v5113_v0, %v1732_v33 }
 0x2bc   : > { %v1566_v24 = vpop.f32.mrf.mxu1 }
 0x2bd   : > { %v1802_v51 = vmul.f32 %v5113_v0, %v1731_v27  ;;  %v1734_v1 = vmax.f32 %v1572_v40, 0.0  ;;  %v1567_v15 = vadd.f32 %v5110_v49, %v1566_v24  ;;  %3896 = vmatprep.mubr.f32.mxu0 %v1871_v52  ;;  %v1874_v61 = vadd.f32 %v5118_v28, %v1803_v13 }
 0x2be   : > { %v3779_v42 = vpop.f32.mrf.mxu1  ;;  %3897 = vmatmul.mubr.f32.gmra.mxu0 %v1872_v37 }
 0x2bf   : > { %v1733_v56 = vmax.f32 %v1567_v15, 0.0  ;;  %v1582_v4 = vadd.f32 %v3779_v42, %v5110_v49  ;;  %v1873_v18 = vadd.f32 %v5118_v28, %v1802_v51  ;;  %v1805_v31 = vmul.f32 %v5113_v0, %v1734_v1 }
 0x2c0   : > { %v1576_v46 = vpop.f32.mrf.mxu1 }
 0x2c1   : > { %v1804_v12 = vmul.f32 %v5113_v0, %v1733_v56  ;;  %v1736_v26 = vmax.f32 %v1582_v4, 0.0  ;;  %v1577_v44 = vadd.f32 %v5110_v49, %v1576_v46  ;;  %3899 = vmatprep.mubr.f32.mxu0 %v1873_v18  ;;  %v1876_v39 = vadd.f32 %v5118_v28, %v1805_v31 }
 0x2c2   : > { %v3782_v60 = vpop.f32.mrf.mxu1  ;;  %3900 = vmatmul.mubr.f32.gmra.mxu0 %v1874_v61 }
 0x2c3   : > { %v1735_v14 = vmax.f32 %v1577_v44, 0.0  ;;  %v1592_v30 = vadd.f32 %v3782_v60, %v5110_v49  ;;  %v1875_v34 = vadd.f32 %v5118_v28, %v1804_v12  ;;  %v1807_v35 = vmul.f32 %v5113_v0, %v1736_v26 }
 0x2c4   : > { %v1586_v36 = vpop.f32.mrf.mxu1 }
 0x2c5   : > { %v1806_v41 = vmul.f32 %v5113_v0, %v1735_v14  ;;  %v1738_v43 = vmax.f32 %v1592_v30, 0.0  ;;  %v1587_v45 = vadd.f32 %v5110_v49, %v1586_v36  ;;  %3902 = vmatprep.mubr.f32.mxu0 %v1875_v34  ;;  %v1878_v58 = vadd.f32 %v5118_v28, %v1807_v35 }
 0x2c6   : > { %v3785_v47 = vpop.f32.mrf.mxu1  ;;  %3903 = vmatmul.mubr.f32.gmra.mxu0 %v1876_v39 }
 0x2c7   : > { %v1737_v48 = vmax.f32 %v1587_v45, 0.0  ;;  %v1602_v50 = vadd.f32 %v3785_v47, %v5110_v49  ;;  %v1877_v54 = vadd.f32 %v5118_v28, %v1806_v41  ;;  %v1809_v55 = vmul.f32 %v5113_v0, %v1738_v43 }
 0x2c8   : > { %v1596_v57 = vpop.f32.mrf.mxu1 }
 0x2c9   : > { %v1808_v59 = vmul.f32 %v5113_v0, %v1737_v48  ;;  %v1740_v62 = vmax.f32 %v1602_v50, 0.0  ;;  %v1597_v63 = vadd.f32 %v5110_v49, %v1596_v57  ;;  %3905 = vmatprep.mubr.f32.mxu0 %v1877_v54  ;;  %v1880_v10 = vadd.f32 %v5118_v28, %v1809_v55 }
 0x2ca   : > { %v3788_v2 = vpop.f32.mrf.mxu1  ;;  %3906 = vmatmul.mubr.f32.gmra.mxu0 %v1878_v58 }
 0x2cb   : > { %v1739_v3 = vmax.f32 %v1597_v63, 0.0  ;;  %v1612_v6 = vadd.f32 %v3788_v2, %v5110_v49  ;;  %v1879_v7 = vadd.f32 %v5118_v28, %v1808_v59  ;;  %v1811_v8 = vmul.f32 %v5113_v0, %v1740_v62 }
 0x2cc   : > { %v1606_v53 = vpop.f32.mrf.mxu1 }
 0x2cd   : > { %v1810_v9 = vmul.f32 %v5113_v0, %v1739_v3  ;;  %v1742_v11 = vmax.f32 %v1612_v6, 0.0  ;;  %v1607_v16 = vadd.f32 %v5110_v49, %v1606_v53  ;;  %3908 = vmatprep.mubr.f32.mxu0 %v1879_v7  ;;  %v1882_v23 = vadd.f32 %v5118_v28, %v1811_v8 }
 0x2ce   : > { %v3791_v17 = vpop.f32.mrf.mxu1  ;;  %3909 = vmatmul.mubr.f32.gmra.mxu0 %v1880_v10 }
 0x2cf   : > { %v1741_v19 = vmax.f32 %v1607_v16, 0.0  ;;  %v1622_v20 = vadd.f32 %v3791_v17, %v5110_v49  ;;  %v1881_v21 = vadd.f32 %v5118_v28, %v1810_v9  ;;  %v1813_v32 = vmul.f32 %v5113_v0, %v1742_v11 }
 0x2d0   : > { %v1616_v22 = vpop.f32.mrf.mxu1 }
 0x2d1   : > { %v1812_v25 = vmul.f32 %v5113_v0, %v1741_v19  ;;  %v1744_v29 = vmax.f32 %v1622_v20, 0.0  ;;  %v1617_v33 = vadd.f32 %v5110_v49, %v1616_v22  ;;  %3911 = vmatprep.mubr.f32.mxu0 %v1881_v21  ;;  %v1884_v24 = vadd.f32 %v5118_v28, %v1813_v32 }
 0x2d2   : > { %v3794_v38 = vpop.f32.mrf.mxu1  ;;  %3912 = vmatmul.mubr.f32.gmra.mxu0 %v1882_v23 }
 0x2d3   : > { %v1743_v5 = vmax.f32 %v1617_v33, 0.0  ;;  %v1632_v27 = vadd.f32 %v3794_v38, %v5110_v49  ;;  %v1883_v40 = vadd.f32 %v5118_v28, %v1812_v25  ;;  %v1815_v52 = vmul.f32 %v5113_v0, %v1744_v29 }
 0x2d4   : > { %v1626_v13 = vpop.f32.mrf.mxu1 }
 0x2d5   : > { %v1814_v37 = vmul.f32 %v5113_v0, %v1743_v5  ;;  %v1746_v51 = vmax.f32 %v1632_v27, 0.0  ;;  %v1627_v1 = vadd.f32 %v5110_v49, %v1626_v13  ;;  %3914 = vmatprep.mubr.f32.mxu0 %v1883_v40  ;;  %v1886_v46 = vadd.f32 %v5118_v28, %v1815_v52 }
 0x2d6   : > { %v3797_v15 = vpop.f32.mrf.mxu1  ;;  %3915 = vmatmul.mubr.f32.gmra.mxu0 %v1884_v24 }
 0x2d7   : > { %v1745_v42 = vmax.f32 %v1627_v1, 0.0  ;;  %v1642_v56 = vadd.f32 %v3797_v15, %v5110_v49  ;;  %v1885_v4 = vadd.f32 %v5118_v28, %v1814_v37  ;;  %v1817_v18 = vmul.f32 %v5113_v0, %v1746_v51 }
 0x2d8   : > { %v1636_v31 = vpop.f32.mrf.mxu1 }
 0x2d9   : > { %v1816_v61 = vmul.f32 %v5113_v0, %v1745_v42  ;;  %v1748_v12 = vmax.f32 %v1642_v56, 0.0  ;;  %v1637_v26 = vadd.f32 %v5110_v49, %v1636_v31  ;;  %3917 = vmatprep.mubr.f32.mxu0 %v1885_v4  ;;  %v1888_v36 = vadd.f32 %v5118_v28, %v1817_v18 }
 0x2da   : > { %v3800_v44 = vpop.f32.mrf.mxu1  ;;  %3918 = vmatmul.mubr.f32.gmra.mxu0 %v1886_v46 }
 0x2db   : > { %v1747_v60 = vmax.f32 %v1637_v26, 0.0  ;;  %v1652_v14 = vadd.f32 %v3800_v44, %v5110_v49  ;;  %v1887_v30 = vadd.f32 %v5118_v28, %v1816_v61  ;;  %v1819_v34 = vmul.f32 %v5113_v0, %v1748_v12 }
 0x2dc   : > { %v1646_v35 = vpop.f32.mrf.mxu1  ;;  %v5312_v61 = vstv %s2629_s25 }
 0x2dd   : > { %v1818_v39 = vmul.f32 %v5113_v0, %v1747_v60  ;;  %v1750_v41 = vmax.f32 %v1652_v14, 0.0  ;;  %v1647_v43 = vadd.f32 %v5110_v49, %v1646_v35  ;;  %3920 = vmatprep.mubr.f32.mxu0 %v1887_v30  ;;  %v1890_v57 = vadd.f32 %v5118_v28, %v1819_v34 }
 0x2de   : > { %v3803_v45 = vpop.f32.mrf.mxu1  ;;  %3921 = vmatmul.mubr.f32.gmra.mxu0 %v1888_v36 }
 0x2df   : > { %v1749_v47 = vmax.f32 %v1647_v43, 0.0  ;;  %v1662_v48 = vadd.f32 %v3803_v45, %v5110_v49  ;;  %v1889_v50 = vadd.f32 %v5118_v28, %v1818_v39  ;;  %v1821_v54 = vmul.f32 %v5113_v0, %v1750_v41 }
 0x2e0   : > { %v1656_v55 = vpop.f32.mrf.mxu1 }
 0x2e1   : > { %v1820_v58 = vmul.f32 %v5113_v0, %v1749_v47  ;;  %v1752_v59 = vmax.f32 %v1662_v48, 0.0  ;;  %v1657_v62 = vadd.f32 %v5110_v49, %v1656_v55  ;;  %3923 = vmatprep.mubr.f32.mxu0 %v1889_v50  ;;  %v1892_v53 = vadd.f32 %v5118_v28, %v1821_v54 }
 0x2e2   : > { %v3806_v63 = vpop.f32.mrf.mxu1  ;;  %3924 = vmatmul.mubr.f32.gmra.mxu0 %v1890_v57 }
 0x2e3   : > { %v1751_v2 = vmax.f32 %v1657_v62, 0.0  ;;  %v1672_v3 = vadd.f32 %v3806_v63, %v5110_v49  ;;  %v1891_v6 = vadd.f32 %v5118_v28, %v1820_v58  ;;  %v1823_v7 = vmul.f32 %v5113_v0, %v1752_v59 }
 0x2e4   : > { %v1666_v8 = vpop.f32.mrf.mxu1 }
 0x2e5   : > { %v1822_v10 = vmul.f32 %v5113_v0, %v1751_v2  ;;  %v1754_v9 = vmax.f32 %v1672_v3, 0.0  ;;  %v1667_v11 = vadd.f32 %v5110_v49, %v1666_v8  ;;  %3926 = vmatprep.mubr.f32.mxu0 %v1891_v6  ;;  %v1894_v22 = vadd.f32 %v5118_v28, %v1823_v7 }
 0x2e6   : > { %v3809_v16 = vpop.f32.mrf.mxu1  ;;  %3927 = vmatmul.mubr.f32.gmra.mxu0 %v1892_v53 }
 0x2e7   : > { %v1753_v17 = vmax.f32 %v1667_v11, 0.0  ;;  %v1682_v19 = vadd.f32 %v3809_v16, %v5110_v49  ;;  %v1893_v20 = vadd.f32 %v5118_v28, %v1822_v10  ;;  %v1825_v21 = vmul.f32 %v5113_v0, %v1754_v9 }
 0x2e8   : > { %v1676_v32 = vpop.f32.mrf.mxu1 }
 0x2e9   : > { %v1824_v23 = vmul.f32 %v5113_v0, %v1753_v17  ;;  %v1756_v25 = vmax.f32 %v1682_v19, 0.0  ;;  %v1677_v29 = vadd.f32 %v5110_v49, %v1676_v32  ;;  %3929 = vmatprep.mubr.f32.mxu0 %v1893_v20  ;;  %v1896_v13 = vadd.f32 %v5118_v28, %v1825_v21 }
 0x2ea   : > { %v3812_v33 = vpop.f32.mrf.mxu1  ;;  %3930 = vmatmul.mubr.f32.gmra.mxu0 %v1894_v22 }
 0x2eb   : > { %v1755_v38 = vmax.f32 %v1677_v29, 0.0  ;;  %v1692_v5 = vadd.f32 %v3812_v33, %v5110_v49  ;;  %v1895_v27 = vadd.f32 %v5118_v28, %v1824_v23  ;;  %v1827_v40 = vmul.f32 %v5113_v0, %v1756_v25 }
 0x2ec   : > { %v1686_v52 = vpop.f32.mrf.mxu1 }
 0x2ed   : > { %v1826_v24 = vmul.f32 %v5113_v0, %v1755_v38  ;;  %v1758_v37 = vmax.f32 %v1692_v5, 0.0  ;;  %v1687_v51 = vadd.f32 %v5110_v49, %v1686_v52  ;;  %3932 = vmatprep.mubr.f32.mxu0 %v1895_v27  ;;  %v1898_v56 = vadd.f32 %v5118_v28, %v1827_v40  ;;  %v5310_v49 = vld [vmem:[#allocation19] ss:$0 sm:$0xff] }
 0x2ee   : > { %3933 = vmatmul.mubr.f32.gmra.mxu0 %v1896_v13 }
 0x2ef   : > { %v1757_v1 = vmax.f32 %v1687_v51, 0.0  ;;  %v1897_v15 = vadd.f32 %v5118_v28, %v1826_v24  ;;  %v1829_v42 = vmul.f32 %v5113_v0, %v1758_v37 }
 0x2f1   : > { %v1828_v4 = vmul.f32 %v5113_v0, %v1757_v1  ;;  %3935 = vmatprep.mubr.f32.mxu0 %v1897_v15  ;;  %v1900_v31 = vadd.f32 %v5118_v28, %v1829_v42 }
 0x2f2   : > { %3936 = vmatmul.mubr.f32.gmra.mxu0 %v1898_v56 }
 0x2f3   : > { %v1899_v18 = vadd.f32 %v5118_v28, %v1828_v4 }
 0x2f5   : > { %3938 = vmatprep.mubr.f32.mxu0 %v1899_v18 }
 0x2f6   : > { %3939 = vmatmul.mubr.f32.gmra.mxu0 %v1900_v31 }
 0x33a   : > { %v3847_v46 = vpop.f32.mrf.mxu0 }
 0x33b   : > { %v1996_v0 = vadd.f32 %v3847_v46, %v5310_v49 }
 0x33c   : > { %v1990_v28 = vpop.f32.mrf.mxu0 }
 0x33d   : > { %v2632_v12 = vmul.f32 %v5312_v61, %v1996_v0  ;;  %v1991_v26 = vadd.f32 %v5310_v49, %v1990_v28 }
 0x33e   : > { %v3850_v44 = vpop.f32.mrf.mxu0 }
 0x33f   : > { %2696 = vst [vmem:[%s5318_s27 + $0x8] sm:$0xff] %v2632_v12  ;;  %v3129_v60 = vpack.c.bf16 %v1996_v0, %v1991_v26  ;;  %v2631_v14 = vmul.f32 %v5312_v61, %v1991_v26  ;;  %v2006_v30 = vadd.f32 %v3850_v44, %v5310_v49 }
 0x340   : > { %v2000_v34 = vpop.f32.mrf.mxu0 }
 0x341   : > { %3130 = vst [vmem:[%s5325_s26] sm:$0xff] %v3129_v60   ;;  %2695 = vst [vmem:[%s5318_s27] sm:$0xff] %v2631_v14  ;;  %v2634_v35 = vmul.f32 %v5312_v61, %v2006_v30  ;;  %v2001_v36 = vadd.f32 %v5310_v49, %v2000_v34 }
 0x342   : > { %v3853_v39 = vpop.f32.mrf.mxu0 }
 0x343   : > { %2698 = vst [vmem:[%s5318_s27 + $0x18] sm:$0xff] %v2634_v35  ;;  %v3134_v41 = vpack.c.bf16 %v2006_v30, %v2001_v36  ;;  %v2633_v43 = vmul.f32 %v5312_v61, %v2001_v36  ;;  %v2016_v45 = vadd.f32 %v3853_v39, %v5310_v49 }
 0x344   : > { %v2010_v47 = vpop.f32.mrf.mxu0 }
 0x345   : > { %3286 = vst [vmem:[%s5325_s26 + $0x8] sm:$0xff] %v3134_v41   ;;  %2697 = vst [vmem:[%s5318_s27 + $0x10] sm:$0xff] %v2633_v43  ;;  %v2636_v48 = vmul.f32 %v5312_v61, %v2016_v45  ;;  %v2011_v50 = vadd.f32 %v5310_v49, %v2010_v47 }
 0x346   : > { %v3856_v54 = vpop.f32.mrf.mxu0 }
 0x347   : > { %2700 = vst [vmem:[%s5318_s27 + $0x28] sm:$0xff] %v2636_v48  ;;  %v3139_v55 = vpack.c.bf16 %v2016_v45, %v2011_v50  ;;  %v2635_v57 = vmul.f32 %v5312_v61, %v2011_v50  ;;  %v2026_v58 = vadd.f32 %v3856_v54, %v5310_v49 }
 0x348   : > { %v2020_v59 = vpop.f32.mrf.mxu0 }
 0x349   : > { %3287 = vst [vmem:[%s5325_s26 + $0x10] sm:$0xff] %v3139_v55   ;;  %2699 = vst [vmem:[%s5318_s27 + $0x20] sm:$0xff] %v2635_v57  ;;  %v2638_v62 = vmul.f32 %v5312_v61, %v2026_v58  ;;  %v2021_v63 = vadd.f32 %v5310_v49, %v2020_v59 }
 0x34a   : > { %v3859_v2 = vpop.f32.mrf.mxu0 }
 0x34b   : > { %2702 = vst [vmem:[%s5318_s27 + $0x38] sm:$0xff] %v2638_v62  ;;  %v3144_v3 = vpack.c.bf16 %v2026_v58, %v2021_v63  ;;  %v2637_v6 = vmul.f32 %v5312_v61, %v2021_v63  ;;  %v2036_v7 = vadd.f32 %v3859_v2, %v5310_v49 }
 0x34c   : > { %v2030_v8 = vpop.f32.mrf.mxu0 }
 0x34d   : > { %3288 = vst [vmem:[%s5325_s26 + $0x18] sm:$0xff] %v3144_v3   ;;  %2701 = vst [vmem:[%s5318_s27 + $0x30] sm:$0xff] %v2637_v6  ;;  %v2640_v53 = vmul.f32 %v5312_v61, %v2036_v7  ;;  %v2031_v10 = vadd.f32 %v5310_v49, %v2030_v8 }
 0x34e   : > { %v3862_v9 = vpop.f32.mrf.mxu0 }
 0x34f   : > { %2704 = vst [vmem:[%s5318_s27 + $0x48] sm:$0xff] %v2640_v53  ;;  %v3149_v11 = vpack.c.bf16 %v2036_v7, %v2031_v10  ;;  %v2639_v16 = vmul.f32 %v5312_v61, %v2031_v10  ;;  %v2046_v17 = vadd.f32 %v3862_v9, %v5310_v49 }
 0x350   : > { %v2040_v19 = vpop.f32.mrf.mxu0 }
 0x351   : > { %3289 = vst [vmem:[%s5325_s26 + $0x20] sm:$0xff] %v3149_v11   ;;  %2703 = vst [vmem:[%s5318_s27 + $0x40] sm:$0xff] %v2639_v16  ;;  %v2642_v20 = vmul.f32 %v5312_v61, %v2046_v17  ;;  %v2041_v21 = vadd.f32 %v5310_v49, %v2040_v19 }
 0x352   : > { %v3865_v32 = vpop.f32.mrf.mxu0 }
 0x353   : > { %2706 = vst [vmem:[%s5318_s27 + $0x58] sm:$0xff] %v2642_v20  ;;  %v3154_v22 = vpack.c.bf16 %v2046_v17, %v2041_v21  ;;  %v2641_v23 = vmul.f32 %v5312_v61, %v2041_v21  ;;  %v2056_v25 = vadd.f32 %v3865_v32, %v5310_v49 }
 0x354   : > { %v2050_v29 = vpop.f32.mrf.mxu0 }
 0x355   : > { %3290 = vst [vmem:[%s5325_s26 + $0x28] sm:$0xff] %v3154_v22   ;;  %2705 = vst [vmem:[%s5318_s27 + $0x50] sm:$0xff] %v2641_v23  ;;  %v2644_v33 = vmul.f32 %v5312_v61, %v2056_v25  ;;  %v2051_v38 = vadd.f32 %v5310_v49, %v2050_v29 }
 0x356   : > { %v3868_v5 = vpop.f32.mrf.mxu0 }
 0x357   : > { %2708 = vst [vmem:[%s5318_s27 + $0x68] sm:$0xff] %v2644_v33  ;;  %v3159_v27 = vpack.c.bf16 %v2056_v25, %v2051_v38  ;;  %v2643_v40 = vmul.f32 %v5312_v61, %v2051_v38  ;;  %v2066_v52 = vadd.f32 %v3868_v5, %v5310_v49 }
 0x358   : > { %v2060_v13 = vpop.f32.mrf.mxu0 }
 0x359   : > { %3291 = vst [vmem:[%s5325_s26 + $0x30] sm:$0xff] %v3159_v27   ;;  %2707 = vst [vmem:[%s5318_s27 + $0x60] sm:$0xff] %v2643_v40  ;;  %v2646_v24 = vmul.f32 %v5312_v61, %v2066_v52  ;;  %v2061_v37 = vadd.f32 %v5310_v49, %v2060_v13 }
 0x35a   : > { %v3871_v51 = vpop.f32.mrf.mxu0 }
 0x35b   : > { %2710 = vst [vmem:[%s5318_s27 + $0x78] sm:$0xff] %v2646_v24  ;;  %v3164_v1 = vpack.c.bf16 %v2066_v52, %v2061_v37  ;;  %v2645_v15 = vmul.f32 %v5312_v61, %v2061_v37  ;;  %v2076_v42 = vadd.f32 %v3871_v51, %v5310_v49 }
 0x35c   : > { %v2070_v56 = vpop.f32.mrf.mxu0 }
 0x35d   : > { %3292 = vst [vmem:[%s5325_s26 + $0x38] sm:$0xff] %v3164_v1   ;;  %2709 = vst [vmem:[%s5318_s27 + $0x70] sm:$0xff] %v2645_v15  ;;  %v2648_v4 = vmul.f32 %v5312_v61, %v2076_v42  ;;  %v2071_v18 = vadd.f32 %v5310_v49, %v2070_v56 }
 0x35e   : > { %v3874_v31 = vpop.f32.mrf.mxu0 }
 0x35f   : > { %2712 = vst [vmem:[%s5318_s27 + $0x88] sm:$0xff] %v2648_v4  ;;  %v3169_v46 = vpack.c.bf16 %v2076_v42, %v2071_v18  ;;  %v2647_v0 = vmul.f32 %v5312_v61, %v2071_v18  ;;  %v2086_v28 = vadd.f32 %v3874_v31, %v5310_v49 }
 0x360   : > { %v2080_v12 = vpop.f32.mrf.mxu0 }
 0x361   : > { %3293 = vst [vmem:[%s5325_s26 + $0x40] sm:$0xff] %v3169_v46   ;;  %2711 = vst [vmem:[%s5318_s27 + $0x80] sm:$0xff] %v2647_v0  ;;  %v2650_v26 = vmul.f32 %v5312_v61, %v2086_v28  ;;  %v2081_v44 = vadd.f32 %v5310_v49, %v2080_v12 }
 0x362   : > { %v3877_v60 = vpop.f32.mrf.mxu0 }
 0x363   : > { %2714 = vst [vmem:[%s5318_s27 + $0x98] sm:$0xff] %v2650_v26  ;;  %v3174_v14 = vpack.c.bf16 %v2086_v28, %v2081_v44  ;;  %v2649_v30 = vmul.f32 %v5312_v61, %v2081_v44  ;;  %v2096_v34 = vadd.f32 %v3877_v60, %v5310_v49 }
 0x364   : > { %v2090_v35 = vpop.f32.mrf.mxu0 }
 0x365   : > { %3294 = vst [vmem:[%s5325_s26 + $0x48] sm:$0xff] %v3174_v14   ;;  %2713 = vst [vmem:[%s5318_s27 + $0x90] sm:$0xff] %v2649_v30  ;;  %v2652_v36 = vmul.f32 %v5312_v61, %v2096_v34  ;;  %v2091_v39 = vadd.f32 %v5310_v49, %v2090_v35 }
 0x366   : > { %v3880_v41 = vpop.f32.mrf.mxu0 }
 0x367   : > { %2716 = vst [vmem:[%s5318_s27 + $0xa8] sm:$0xff] %v2652_v36  ;;  %v3179_v43 = vpack.c.bf16 %v2096_v34, %v2091_v39  ;;  %v2651_v45 = vmul.f32 %v5312_v61, %v2091_v39  ;;  %v2106_v47 = vadd.f32 %v3880_v41, %v5310_v49 }
 0x368   : > { %v2100_v48 = vpop.f32.mrf.mxu0 }
 0x369   : > { %3295 = vst [vmem:[%s5325_s26 + $0x50] sm:$0xff] %v3179_v43   ;;  %2715 = vst [vmem:[%s5318_s27 + $0xa0] sm:$0xff] %v2651_v45  ;;  %v2654_v50 = vmul.f32 %v5312_v61, %v2106_v47  ;;  %v2101_v54 = vadd.f32 %v5310_v49, %v2100_v48 }
 0x36a   : > { %v3883_v55 = vpop.f32.mrf.mxu0 }
 0x36b   : > { %2718 = vst [vmem:[%s5318_s27 + $0xb8] sm:$0xff] %v2654_v50  ;;  %v3184_v57 = vpack.c.bf16 %v2106_v47, %v2101_v54  ;;  %v2653_v58 = vmul.f32 %v5312_v61, %v2101_v54  ;;  %v2116_v59 = vadd.f32 %v3883_v55, %v5310_v49 }
 0x36c   : > { %v2110_v62 = vpop.f32.mrf.mxu0 }
 0x36d   : > { %3296 = vst [vmem:[%s5325_s26 + $0x58] sm:$0xff] %v3184_v57   ;;  %2717 = vst [vmem:[%s5318_s27 + $0xb0] sm:$0xff] %v2653_v58  ;;  %v2656_v63 = vmul.f32 %v5312_v61, %v2116_v59  ;;  %v2111_v2 = vadd.f32 %v5310_v49, %v2110_v62 }
 0x36e   : > { %v3886_v3 = vpop.f32.mrf.mxu0 }
 0x36f   : > { %2720 = vst [vmem:[%s5318_s27 + $0xc8] sm:$0xff] %v2656_v63  ;;  %v3189_v6 = vpack.c.bf16 %v2116_v59, %v2111_v2  ;;  %v2655_v7 = vmul.f32 %v5312_v61, %v2111_v2  ;;  %v2126_v8 = vadd.f32 %v3886_v3, %v5310_v49 }
 0x370   : > { %v2120_v53 = vpop.f32.mrf.mxu0 }
 0x371   : > { %3297 = vst [vmem:[%s5325_s26 + $0x60] sm:$0xff] %v3189_v6   ;;  %2719 = vst [vmem:[%s5318_s27 + $0xc0] sm:$0xff] %v2655_v7  ;;  %v2658_v10 = vmul.f32 %v5312_v61, %v2126_v8  ;;  %v2121_v9 = vadd.f32 %v5310_v49, %v2120_v53 }
 0x372   : > { %v3889_v11 = vpop.f32.mrf.mxu0 }
 0x373   : > { %2722 = vst [vmem:[%s5318_s27 + $0xd8] sm:$0xff] %v2658_v10  ;;  %v3194_v16 = vpack.c.bf16 %v2126_v8, %v2121_v9  ;;  %v2657_v17 = vmul.f32 %v5312_v61, %v2121_v9  ;;  %v2136_v19 = vadd.f32 %v3889_v11, %v5310_v49 }
 0x374   : > { %v2130_v20 = vpop.f32.mrf.mxu0 }
 0x375   : > { %3298 = vst [vmem:[%s5325_s26 + $0x68] sm:$0xff] %v3194_v16   ;;  %2721 = vst [vmem:[%s5318_s27 + $0xd0] sm:$0xff] %v2657_v17  ;;  %v2660_v21 = vmul.f32 %v5312_v61, %v2136_v19  ;;  %v2131_v32 = vadd.f32 %v5310_v49, %v2130_v20 }
 0x376   : > { %v3892_v22 = vpop.f32.mrf.mxu0 }
 0x377   : > { %2724 = vst [vmem:[%s5318_s27 + $0xe8] sm:$0xff] %v2660_v21  ;;  %v3199_v23 = vpack.c.bf16 %v2136_v19, %v2131_v32  ;;  %v2659_v25 = vmul.f32 %v5312_v61, %v2131_v32  ;;  %v2146_v29 = vadd.f32 %v3892_v22, %v5310_v49 }
 0x378   : > { %v2140_v33 = vpop.f32.mrf.mxu0 }
 0x379   : > { %3299 = vst [vmem:[%s5325_s26 + $0x70] sm:$0xff] %v3199_v23   ;;  %2723 = vst [vmem:[%s5318_s27 + $0xe0] sm:$0xff] %v2659_v25  ;;  %v2662_v38 = vmul.f32 %v5312_v61, %v2146_v29  ;;  %v2141_v5 = vadd.f32 %v5310_v49, %v2140_v33 }
 0x37a   : > { %v3895_v27 = vpop.f32.mrf.mxu0 }
 0x37b   : > { %2726 = vst [vmem:[%s5318_s27 + $0xf8] sm:$0xff] %v2662_v38  ;;  %v3204_v40 = vpack.c.bf16 %v2146_v29, %v2141_v5  ;;  %v2661_v52 = vmul.f32 %v5312_v61, %v2141_v5  ;;  %v2156_v13 = vadd.f32 %v3895_v27, %v5310_v49 }
 0x37c   : > { %v2150_v24 = vpop.f32.mrf.mxu0 }
 0x37d   : > { %3300 = vst [vmem:[%s5325_s26 + $0x78] sm:$0xff] %v3204_v40   ;;  %2725 = vst [vmem:[%s5318_s27 + $0xf0] sm:$0xff] %v2661_v52  ;;  %v2664_v37 = vmul.f32 %v5312_v61, %v2156_v13  ;;  %v2151_v51 = vadd.f32 %v5310_v49, %v2150_v24 }
 0x37e   : > { %v3898_v1 = vpop.f32.mrf.mxu0 }
 0x37f   : > { %2728 = vst [vmem:[%s5318_s27 + $0x108] sm:$0xff] %v2664_v37  ;;  %v3209_v15 = vpack.c.bf16 %v2156_v13, %v2151_v51  ;;  %v2663_v42 = vmul.f32 %v5312_v61, %v2151_v51  ;;  %v2166_v56 = vadd.f32 %v3898_v1, %v5310_v49 }
 0x380   : > { %v2160_v4 = vpop.f32.mrf.mxu0 }
 0x381   : > { %3301 = vst [vmem:[%s5325_s26 + $0x80] sm:$0xff] %v3209_v15   ;;  %2727 = vst [vmem:[%s5318_s27 + $0x100] sm:$0xff] %v2663_v42  ;;  %v2666_v18 = vmul.f32 %v5312_v61, %v2166_v56  ;;  %v2161_v31 = vadd.f32 %v5310_v49, %v2160_v4 }
 0x382   : > { %v3901_v46 = vpop.f32.mrf.mxu0 }
 0x383   : > { %2730 = vst [vmem:[%s5318_s27 + $0x118] sm:$0xff] %v2666_v18  ;;  %v3214_v0 = vpack.c.bf16 %v2166_v56, %v2161_v31  ;;  %v2665_v28 = vmul.f32 %v5312_v61, %v2161_v31  ;;  %v2176_v12 = vadd.f32 %v3901_v46, %v5310_v49 }
 0x384   : > { %v2170_v26 = vpop.f32.mrf.mxu0 }
 0x385   : > { %3302 = vst [vmem:[%s5325_s26 + $0x88] sm:$0xff] %v3214_v0   ;;  %2729 = vst [vmem:[%s5318_s27 + $0x110] sm:$0xff] %v2665_v28  ;;  %v2668_v44 = vmul.f32 %v5312_v61, %v2176_v12  ;;  %v2171_v60 = vadd.f32 %v5310_v49, %v2170_v26 }
 0x386   : > { %v3904_v14 = vpop.f32.mrf.mxu0 }
 0x387   : > { %2732 = vst [vmem:[%s5318_s27 + $0x128] sm:$0xff] %v2668_v44  ;;  %v3219_v30 = vpack.c.bf16 %v2176_v12, %v2171_v60  ;;  %v2667_v34 = vmul.f32 %v5312_v61, %v2171_v60  ;;  %v2186_v35 = vadd.f32 %v3904_v14, %v5310_v49 }
 0x388   : > { %v2180_v36 = vpop.f32.mrf.mxu0 }
 0x389   : > { %3303 = vst [vmem:[%s5325_s26 + $0x90] sm:$0xff] %v3219_v30   ;;  %2731 = vst [vmem:[%s5318_s27 + $0x120] sm:$0xff] %v2667_v34  ;;  %v2670_v39 = vmul.f32 %v5312_v61, %v2186_v35  ;;  %v2181_v41 = vadd.f32 %v5310_v49, %v2180_v36 }
 0x38a   : > { %v3907_v43 = vpop.f32.mrf.mxu0 }
 0x38b   : > { %2734 = vst [vmem:[%s5318_s27 + $0x138] sm:$0xff] %v2670_v39  ;;  %v3224_v45 = vpack.c.bf16 %v2186_v35, %v2181_v41  ;;  %v2669_v47 = vmul.f32 %v5312_v61, %v2181_v41  ;;  %v2196_v48 = vadd.f32 %v3907_v43, %v5310_v49 }
 0x38c   : > { %v2190_v50 = vpop.f32.mrf.mxu0 }
 0x38d   : > { %3304 = vst [vmem:[%s5325_s26 + $0x98] sm:$0xff] %v3224_v45   ;;  %2733 = vst [vmem:[%s5318_s27 + $0x130] sm:$0xff] %v2669_v47  ;;  %v2672_v54 = vmul.f32 %v5312_v61, %v2196_v48  ;;  %v2191_v55 = vadd.f32 %v5310_v49, %v2190_v50 }
 0x38e   : > { %v3910_v57 = vpop.f32.mrf.mxu0 }
 0x38f   : > { %2736 = vst [vmem:[%s5318_s27 + $0x148] sm:$0xff] %v2672_v54  ;;  %v3229_v58 = vpack.c.bf16 %v2196_v48, %v2191_v55  ;;  %v2671_v59 = vmul.f32 %v5312_v61, %v2191_v55  ;;  %v2206_v62 = vadd.f32 %v3910_v57, %v5310_v49 }
 0x390   : > { %v2200_v63 = vpop.f32.mrf.mxu0 }
 0x391   : > { %3305 = vst [vmem:[%s5325_s26 + $0xa0] sm:$0xff] %v3229_v58   ;;  %2735 = vst [vmem:[%s5318_s27 + $0x140] sm:$0xff] %v2671_v59  ;;  %v2674_v2 = vmul.f32 %v5312_v61, %v2206_v62  ;;  %v2201_v3 = vadd.f32 %v5310_v49, %v2200_v63 }
 0x392   : > { %v3913_v6 = vpop.f32.mrf.mxu0 }
 0x393   : > { %2738 = vst [vmem:[%s5318_s27 + $0x158] sm:$0xff] %v2674_v2  ;;  %v3234_v7 = vpack.c.bf16 %v2206_v62, %v2201_v3  ;;  %v2673_v8 = vmul.f32 %v5312_v61, %v2201_v3  ;;  %v2216_v53 = vadd.f32 %v3913_v6, %v5310_v49 }
 0x394   : > { %v2210_v10 = vpop.f32.mrf.mxu0 }
 0x395   : > { %3306 = vst [vmem:[%s5325_s26 + $0xa8] sm:$0xff] %v3234_v7   ;;  %2737 = vst [vmem:[%s5318_s27 + $0x150] sm:$0xff] %v2673_v8  ;;  %v2676_v9 = vmul.f32 %v5312_v61, %v2216_v53  ;;  %v2211_v11 = vadd.f32 %v5310_v49, %v2210_v10 }
 0x396   : > { %v3916_v16 = vpop.f32.mrf.mxu0 }
 0x397   : > { %2740 = vst [vmem:[%s5318_s27 + $0x168] sm:$0xff] %v2676_v9  ;;  %v3239_v17 = vpack.c.bf16 %v2216_v53, %v2211_v11  ;;  %v2675_v19 = vmul.f32 %v5312_v61, %v2211_v11  ;;  %v2226_v20 = vadd.f32 %v3916_v16, %v5310_v49 }
 0x398   : > { %v2220_v21 = vpop.f32.mrf.mxu0 }
 0x399   : > { %3307 = vst [vmem:[%s5325_s26 + $0xb0] sm:$0xff] %v3239_v17   ;;  %2739 = vst [vmem:[%s5318_s27 + $0x160] sm:$0xff] %v2675_v19  ;;  %v2678_v32 = vmul.f32 %v5312_v61, %v2226_v20  ;;  %v2221_v22 = vadd.f32 %v5310_v49, %v2220_v21 }
 0x39a   : > { %v3919_v23 = vpop.f32.mrf.mxu0 }
 0x39b   : > { %2742 = vst [vmem:[%s5318_s27 + $0x178] sm:$0xff] %v2678_v32  ;;  %v3244_v25 = vpack.c.bf16 %v2226_v20, %v2221_v22  ;;  %v2677_v29 = vmul.f32 %v5312_v61, %v2221_v22  ;;  %v2236_v33 = vadd.f32 %v3919_v23, %v5310_v49 }
 0x39c   : > { %v2230_v38 = vpop.f32.mrf.mxu0 }
 0x39d   : > { %3308 = vst [vmem:[%s5325_s26 + $0xb8] sm:$0xff] %v3244_v25   ;;  %2741 = vst [vmem:[%s5318_s27 + $0x170] sm:$0xff] %v2677_v29  ;;  %v2680_v5 = vmul.f32 %v5312_v61, %v2236_v33  ;;  %v2231_v27 = vadd.f32 %v5310_v49, %v2230_v38 }
 0x39e   : > { %v3922_v40 = vpop.f32.mrf.mxu0 }
 0x39f   : > { %2744 = vst [vmem:[%s5318_s27 + $0x188] sm:$0xff] %v2680_v5  ;;  %v3249_v52 = vpack.c.bf16 %v2236_v33, %v2231_v27  ;;  %v2679_v13 = vmul.f32 %v5312_v61, %v2231_v27  ;;  %v2246_v24 = vadd.f32 %v3922_v40, %v5310_v49 }
 0x3a0   : > { %v2240_v37 = vpop.f32.mrf.mxu0 }
 0x3a1   : > { %3309 = vst [vmem:[%s5325_s26 + $0xc0] sm:$0xff] %v3249_v52   ;;  %2743 = vst [vmem:[%s5318_s27 + $0x180] sm:$0xff] %v2679_v13  ;;  %v2682_v51 = vmul.f32 %v5312_v61, %v2246_v24  ;;  %v2241_v1 = vadd.f32 %v5310_v49, %v2240_v37 }
 0x3a2   : > { %v3925_v15 = vpop.f32.mrf.mxu0 }
 0x3a3   : > { %2746 = vst [vmem:[%s5318_s27 + $0x198] sm:$0xff] %v2682_v51  ;;  %v3254_v42 = vpack.c.bf16 %v2246_v24, %v2241_v1  ;;  %v2681_v56 = vmul.f32 %v5312_v61, %v2241_v1  ;;  %v2256_v4 = vadd.f32 %v3925_v15, %v5310_v49 }
 0x3a4   : > { %v2250_v18 = vpop.f32.mrf.mxu0 }
 0x3a5   : > { %3310 = vst [vmem:[%s5325_s26 + $0xc8] sm:$0xff] %v3254_v42   ;;  %2745 = vst [vmem:[%s5318_s27 + $0x190] sm:$0xff] %v2681_v56  ;;  %v2684_v31 = vmul.f32 %v5312_v61, %v2256_v4  ;;  %v2251_v46 = vadd.f32 %v5310_v49, %v2250_v18 }
 0x3a6   : > { %v3928_v0 = vpop.f32.mrf.mxu0 }
 0x3a7   : > { %2748 = vst [vmem:[%s5318_s27 + $0x1a8] sm:$0xff] %v2684_v31  ;;  %v3259_v28 = vpack.c.bf16 %v2256_v4, %v2251_v46  ;;  %v2683_v12 = vmul.f32 %v5312_v61, %v2251_v46  ;;  %v2266_v26 = vadd.f32 %v3928_v0, %v5310_v49 }
 0x3a8   : > { %v2260_v44 = vpop.f32.mrf.mxu0 }
 0x3a9   : > { %3311 = vst [vmem:[%s5325_s26 + $0xd0] sm:$0xff] %v3259_v28   ;;  %2747 = vst [vmem:[%s5318_s27 + $0x1a0] sm:$0xff] %v2683_v12  ;;  %v2686_v60 = vmul.f32 %v5312_v61, %v2266_v26  ;;  %v2261_v14 = vadd.f32 %v5310_v49, %v2260_v44 }
 0x3aa   : > { %v3931_v30 = vpop.f32.mrf.mxu0 }
 0x3ab   : > { %2750 = vst [vmem:[%s5318_s27 + $0x1b8] sm:$0xff] %v2686_v60  ;;  %v3264_v34 = vpack.c.bf16 %v2266_v26, %v2261_v14  ;;  %v2685_v35 = vmul.f32 %v5312_v61, %v2261_v14  ;;  %v2276_v36 = vadd.f32 %v3931_v30, %v5310_v49 }
 0x3ac   : > { %v2270_v39 = vpop.f32.mrf.mxu0 }
 0x3ad   : > { %3312 = vst [vmem:[%s5325_s26 + $0xd8] sm:$0xff] %v3264_v34   ;;  %2749 = vst [vmem:[%s5318_s27 + $0x1b0] sm:$0xff] %v2685_v35  ;;  %v2688_v41 = vmul.f32 %v5312_v61, %v2276_v36  ;;  %v2271_v43 = vadd.f32 %v5310_v49, %v2270_v39 }
 0x3ae   : > { %v3934_v45 = vpop.f32.mrf.mxu0 }
 0x3af   : > { %2752 = vst [vmem:[%s5318_s27 + $0x1c8] sm:$0xff] %v2688_v41  ;;  %v3269_v47 = vpack.c.bf16 %v2276_v36, %v2271_v43  ;;  %v2687_v48 = vmul.f32 %v5312_v61, %v2271_v43  ;;  %v2286_v50 = vadd.f32 %v3934_v45, %v5310_v49 }
 0x3b0   : > { %v2280_v54 = vpop.f32.mrf.mxu0 }
 0x3b1   : > { %3313 = vst [vmem:[%s5325_s26 + $0xe0] sm:$0xff] %v3269_v47   ;;  %2751 = vst [vmem:[%s5318_s27 + $0x1c0] sm:$0xff] %v2687_v48  ;;  %v2690_v55 = vmul.f32 %v5312_v61, %v2286_v50  ;;  %v2281_v57 = vadd.f32 %v5310_v49, %v2280_v54 }
 0x3b2   : > { %v3937_v58 = vpop.f32.mrf.mxu0 }
 0x3b3   : > { %2754 = vst [vmem:[%s5318_s27 + $0x1d8] sm:$0xff] %v2690_v55  ;;  %v3274_v59 = vpack.c.bf16 %v2286_v50, %v2281_v57  ;;  %v2689_v62 = vmul.f32 %v5312_v61, %v2281_v57  ;;  %v2296_v63 = vadd.f32 %v3937_v58, %v5310_v49 }
 0x3b4   : > { %v2290_v2 = vpop.f32.mrf.mxu0 }
 0x3b5   : > { %3314 = vst [vmem:[%s5325_s26 + $0xe8] sm:$0xff] %v3274_v59   ;;  %2753 = vst [vmem:[%s5318_s27 + $0x1d0] sm:$0xff] %v2689_v62  ;;  %v2692_v3 = vmul.f32 %v5312_v61, %v2296_v63  ;;  %v2291_v6 = vadd.f32 %v5310_v49, %v2290_v2 }
 0x3b6   : > { %v3940_v7 = vpop.f32.mrf.mxu0 }
 0x3b7   : > { %2756 = vst [vmem:[%s5318_s27 + $0x1e8] sm:$0xff] %v2692_v3  ;;  %v3279_v8 = vpack.c.bf16 %v2296_v63, %v2291_v6  ;;  %v2691_v53 = vmul.f32 %v5312_v61, %v2291_v6  ;;  %v2306_v10 = vadd.f32 %v3940_v7, %v5310_v49 }
 0x3b8   : > { %v2300_v9 = vpop.f32.mrf.mxu0 }
 0x3b9   : > { %3315 = vst [vmem:[%s5325_s26 + $0xf0] sm:$0xff] %v3279_v8   ;;  %2755 = vst [vmem:[%s5318_s27 + $0x1e0] sm:$0xff] %v2691_v53  ;;  %v2694_v11 = vmul.f32 %v5312_v61, %v2306_v10  ;;  %v2301_v16 = vadd.f32 %v5310_v49, %v2300_v9 }
 0x3bb   : > { %2758 = vst [vmem:[%s5318_s27 + $0x1f8] sm:$0xff] %v2694_v11  ;;  %v3284_v17 = vpack.c.bf16 %v2306_v10, %v2301_v16  ;;  %v2693_v19 = vmul.f32 %v5312_v61, %v2301_v16 }
 0x3bd   : > { %3316 = vst [vmem:[%s5325_s26 + $0xf8] sm:$0xff] %v3284_v17   ;;  %2757 = vst [vmem:[%s5318_s27 + $0x1f0] sm:$0xff] %v2693_v19 }
 0x3be PF: > { %p30_p8 = scmp.ge.s32.totalorder %s4679_s23, 4   ;;  %s5601_s27 = smov %s4449_s28 }
 0x3bf   : > { %s5602_s28 = smov %s4453_s29  ;;  %s5603_s29 = smov %s4691_s22 }
 0x3c0   : > { %s5604_s30 = smov %s4679_s23  ;;  %32 = sbr.rel (!%p30_p8) target bundleno = 13 (0xd), region = 160 }
 0x3c5   :  { %2798 = vsyncpa [#allocation4], 1 }
 0x3c6   :  { %2800 = vsyncpa [#allocation4 + $0x1], 1 }
 0x3c7   :  { %2801 = vsyncpa [#allocation6], 1 }
 0x3c8   :  { %2802 = vsyncpa [#allocation9], 1 }
 0x3c9   :  { %2803 = vsyncpa [#allocation12], 1 }
 0x3ca   :  { %2804 = vsyncpa [#allocation15], 1 }
 0x3cb   :  { %2805 = vsyncpa [#allocation18], 1 }

</bundles_post_ra>
